<compile_context>
chip_gen: v6e
topology: v6e:2x2x1
jax: 0.10.0
libtpu: 0.0.40
codegen_flags: <defaults>
</compile_context>

<pallas_src>
import math
from functools import partial

import numpy as np
import jax
import jax.numpy as jnp
from jax.experimental import pallas as pl
from jax.experimental.pallas import tpu as pltpu


NUM_FREQUENCIES = 8                    # module default
IN_FEATURES = 2                        # fixed by PosEncodingNeRF2D
OUT_DIM = IN_FEATURES + 2 * IN_FEATURES * NUM_FREQUENCIES     # 2 + 4*8 = 34
_NSC = IN_FEATURES * NUM_FREQUENCIES   # 16 sin rows / 16 cos rows
_NROWS = _NSC + 1                      # 17 rows per (sin|cos) plane; OUT_DIM == 2*_NROWS

# Row k of the kernel's angle block is 2^(k//2) * pi * c_{k%2} (frequency-major,
# feature-minor) which, after per-point interleave of the sin/cos planes, is exactly
# the PyTorch loop order.  Column j holds the scale applied to coordinate j (zero for
# the unused coordinate) so the kernel needs no per-row select — just mul/mul/add.
_ROW_SCALES = np.zeros((_NSC, IN_FEATURES), dtype=np.float32)
for _k in range(_NSC):
    _ROW_SCALES[_k, _k % IN_FEATURES] = (2.0 ** (_k // IN_FEATURES)) * np.pi


def _posenc_kernel(scale_ref, c_ref, o_ref):
    """scale_ref: (16, 2) f32; c_ref: (2, tn) f32 coords; o_ref: (2, 17, tn) f32."""
    c = c_ref[...]                                     # (2, tn)
    s = scale_ref[...]                                 # (16, 2), passed as input (no captured consts)
    # (1,tn) * (16,1) broadcasts to (16,tn); one of the two products is zero per row.
    ang = c[0:1, :] * s[:, 0:1] + c[1:2, :] * s[:, 1:2]
    # NOTE: sin/cos are evaluated directly (not via a double-angle recurrence) to keep
    # exact f32 parity with the polynomial reference; the recurrence would cut VALU
    # work ~5-8x on v7x if a looser tolerance were acceptable.
    o_ref[0, :, :] = jnp.concatenate([c[0:1, :], jnp.sin(ang)], axis=0)   # [x;  sin rows]
    o_ref[1, :, :] = jnp.concatenate([c[1:2, :], jnp.cos(ang)], axis=0)   # [y;  cos rows]


def _round_up(x, m):
    return (x + m - 1) // m * m


@partial(jax.jit, static_argnames=("tile_n",))
def pos_encoding_nerf_2d(coords, *, tile_n=32768):
    """coords: (B, ..., 2) float -> (B, N, OUT_DIM) f32, matching PosEncodingNeRF2D.forward."""
    b = coords.shape[0]
    c = coords.reshape(b, -1, IN_FEATURES).astype(jnp.float32)
    n = c.shape[1]
    m = b * n

    # Pad M only to a multiple of 1024 (8x128), then split into near-equal 1024-aligned
    # tiles no larger than tile_n — avoids the up-to-2x waste of rounding M to a whole tile.
    tile_n = max(1024, _round_up(tile_n, 1024))
    m_1024 = _round_up(m, 1024)
    nsteps = pl.cdiv(m_1024, tile_n)
    tn = _round_up(pl.cdiv(m_1024, nsteps), 1024)
    m_pad = nsteps * tn

    flat = c.reshape(m, IN_FEATURES)
    if m_pad != m:
        # Padded points are zeros -> sin(0)/cos(0); sliced off after the kernel.
        flat = jnp.pad(flat, ((0, m_pad - m), (0, 0)))
    flat_t = flat.T                                     # (2, m_pad): cheap (8 B/point)

    out_planes = pl.pallas_call(
        _posenc_kernel,
        out_shape=jax.ShapeDtypeStruct((2, _NROWS, m_pad), jnp.float32),
        grid_spec=pltpu.PrefetchScalarGridSpec(
            num_scalar_prefetch=0,
            grid=(nsteps,),
            in_specs=[
                pl.BlockSpec((_NSC, IN_FEATURES), lambda i: (0, 0)),   # tiny scale table
                pl.BlockSpec((IN_FEATURES, tn), lambda i: (0, i)),      # coord tile
            ],
            out_specs=pl.BlockSpec((2, _NROWS, tn), lambda i: (0, 0, i)),
        ),
        compiler_params=pltpu.CompilerParams(
            dimension_semantics=("parallel",),
            vmem_limit_bytes=48 * 1024 * 1024,
        ),
        cost_estimate=pl.CostEstimate(
            flops=3 * _NSC * m_pad,
            transcendentals=2 * _NSC * m_pad,
            bytes_accessed=4 * (IN_FEATURES + 2 * _NROWS) * m_pad,
        ),
    )(jnp.asarray(_ROW_SCALES), flat_t)

    # (2,17,M) -> (M,17,2) -> (M,34): one fused transpose/reshape/slice in XLA; the per-point
    # channel order is already PyTorch's [x, y, sin, cos, sin, cos, ...] (no gather needed).
    # TODO(synk): in a full SIREN/NeRF pipeline, skip this relayout and fuse the first linear
    # layer into the kernel instead — the channel-major (34, tn) tile is the MXU-friendly operand.
    out = jnp.transpose(out_planes, (2, 1, 0)).reshape(m_pad, OUT_DIM)[:m]
    return out.reshape(b, n, OUT_DIM)


def _reference(coords):
    """Pure-JAX port of PosEncodingNeRF2D.forward."""
    b = coords.shape[0]
    c = coords.reshape(b, -1, IN_FEATURES).astype(jnp.float32)
    pieces = [c]
    for i in range(NUM_FREQUENCIES):
        for j in range(IN_FEATURES):
            arg = (2.0 ** i) * math.pi * c[..., j:j + 1]
            pieces.append(jnp.sin(arg))
            pieces.append(jnp.cos(arg))
    return jnp.concatenate(pieces, axis=-1)


if __name__ == "__main__":
    key = jax.random.PRNGKey(0)
    # Small image-grid-like coords: batch=2, 16x16 spatial grid, 2 coord channels.
    coords = jax.random.uniform(key, (2, 16, 16, 2), dtype=jnp.float32,
                                minval=-1.0, maxval=1.0)

    out = pos_encoding_nerf_2d(coords)
    out = jax.block_until_ready(out)

    ref = _reference(coords)
    assert out.shape == (2, 256, OUT_DIM), out.shape
    # atol 3e-5: f32 ulp of the top-octave argument (|x| ~ 128*pi ~ 402) is ~3e-5, so allow
    # ~1 ulp of range-reduction difference between the Mosaic and XLA sin/cos expansions.
    assert jnp.allclose(out, ref, atol=3e-5, rtol=1e-5), float(jnp.max(jnp.abs(out - ref)))

    print("KERNEL_OK")
</pallas_src>

<mosaic_0001>
module attributes {stable_mosaic.version = 11 : i64} {
  func.func @_posenc_kernel(%arg0: i32, %arg1: memref<16x2xf32, #tpu.memory_space<vmem>>, %arg2: memref<2x1024xf32, #tpu.memory_space<vmem>>, %arg3: memref<2x17x1024xf32, #tpu.memory_space<vmem>>) attributes {dimension_semantics = [#tpu.dimension_semantics<parallel>], iteration_bounds = array<i64: 1>, scalar_prefetch = 0 : i64, scratch_operands = 0 : i64, tpu.core_type = #tpu.core_type<tc>, window_params = [{pipeline_mode = #tpu.pipeline_mode<synchronous>, transform_indices = @transform_0, window_bounds = array<i64: 16, 2>}, {transform_indices = @transform_1, window_bounds = array<i64: 2, 1024>}, {transform_indices = @transform_2, window_bounds = array<i64: 2, 17, 1024>}]} {
    %c0 = arith.constant 0 : index
    %c0_0 = arith.constant 0 : index
    %0 = vector.load %arg2[%c0, %c0_0] : memref<2x1024xf32, #tpu.memory_space<vmem>>, vector<2x1024xf32>
    %c0_1 = arith.constant 0 : index
    %c0_2 = arith.constant 0 : index
    %1 = vector.load %arg1[%c0_1, %c0_2] : memref<16x2xf32, #tpu.memory_space<vmem>>, vector<16x2xf32>
    %2 = vector.extract_strided_slice %0 {offsets = [0, 0], sizes = [1, 1024], strides = [1, 1]} : vector<2x1024xf32> to vector<1x1024xf32>
    %3 = vector.extract_strided_slice %1 {offsets = [0, 0], sizes = [16, 1], strides = [1, 1]} : vector<16x2xf32> to vector<16x1xf32>
    %4 = vector.broadcast %2 : vector<1x1024xf32> to vector<16x1024xf32>
    %5 = vector.broadcast %3 : vector<16x1xf32> to vector<16x1024xf32>
    %6 = arith.mulf %4, %5 : vector<16x1024xf32>
    %7 = vector.extract_strided_slice %0 {offsets = [1, 0], sizes = [1, 1024], strides = [1, 1]} : vector<2x1024xf32> to vector<1x1024xf32>
    %8 = vector.extract_strided_slice %1 {offsets = [0, 1], sizes = [16, 1], strides = [1, 1]} : vector<16x2xf32> to vector<16x1xf32>
    %9 = vector.broadcast %7 : vector<1x1024xf32> to vector<16x1024xf32>
    %10 = vector.broadcast %8 : vector<16x1xf32> to vector<16x1024xf32>
    %11 = arith.mulf %9, %10 : vector<16x1024xf32>
    %12 = arith.addf %6, %11 : vector<16x1024xf32>
    %13 = vector.extract_strided_slice %0 {offsets = [0, 0], sizes = [1, 1024], strides = [1, 1]} : vector<2x1024xf32> to vector<1x1024xf32>
    %14 = math.sin %12 : vector<16x1024xf32>
    %15 = tpu.concatenate %13, %14 in 0 : vector<1x1024xf32>, vector<16x1024xf32> -> vector<17x1024xf32>
    %c0_3 = arith.constant 0 : index
    %c0_4 = arith.constant 0 : index
    %c0_5 = arith.constant 0 : index
    %16 = vector.load %arg3[%c0_3, %c0_4, %c0_5] : memref<2x17x1024xf32, #tpu.memory_space<vmem>>, vector<1x17x1024xf32>
    %17 = vector.shape_cast %16 : vector<1x17x1024xf32> to vector<17x1024xf32>
    %18 = vector.shape_cast %15 : vector<17x1024xf32> to vector<1x17x1024xf32>
    tpu.vector_store %arg3[%c0_3, %c0_4, %c0_5], %18 {strides = array<i32>} : memref<2x17x1024xf32, #tpu.memory_space<vmem>>, vector<1x17x1024xf32>,
    %19 = vector.extract_strided_slice %0 {offsets = [1, 0], sizes = [1, 1024], strides = [1, 1]} : vector<2x1024xf32> to vector<1x1024xf32>
    %20 = math.cos %12 : vector<16x1024xf32>
    %21 = tpu.concatenate %19, %20 in 0 : vector<1x1024xf32>, vector<16x1024xf32> -> vector<17x1024xf32>
    %c1 = arith.constant 1 : index
    %c0_6 = arith.constant 0 : index
    %c0_7 = arith.constant 0 : index
    %22 = vector.load %arg3[%c1, %c0_6, %c0_7] : memref<2x17x1024xf32, #tpu.memory_space<vmem>>, vector<1x17x1024xf32>
    %23 = vector.shape_cast %22 : vector<1x17x1024xf32> to vector<17x1024xf32>
    %24 = vector.shape_cast %21 : vector<17x1024xf32> to vector<1x17x1024xf32>
    tpu.vector_store %arg3[%c1, %c0_6, %c0_7], %24 {strides = array<i32>} : memref<2x17x1024xf32, #tpu.memory_space<vmem>>, vector<1x17x1024xf32>,
    return
  }
  func.func @transform_0(%arg0: i32) -> (i32, i32) {
    %c0_i32 = arith.constant 0 : i32
    %c0_i32_0 = arith.constant 0 : i32
    %c0_i32_1 = arith.constant 0 : i32
    return %c0_i32, %c0_i32_0 : i32, i32
  }
  func.func @transform_1(%arg0: i32) -> (i32, i32) {
    %c0_i32 = arith.constant 0 : i32
    %c0_i32_0 = arith.constant 0 : i32
    return %c0_i32, %arg0 : i32, i32
  }
  func.func @transform_2(%arg0: i32) -> (i32, i32, i32) {
    %c0_i32 = arith.constant 0 : i32
    %c0_i32_0 = arith.constant 0 : i32
    %c0_i32_1 = arith.constant 0 : i32
    return %c0_i32, %c0_i32_0, %arg0 : i32, i32, i32
  }
}

</mosaic_0001>

<bundles_post_ra>
// kernel: pos_encoding_nerf_2d.1
= control target key start
LH: loop header
LB: loop body
LE: loop exit
PB: predicated region body
PF: predicated region fallthrough
CT: control target
= control target key end

     0   :  { %v4028_v0 = vmov 1   ;;  %v4029_v1 = vmov 0   ;;  %v17_v4 = vlaneseq  ;;  %s6481_s0 = inlined_call_operand.vmem [shape: f32[16,2], index: 0, kind: input, shape index: {}]   ;;  %s6482_s1 = inlined_call_operand.vmem [shape: f32[2,1024], index: 1, kind: input, shape index: {}]   ;;  %s6483_s2 = inlined_call_operand.vmem [shape: f32[2,17,1024], index: 2, kind: output, shape index: {}]  }
   0x1   :  { %3962 = vset.pattern.permute.xlu1 %v4028_v0  ;;  %3961 = vset.pattern.permute.xlu0 %v4029_v1  ;;  %v13_v2 = vld [vmem:[%s6481_s0] sm:$0xff]  ;;  %v14_v3 = vld [vmem:[%s6481_s0 + $0x8] sm:$0xff] }
   0x2   :  { %188 = vperm.xlu1 %3962, %v13_v2   ;;  %91 = vperm.xlu0 %3961, %v13_v2   ;;  %v4057_v5 = vshrl.u32 %v17_v4, 7  ;;  %v11_v8 = vld [vmem:[%s6482_s1] sm:$0xff] }
   0x4   :  { %v4060_v6 = vsub.s32 0, %v4057_v5  ;;  %v4063_v7 = vsub.s32 1, %v4057_v5  ;;  %v23_v9 = vsub.s32 2, %v4057_v5  ;;  %v6488_v10 = vsub.s32 3, %v4057_v5 }
   0x5   :  { %v6490_v11 = vsub.s32 4, %v4057_v5  ;;  %v6487_v12 = vsub.s32 5, %v4057_v5  ;;  %v6489_v34 = vsub.s32 6, %v4057_v5  ;;  %v6486_v36 = vsub.s32 7, %v4057_v5 }
   0x6   :  { %192 = vperm.xlu1 %3962, %v14_v3   ;;  %96 = vperm.xlu0 %3961, %v14_v3   ;;  %v4073_v13 = vrot.slane %v11_v8, %v4060_v6  ;;  %v4076_v14 = vrot.slane %v11_v8, %v4063_v7  ;;  %v4080_v15 = vrot.slane %v11_v8, %v23_v9 }
   0x7   :  { %v4084_v16 = vrot.slane %v11_v8, %v6488_v10  ;;  %v4088_v17 = vrot.slane %v11_v8, %v6490_v11  ;;  %v4092_v18 = vrot.slane %v11_v8, %v6487_v12  ;;  %v4146_v40 = vrot.slane %v11_v8, %v6489_v34 }
   0x8   :  { %6630 = vst [vmem:[#allocation2_spill] sm:$0xff] %v4073_v13  ;;  %6631 = vst [vmem:[#allocation3_spill] sm:$0xff] %v4076_v14  ;;  %v4096_v19 = vrot.slane %v4073_v13, %v4060_v6  ;;  %v4100_v20 = vrot.slane %v4076_v14, %v4063_v7  ;;  %v4108_v23 = vrot.slane %v4080_v15, %v4060_v6 }
   0x9   :  { %6632 = vst [vmem:[#allocation4_spill] sm:$0xff] %v4080_v15  ;;  %6633 = vst [vmem:[#allocation5_spill] sm:$0xff] %v4084_v16  ;;  %v4112_v24 = vrot.slane %v4084_v16, %v4063_v7  ;;  %v4116_v25 = vrot.slane %v4088_v17, %v4060_v6  ;;  %v4120_v26 = vrot.slane %v4092_v18, %v4063_v7  ;;  %v6664_v15 = vmov 920167782  }
   0xa   :  { %3963 = vset.pattern.permute.xlu0 %v4028_v0  ;;  %6634 = vst [vmem:[#allocation6_spill] sm:$0xff] %v4088_v17  ;;  %6635 = vst [vmem:[#allocation7_spill] sm:$0xff] %v4092_v18  ;;  %v4152_v43 = vrot.slane %v11_v8, %v6486_v36  ;;  %v4161_v50 = vrot.slane %v4146_v40, %v4060_v6  ;;  %v6498_v8 = vmov 683565275  }
   0xb   :  { %6639 = vst [vmem:[#allocation11_spill] sm:$0xff] %v4146_v40 }
   0xc   :  { %6640 = vst [vmem:[#allocation12_spill] sm:$0xff] %v4152_v43  ;;  %v4165_v53 = vrot.slane %v4152_v43, %v4063_v7  ;;  %v6649_v43 = vmov 1326507024  }
  0x7d   :  { %v4102_v21 = vpop.permute.xlu1 %188  ;;  %v4104_v22 = vpop.permute.xlu0 %91 }
  0x7e   :  { %v99_v27 = vmul.f32 %v4104_v22, %v4096_v19  ;;  %v195_v28 = vmul.f32 %v4102_v21, %v4100_v20  ;;  %v100_v29 = vmul.f32 %v4104_v22, %v4108_v23  ;;  %v196_v30 = vmul.f32 %v4102_v21, %v4112_v24 }
  0x7f   :  { %v101_v31 = vmul.f32 %v4104_v22, %v4116_v25  ;;  %v197_v32 = vmul.f32 %v4102_v21, %v4120_v26  ;;  %v4169_v60 = vmul.f32 %v4104_v22, %v4161_v50  ;;  %v4173_v0 = vmul.f32 %v4102_v21, %v4165_v53 }
  0x80   :  { %v4134_v33 = vadd.f32 %v195_v28, %v99_v27  ;;  %v4137_v35 = vadd.f32 %v196_v30, %v100_v29  ;;  %v6501_v30 = vmov 2475754826  }
  0x81   :  { %v4140_v37 = vadd.f32 %v197_v32, %v101_v31  ;;  %v6505_v32 = vmov 2131351028  }
  0x82   :  { %6636 = vst [vmem:[#allocation8_spill] sm:$0xff] %v4134_v33  ;;  %6637 = vst [vmem:[#allocation9_spill] sm:$0xff] %v4137_v35  ;;  %v6485_v38 = vand.u32 2147483647, %v4134_v33  ;;  %v230_v39 = vand.u32 2139095040, %v4134_v33  ;;  %v334_v42 = vand.u32 2139095040, %v4137_v35 }
  0x83   :  { %6638 = vst [vmem:[#allocation10_spill] sm:$0xff] %v4140_v37  ;;  %v6484_v41 = vand.u32 2147483647, %v4137_v35  ;;  %v438_v48 = vand.u32 2139095040, %v4140_v37 }
  0x84   :  { %v231_v44 = vshrl.u32 %v230_v39, 23  ;;  %v234_v45 = vand.u32 8388607, %v6485_v38  ;;  %v335_v46 = vshrl.u32 %v334_v42, 23  ;;  %v6510_v42 = vmov 2102212464  }
  0x85   :  { %v338_v47 = vand.u32 8388607, %v6484_v41  ;;  %v439_v52 = vshrl.u32 %v438_v48, 23 }
  0x86   :  { %v3737_v49 = vadd.s32 4294967169, %v231_v44  ;;  %v3741_v51 = vadd.s32 4294967169, %v335_v46  ;;  %v235_v55 = vor.u32 8388608, %v234_v45  ;;  %v6508_v45 = vmov 920167782  }
  0x87   :  { %v339_v56 = vor.u32 8388608, %v338_v47  ;;  %v3745_v58 = vadd.s32 4294967169, %v439_v52 }
  0x88   :  { %v237_v54 = vadd.s32 1, %v3737_v49  ;;  %v341_v57 = vadd.s32 1, %v3741_v51  ;;  %v4175_v1 = vshll.u32 %v235_v55, 8 }
  0x89   :  { %v4177_v2 = vshll.u32 %v339_v56, 8  ;;  %v4179_v3 = vadd.s32 1, %v3745_v58 }
  0x8a   :  { %vm238_vm0 = vcmp.gt.s32.totalorder %v237_v54, 0  ;;  %vm342_vm1 = vcmp.gt.s32.totalorder %v341_v57, 0 }
  0x8b   :  { %v239_v59 = vsel %vm238_vm0, %v237_v54, 0  ;;  %v343_v63 = vsel %vm342_vm1, %v341_v57, 0  ;;  %v6491_v54 = vmov 1326507024   ;;  %vm446_vm6 = vcmp.gt.s32.totalorder %v4179_v3, 0 }
  0x8c   :  { %v240_v61 = vshrl.u32 %v239_v59, 5  ;;  %v241_v62 = vand.u32 31, %v239_v59  ;;  %v4182_v28 = vshrl.u32 %v343_v63, 5  ;;  %v345_v29 = vand.u32 31, %v343_v63 }
  0x8e   :  { %v242_v4 = vsub.s32 32, %v241_v62  ;;  %v244_v27 = vshll.u32 %v6498_v8, %v241_v62  ;;  %v247_v31 = vshll.u32 %v6501_v30, %v241_v62  ;;  %v250_v39 = vshll.u32 %v6505_v32, %v241_v62 }
  0x8f   :  { %v253_v44 = vshll.u32 %v6510_v42, %v241_v62  ;;  %v256_v46 = vshll.u32 %v6508_v45, %v241_v62  ;;  %vm259_vm2 = vcmp.lt.s32.totalorder %v240_v61, 1  ;;  %vm260_vm3 = vcmp.lt.s32.totalorder %v240_v61, 2 }
  0x90   :  { %v245_v47 = vshrl.u32 %v6501_v30, %v242_v4  ;;  %v248_v48 = vshrl.u32 %v6505_v32, %v242_v4  ;;  %v251_v49 = vshrl.u32 %v6510_v42, %v242_v4  ;;  %v243_v51 = vshrl.u32 %v6498_v8, %v242_v4 }
  0x91   :  { %v254_v52 = vshrl.u32 %v6508_v45, %v242_v4  ;;  %v257_v55 = vshrl.u32 %v6491_v54, %v242_v4  ;;  %v346_v59 = vsub.s32 32, %v345_v29  ;;  %vm261_vm4 = vcmp.lt.s32.totalorder %v240_v61, 3 }
  0x92   :  { %v246_v56 = vor.u32 %v245_v47, %v244_v27  ;;  %v249_v57 = vor.u32 %v248_v48, %v247_v31  ;;  %v252_v58 = vor.u32 %v251_v49, %v250_v39  ;;  %vm262_vm5 = vcmp.lt.s32.totalorder %v240_v61, 4 }
  0x93   :  { %v255_v62 = vor.u32 %v254_v52, %v253_v44  ;;  %v258_v63 = vor.u32 %v257_v55, %v256_v46  ;;  %v348_v4 = vshll.u32 %v6498_v8, %v345_v29  ;;  %v349_v39 = vshrl.u32 %v6501_v30, %v346_v59 }
  0x94   :  { %v263_v41 = vsel %vm259_vm2, %v243_v51, %v246_v56  ;;  %v264_v38 = vsel %vm262_vm5, %v252_v58, 2102212464  ;;  %v267_v36 = vsel %vm259_vm2, %v246_v56, %v249_v57  ;;  %v271_v12 = vsel %vm259_vm2, %v249_v57, %v252_v58 }
  0x95   :  { %v265_v10 = vsel %vm261_vm4, %v249_v57, %v264_v38  ;;  %v268_v34 = vsel %vm262_vm5, %v255_v62, 920167782  ;;  %v272_v11 = vsel %vm262_vm5, %v258_v63, 1326507024  ;;  %v351_v44 = vshll.u32 %v6501_v30, %v345_v29 }
  0x96   :  { %v269_v27 = vsel %vm261_vm4, %v252_v58, %v268_v34  ;;  %v273_v31 = vsel %vm261_vm4, %v255_v62, %v272_v11  ;;  %v266_v46 = vsel %vm260_vm3, %v263_v41, %v265_v10  ;;  %v352_v38 = vshrl.u32 %v6505_v32, %v346_v59 }
  0x97   :  { %v270_v47 = vsel %vm260_vm3, %v267_v36, %v269_v27  ;;  %v274_v48 = vsel %vm260_vm3, %v271_v12, %v273_v31  ;;  %v350_v11 = vor.u32 %v349_v39, %v348_v4  ;;  %v354_v56 = vshll.u32 %v6505_v32, %v345_v29 }
  0x98   :  { %v4206_v49 = vmul.u32.u64.low %v4175_v1, %v274_v48  ;;  %v4207_v51 = vmul.u32.u64.high %v4175_v1, %v274_v48, %v4206_v49  ;;  %v4210_v52 = vmul.u32.u64.low %v4175_v1, %v270_v47  ;;  %v4211_v34 = vmul.u32.u64.high %v4175_v1, %v270_v47, %v4210_v52 }
  0x99   :  { %v353_v55 = vor.u32 %v352_v38, %v351_v44  ;;  %v355_v10 = vshrl.u32 %v6510_v42, %v346_v59  ;;  %v347_v36 = vshrl.u32 %v6498_v8, %v346_v59  ;;  %v357_v12 = vshll.u32 %v6510_v42, %v345_v29 }
  0x9a   :  { %v358_v41 = vshrl.u32 %v6508_v45, %v346_v59  ;;  %v361_v61 = vshrl.u32 %v6491_v54, %v346_v59  ;;  %v282_v57 = vmul.u32 %v4175_v1, %v266_v46  ;;  %v360_v62 = vshll.u32 %v6508_v45, %v345_v29 }
  0x9b   :  { %v356_v58 = vor.u32 %v355_v10, %v354_v56  ;;  %vm363_vm7 = vcmp.lt.s32.totalorder %v4182_v28, 1  ;;  %vm284_vm8 = vc.u32 %v4207_v51, %v4210_v52  ;;  %v285_v63 = vadd.s32 1, %v4211_v34 }
  0x9c   :  { %v359_v4 = vor.u32 %v358_v41, %v357_v12  ;;  %vm364_vm9 = vcmp.lt.s32.totalorder %v4182_v28, 2  ;;  %v362_v27 = vor.u32 %v361_v61, %v360_v62  ;;  %vm365_vm10 = vcmp.lt.s32.totalorder %v4182_v28, 3 }
  0x9d   :  { %vm366_vm11 = vcmp.lt.s32.totalorder %v4182_v28, 4  ;;  %v371_v59 = vsel %vm363_vm7, %v350_v11, %v353_v55  ;;  %v286_v1 = vsel %vm284_vm8, %v285_v63, %v4211_v34  ;;  %v375_v39 = vsel %vm363_vm7, %v353_v55, %v356_v58  ;;  %v12_v34 = vld [vmem:[%s6482_s1 + $0x8] sm:$0xff] }
  0x9e   :  { %v368_v31 = vsel %vm366_vm11, %v356_v58, 2102212464  ;;  %v372_v29 = vsel %vm366_vm11, %v359_v4, 920167782  ;;  %v287_v44 = vadd.s32 %v286_v1, %v282_v57  ;;  %v367_v46 = vsel %vm363_vm7, %v347_v36, %v350_v11 }
  0x9f   :  { %v373_v47 = vsel %vm365_vm10, %v356_v58, %v372_v29  ;;  %v376_v48 = vsel %vm366_vm11, %v362_v27, 1326507024  ;;  %v369_v38 = vsel %vm365_vm10, %v353_v55, %v368_v31  ;;  %v447_v10 = vsel %vm446_vm6, %v4179_v3, 0 }
  0xa0   :  { %v374_v49 = vsel %vm364_vm9, %v371_v59, %v373_v47  ;;  %v377_v56 = vsel %vm365_vm10, %v359_v4, %v376_v48  ;;  %v288_v12 = vadd.s32 536870912, %v287_v44  ;;  %v370_v3 = vsel %vm364_vm9, %v367_v46, %v369_v38 }
  0xa1   :  { %v378_v41 = vsel %vm364_vm9, %v375_v39, %v377_v56  ;;  %v4241_v11 = vmul.u32.u64.low %v4177_v2, %v374_v49  ;;  %v4242_v36 = vmul.u32.u64.high %v4177_v2, %v374_v49, %v4241_v11  ;;  %v449_v57 = vand.u32 31, %v447_v10 }
  0xa2   :  { %v4246_v55 = vmul.u32.u64.low %v4177_v2, %v378_v41  ;;  %v4247_v61 = vmul.u32.u64.high %v4177_v2, %v378_v41, %v4246_v55  ;;  %v4252_v58 = vrot.slane %v12_v34, %v4060_v6  ;;  %v4256_v62 = vrot.slane %v12_v34, %v23_v9 }
  0xa3   :  { %v6643_v63 = vsub.s32 4, %v4057_v5  ;;  %v4264_v27 = vadd.f32 %v4173_v0, %v4169_v60  ;;  %v4266_v59 = vshrl.u32 %v288_v12, 30  ;;  %v389_v28 = vadd.s32 1, %v4242_v36 }
  0xa4   :  { %6641 = vst [vmem:[#allocation13_spill] sm:$0xff] %v4252_v58  ;;  %6642 = vst [vmem:[#allocation14_spill] sm:$0xff] %v4256_v62  ;;  %v450_v1 = vsub.s32 32, %v449_v57  ;;  %v386_v31 = vmul.u32 %v4177_v2, %v370_v3  ;;  %vm388_vm12 = vc.u32 %v4247_v61, %v4241_v11  ;;  %v6494_v9 = vand.u32 2147483647, %v4140_v37 }
  0xa5   :  { %v4260_v4 = vrot.slane %v12_v34, %v6643_v63  ;;  %6645 = vst [vmem:[#allocation16_spill] sm:$0xff] %v4264_v27  ;;  %v6646_v29 = vsub.s32 6, %v4057_v5  ;;  %v390_v46 = vsel %vm388_vm12, %v389_v28, %v4242_v36  ;;  %v4280_v60 = vrot.slane %v4252_v58, %v4060_v6 }
  0xa6   :  { %v4284_v0 = vrot.slane %v4256_v62, %v4060_v6  ;;  %v391_v47 = vadd.s32 %v390_v46, %v386_v31  ;;  %v4291_v48 = vrot.slane %v12_v34, %v4063_v7  ;;  %v290_v38 = vshll.u32 %v4266_v59, 30 }
  0xa7   :  { %6644 = vst [vmem:[#allocation15_spill] sm:$0xff] %v4260_v4  ;;  %v4275_v39 = vrot.slane %v12_v34, %v6646_v29  ;;  %v4288_v2 = vrot.slane %v4260_v4, %v4060_v6  ;;  %v453_v49 = vshrl.u32 %v6501_v30, %v450_v1  ;;  %v542_v56 = vand.u32 2139095040, %v4264_v27 }
  0xa8   :  { %6648 = vst [vmem:[#allocation18_spill] sm:$0xff] %v4291_v48  ;;  %v392_v12 = vadd.s32 536870912, %v391_v47  ;;  %v442_v41 = vand.u32 8388607, %v6494_v9  ;;  %v456_v36 = vshrl.u32 %v6505_v32, %v450_v1  ;;  %v459_v55 = vshrl.u32 %v6510_v42, %v450_v1 }
  0xa9   :  { %6647 = vst [vmem:[#allocation17_spill] sm:$0xff] %v4275_v39  ;;  %v4300_v3 = vshrl.u32 %v447_v10, 5  ;;  %v452_v63 = vshll.u32 %v6498_v8, %v449_v57  ;;  %v455_v28 = vshll.u32 %v6501_v30, %v449_v57  ;;  %v462_v31 = vshrl.u32 %v6508_v45, %v450_v1 }
  0xaa   :  { %v4305_v29 = vshrl.u32 %v392_v12, 30  ;;  %v458_v46 = vshll.u32 %v6505_v32, %v449_v57  ;;  %v461_v54 = vshll.u32 %v6510_v42, %v449_v57  ;;  %v465_v9 = vshrl.u32 %v6649_v43, %v450_v1 }
  0xab   :  { %v4310_v18 = vsub.s32 %v287_v44, %v290_v38  ;;  %v454_v16 = vor.u32 %v453_v49, %v452_v63  ;;  %v464_v10 = vshll.u32 %v6508_v45, %v449_v57  ;;  %v543_v14 = vshrl.u32 %v542_v56, 23 }
  0xac   :  { %v394_v8 = vshll.u32 %v4305_v29, 30  ;;  %v457_v4 = vor.u32 %v456_v36, %v455_v28  ;;  %v460_v30 = vor.u32 %v459_v55, %v458_v46  ;;  %v463_v62 = vor.u32 %v462_v31, %v461_v54 }
  0xad   :  { %v6650_v12 = vsub.s32 3, %v4057_v5  ;;  %v443_v32 = vor.u32 8388608, %v442_v41  ;;  %v466_v40 = vor.u32 %v465_v9, %v464_v10  ;;  %vm470_vm13 = vcmp.lt.s32.totalorder %v4300_v3, 4 }
  0xae   :  { %v6652_v44 = vsub.s32 5, %v4057_v5  ;;  %v6654_v57 = vsub.s32 7, %v4057_v5  ;;  %v4327_v56 = vsub.s32 %v391_v47, %v394_v8  ;;  %v476_v54 = vsel %vm470_vm13, %v463_v62, 920167782 }
  0xaf   :  { %v4316_v58 = vrot.slane %v12_v34, %v6650_v12  ;;  %v293_v36 = vsub.s32 0, %v4310_v18  ;;  %vm467_vm14 = vcmp.lt.s32.totalorder %v4300_v3, 1  ;;  %vm469_vm15 = vcmp.lt.s32.totalorder %v4300_v3, 3 }
  0xb0   :  { %v4321_v38 = vrot.slane %v12_v34, %v6652_v44  ;;  %v4325_v49 = vrot.slane %v12_v34, %v6654_v57  ;;  %v3749_v9 = vadd.s32 4294967169, %v543_v14  ;;  %v397_v41 = vsub.s32 0, %v4327_v56 }
  0xb1   :  { %6651 = vst [vmem:[#allocation19_spill] sm:$0xff] %v4316_v58  ;;  %v475_v55 = vsel %vm467_vm14, %v454_v16, %v457_v4  ;;  %v477_v5 = vsel %vm469_vm15, %v460_v30, %v476_v54  ;;  %v479_v8 = vsel %vm467_vm14, %v457_v4, %v460_v30  ;;  %v88_v34 = vrot.slane %v4275_v39, %v4060_v6 }
  0xb2   :  { %6653 = vst [vmem:[#allocation20_spill] sm:$0xff] %v4321_v38  ;;  %6655 = vst [vmem:[#allocation21_spill] sm:$0xff] %v4325_v49  ;;  %v4345_v47 = vrot.slane %v4291_v48, %v4063_v7  ;;  %v480_v14 = vsel %vm470_vm13, %v466_v40, 1326507024  ;;  %v483_v63 = vshll.u32 %v443_v32, 8  ;;  %vm468_vm0 = vcmp.lt.s32.totalorder %v4300_v3, 2 }
  0xb3   :  { %v6656_v28 = vmov 683565275   ;;  %v472_v46 = vsel %vm470_vm13, %v460_v30, 2102212464  ;;  %v481_v10 = vsel %vm469_vm15, %v463_v62, %v480_v14  ;;  %v3738_v6 = vmin.u32 %v293_v36, %v4310_v18 }
  0xb4   :  { %v451_v31 = vshrl.u32 %v6656_v28, %v450_v1  ;;  %v478_v12 = vsel %vm468_vm0, %v475_v55, %v477_v5  ;;  %v482_v44 = vsel %vm468_vm0, %v479_v8, %v481_v10  ;;  %v549_v40 = vadd.s32 1, %v3749_v9 }
  0xb5   :  { %v4362_v32 = vrot.slane %v4316_v58, %v4063_v7  ;;  %v4366_v1 = vrot.slane %v4321_v38, %v4063_v7  ;;  %v4370_v30 = vrot.slane %v4325_v49, %v4063_v7  ;;  %v3742_v62 = vmin.u32 %v397_v41, %v4327_v56  ;;  %v97_v7 = vpop.permute.xlu0 %96 }
  0xb6   :  { %v471_v57 = vsel %vm467_vm14, %v451_v31, %v454_v16  ;;  %v473_v54 = vsel %vm469_vm15, %v457_v4, %v472_v46  ;;  %v4377_v36 = vmul.u32.u64.low %v483_v63, %v482_v44  ;;  %v4378_v9 = vmul.u32.u64.high %v483_v63, %v482_v44, %v4377_v36 }
  0xb7   :  { %v4382_v55 = vmul.f32 %v4104_v22, %v4280_v60  ;;  %v4384_v5 = vmul.u32.u64.low %v483_v63, %v478_v12  ;;  %v4385_v8 = vmul.u32.u64.high %v483_v63, %v478_v12, %v4384_v5  ;;  %vm550_vm1 = vcmp.gt.s32.totalorder %v549_v40, 0 }
  0xb8   :  { %6657 = vst [vmem:[#allocation22_spill] sm:$0xff] %v4378_v9  ;;  %v4390_v41 = vmul.f32 %v4104_v22, %v4284_v0  ;;  %v4394_v16 = vmul.f32 %v4104_v22, %v4288_v2  ;;  %v295_v4 = vclz %v3738_v6  ;;  %v551_v14 = vsel %vm550_vm1, %v549_v40, 0 }
  0xb9   :  { %6658 = vst [vmem:[#allocation23_spill] sm:$0xff] %v4384_v5  ;;  %v4397_v31 = vmul.f32 %v4104_v22, %v88_v34  ;;  %v399_v46 = vclz %v3742_v62  ;;  %v474_v10 = vsel %vm468_vm0, %v471_v57, %v473_v54  ;;  %v553_v12 = vand.u32 31, %v551_v14  ;;  %v4424_v62 = vpop.permute.xlu1 %192 }
  0xba   :  { %v199_v44 = vmul.f32 %v4102_v21, %v4345_v47  ;;  %v4405_v36 = vmul.f32 %v4102_v21, %v4362_v32  ;;  %v4409_v45 = vmul.f32 %v4102_v21, %v4366_v1  ;;  %vm492_vm2 = vc.u32 %v4378_v9, %v4384_v5 }
  0xbb   :  { %v4414_v22 = vmul.f32 %v97_v7, %v4096_v19  ;;  %v4417_v3 = vmul.f32 %v97_v7, %v4108_v23  ;;  %v4421_v6 = vmul.f32 %v4102_v21, %v4370_v30  ;;  %v493_v40 = vadd.s32 1, %v4385_v8 }
  0xbc   :  { %v3739_v57 = vadd.s32 4294967294, %v295_v4  ;;  %v490_v54 = vmul.u32 %v483_v63, %v474_v10  ;;  %v554_v49 = vsub.s32 32, %v553_v12  ;;  %v4428_v38 = vmul.f32 %v97_v7, %v4116_v25 }
  0xbd   :  { %v4431_v19 = vmul.f32 %v97_v7, %v4161_v50  ;;  %v3743_v23 = vadd.s32 4294967294, %v399_v46  ;;  %v494_v58 = vsel %vm492_vm2, %v493_v40, %v4385_v8  ;;  %v4435_v21 = vmul.f32 %v97_v7, %v4280_v60 }
  0xbe   :  { %v4438_v48 = vmul.f32 %v97_v7, %v4284_v0  ;;  %v4441_v63 = vmul.f32 %v97_v7, %v4288_v2  ;;  %v495_v4 = vadd.s32 %v494_v58, %v490_v54  ;;  %v4443_v10 = vmul.f32 %v97_v7, %v88_v34 }
  0xbf   :  { %v4447_v25 = vmul.f32 %v4424_v62, %v4100_v20  ;;  %v6660_v50 = vmov 2475754826   ;;  %v6661_v42 = vmov 2131351028   ;;  %v4453_v60 = vmul.f32 %v4424_v62, %v4112_v24 }
  0xc0   :  { %6659 = vst [vmem:[#allocation24_spill] sm:$0xff] %v4443_v10  ;;  %v557_v46 = vshrl.u32 %v6660_v50, %v554_v49  ;;  %v560_v8 = vshrl.u32 %v6661_v42, %v554_v49  ;;  %vm3740_vm3 = vcmp.lt.s32.totalorder %v3739_v57, 0  ;;  %v496_v0 = vadd.s32 536870912, %v495_v4 }
  0xc1   :  { %v6662_v2 = vand.u32 2147483647, %v4264_v27  ;;  %vm3744_vm4 = vcmp.lt.s32.totalorder %v3743_v23, 0  ;;  %v556_v58 = vshll.u32 %v6656_v28, %v553_v12  ;;  %v559_v34 = vshll.u32 %v6660_v50, %v553_v12 }
  0xc2   :  { %v6663_v20 = vmov 2102212464   ;;  %v4460_v54 = vshrl.u32 %v496_v0, 30  ;;  %v552_v39 = vshrl.u32 %v551_v14, 5  ;;  %v566_v24 = vshrl.u32 %v6664_v15, %v554_v49 }
  0xc3   :  { %v546_v40 = vand.u32 8388607, %v6662_v2  ;;  %v563_v7 = vshrl.u32 %v6663_v20, %v554_v49  ;;  %v565_v17 = vshll.u32 %v6663_v20, %v553_v12  ;;  %v558_v13 = vor.u32 %v557_v46, %v556_v58 }
  0xc4   :  { %v561_v37 = vor.u32 %v560_v8, %v559_v34  ;;  %v562_v5 = vshll.u32 %v6661_v42, %v553_v12  ;;  %v569_v2 = vshrl.u32 %v6649_v43, %v554_v49  ;;  %v205_v27 = vmul.f32 %v4424_v62, %v4120_v26 }
  0xc5   :  { %v206_v50 = vmul.f32 %v4424_v62, %v4165_v53  ;;  %v498_v0 = vshll.u32 %v4460_v54, 30  ;;  %v567_v9 = vor.u32 %v566_v24, %v565_v17  ;;  %v4472_v14 = vsel %vm3740_vm3, 0, %v3739_v57 }
  0xc6   :  { %v547_v20 = vor.u32 8388608, %v546_v40  ;;  %v564_v10 = vor.u32 %v563_v7, %v562_v5  ;;  %v568_v46 = vshll.u32 %v6664_v15, %v553_v12  ;;  %v207_v8 = vmul.f32 %v4424_v62, %v4345_v47 }
  0xc7   :  { %v4478_v58 = vsel %vm3744_vm4, 0, %v3743_v23  ;;  %v4480_v26 = vsub.s32 %v495_v4, %v498_v0  ;;  %vm571_vm5 = vcmp.lt.s32.totalorder %v552_v39, 1  ;;  %v208_v53 = vmul.f32 %v4424_v62, %v4362_v32 }
  0xc8   :  { %v570_v17 = vor.u32 %v569_v2, %v568_v46  ;;  %vm574_vm6 = vcmp.lt.s32.totalorder %v552_v39, 4  ;;  %v579_v57 = vsel %vm571_vm5, %v558_v13, %v561_v37  ;;  %v4486_v5 = vadd.f32 %v199_v44, %v4382_v55 }
  0xc9   :  { %v303_v12 = vsub.s32 4294967266, %v4472_v14  ;;  %vm573_vm7 = vcmp.lt.s32.totalorder %v552_v39, 3  ;;  %v580_v47 = vsel %vm574_vm6, %v567_v9, 920167782  ;;  %v407_v23 = vsub.s32 4294967266, %v4478_v58 }
  0xca   :  { %6665 = vst [vmem:[#allocation25_spill] sm:$0xff] %v4486_v5  ;;  %vm572_vm8 = vcmp.lt.s32.totalorder %v552_v39, 2  ;;  %v581_v4 = vsel %vm573_vm7, %v564_v10, %v580_v47  ;;  %v587_v40 = vshll.u32 %v547_v20, 8  ;;  %v501_v34 = vsub.s32 0, %v4480_v26 }
  0xcb   :  { %v555_v32 = vshrl.u32 %v6656_v28, %v554_v49  ;;  %v576_v7 = vsel %vm574_vm6, %v564_v10, 2102212464  ;;  %v582_v24 = vsel %vm572_vm8, %v579_v57, %v581_v4  ;;  %v583_v55 = vsel %vm571_vm5, %v561_v37, %v564_v10 }
  0xcc   :  { %v584_v44 = vsel %vm574_vm6, %v570_v17, 1326507024  ;;  %v4495_v2 = vmul.u32.u64.low %v587_v40, %v582_v24  ;;  %v4496_v0 = vmul.u32.u64.high %v587_v40, %v582_v24, %v4495_v2  ;;  %v209_v46 = vmul.f32 %v4424_v62, %v4366_v1 }
  0xcd   :  { %v4503_v20 = vmul.f32 %v4424_v62, %v4370_v30  ;;  %v4507_v49 = vadd.f32 %v4405_v36, %v4390_v41  ;;  %v4511_v57 = vadd.f32 %v4409_v45, %v4394_v16  ;;  %v4515_v10 = vadd.f32 %v4421_v6, %v4397_v31 }
  0xce   :  { %v575_v17 = vsel %vm571_vm5, %v555_v32, %v558_v13  ;;  %v577_v1 = vsel %vm573_vm7, %v561_v37, %v576_v7  ;;  %v585_v47 = vsel %vm573_vm7, %v567_v9, %v584_v44  ;;  %v304_v30 = vadd.s32 127, %v303_v12 }
  0xcf   :  { %6666 = vst [vmem:[#allocation26_spill] sm:$0xff] %v4507_v49  ;;  %6667 = vst [vmem:[#allocation27_spill] sm:$0xff] %v4511_v57  ;;  %v3746_v62 = vmin.u32 %v501_v34, %v4480_v26  ;;  %v586_v41 = vsel %vm572_vm8, %v583_v55, %v585_v47  ;;  %v646_v36 = vand.u32 2139095040, %v4486_v5  ;;  %v4525_v45 = vadd.f32 %v4447_v25, %v4414_v22 }
  0xd0   :  { %6668 = vst [vmem:[#allocation28_spill] sm:$0xff] %v4515_v10  ;;  %v408_v16 = vadd.s32 127, %v407_v23  ;;  %v4527_v31 = vmul.u32.u64.low %v587_v40, %v586_v41  ;;  %v4528_v6 = vmul.u32.u64.high %v587_v40, %v586_v41, %v4527_v31  ;;  %v299_v13 = vsub.s32 32, %v4472_v14 }
  0xd1   :  { %6669 = vst [vmem:[#allocation29_spill] sm:$0xff] %v4525_v45  ;;  %v578_v37 = vsel %vm572_vm8, %v575_v17, %v577_v1  ;;  %v597_v9 = vadd.s32 1, %v4496_v0  ;;  %v647_v12 = vshrl.u32 %v646_v36, 23  ;;  %v4535_v4 = vadd.f32 %v4453_v60, %v4417_v3  ;;  %v6673_v31 = vld [vmem:[#allocation24_spill] sm:$0xff] }
  0xd2   :  { %v4538_v34 = vadd.f32 %v205_v27, %v4428_v38  ;;  %v4541_v22 = vadd.f32 %v206_v50, %v4431_v19  ;;  %v403_v25 = vsub.s32 32, %v4478_v58  ;;  %v283_v23 = vadd.s32 %v4210_v52, %v4207_v51 }
  0xd3   :  { %6670 = vst [vmem:[#allocation30_spill] sm:$0xff] %v4535_v4  ;;  %v305_v39 = vshll.u32 %v304_v30, 23  ;;  %v387_v32 = vadd.s32 %v4241_v11, %v4247_v61  ;;  %v503_v7 = vclz %v3746_v62  ;;  %v409_v24 = vshll.u32 %v408_v16, 23 }
  0xd4   :  { %6671 = vst [vmem:[#allocation31_spill] sm:$0xff] %v4538_v34  ;;  %v594_v55 = vmul.u32 %v587_v40, %v578_v37  ;;  %vm596_vm9 = vc.u32 %v4528_v6, %v4495_v2  ;;  %v3753_v27 = vadd.s32 4294967169, %v647_v12  ;;  %v4551_v38 = vadd.f32 %v207_v8, %v4435_v21 }
  0xd5   :  { %v4554_v3 = vadd.f32 %v208_v53, %v4438_v48  ;;  %v301_v19 = vshrl.u32 %v283_v23, %v299_v13  ;;  %v598_v51 = vsel %vm596_vm9, %v597_v9, %v4496_v0  ;;  %v313_v52 = vsub.s32 4, %v4266_v59 }
  0xd6   :  { %v405_v50 = vshrl.u32 %v387_v32, %v403_v25  ;;  %v599_v11 = vadd.s32 %v598_v51, %v594_v55  ;;  %v653_v61 = vadd.s32 1, %v3753_v27  ;;  %v300_v60 = vshll.u32 %v4310_v18, %v4472_v14  ;;  %v6683_v32 = vld [vmem:[#allocation22_spill] sm:$0xff] }
  0xd7   :  { %v306_v40 = vor.u32 4788187, %v305_v39  ;;  %v417_v44 = vsub.s32 4, %v4305_v29  ;;  %v3747_v17 = vadd.s32 4294967294, %v503_v7  ;;  %v404_v21 = vshll.u32 %v4327_v56, %v4478_v58  ;;  %v6684_v7 = vld [vmem:[#allocation23_spill] sm:$0xff] }
  0xd8   :  { %v410_v48 = vor.u32 4788187, %v409_v24  ;;  %v600_v8 = vadd.s32 536870912, %v599_v11  ;;  %vm654_vm10 = vcmp.gt.s32.totalorder %v653_v61, 0  ;;  %vm229_vm11 = vcmp.lt.s32.totalorder %v4134_v33, 0 }
  0xd9   :  { %v302_v53 = vor.u32 %v301_v19, %v300_v60  ;;  %vm333_vm12 = vcmp.lt.s32.totalorder %v4137_v35, 0  ;;  %v655_v0 = vsel %vm654_vm10, %v653_v61, 0  ;;  %v406_v1 = vor.u32 %v405_v50, %v404_v21 }
  0xda   :  { %v4565_v47 = vshrl.u32 %v600_v8, 30  ;;  %v6528_v18 = vand.u32 2147483647, %v4486_v5  ;;  %v657_v14 = vand.u32 31, %v655_v0  ;;  %v4569_v30 = vadd.f32 %v209_v46, %v4441_v63 }
  0xdb   :  { %v314_v56 = vsel %vm229_vm11, %v313_v52, %v4266_v59  ;;  %v418_v58 = vsel %vm333_vm12, %v417_v44, %v4305_v29  ;;  %vm3748_vm13 = vcmp.lt.s32.totalorder %v3747_v17, 0  ;;  %v307_v62 = vand.u32 2147483647, %v306_v40 }
  0xdc   :  { %6672 = vst [vmem:[#allocation32_spill] sm:$0xff] %v4569_v30  ;;  %v411_v41 = vand.u32 2147483647, %v410_v48  ;;  %v602_v36 = vshll.u32 %v4565_v47, 30  ;;  %v658_v16 = vsub.s32 32, %v657_v14  ;;  %v4580_v13 = vadd.f32 %v4503_v20, %v6673_v31 }
  0xdd   :  { %v6675_v63 = vand.u32 2147483647, %v4134_v33  ;;  %v309_v59 = vcvt.s32.f32 %v302_v53  ;;  %v6678_v37 = vand.u32 2147483647, %v4137_v35  ;;  %v413_v9 = vcvt.s32.f32 %v406_v1 }
  0xde   :  { %6674 = vst [vmem:[#allocation24_spill] sm:$0xff] %v4580_v13  ;;  %v4594_v12 = vsel %vm3748_vm13, 0, %v3747_v17  ;;  %v4596_v25 = vsub.s32 %v599_v11, %v602_v36  ;;  %v650_v20 = vand.u32 8388607, %v6528_v18  ;;  %v491_v24 = vadd.s32 %v6684_v7, %v6683_v32 }
  0xdf   :  { %vm4584_vm14 = vcmp.le.f32.partialorder %v6675_v63, 0.7853982  ;;  %vm4590_vm15 = vcmp.le.f32.partialorder %v6678_v37, 0.7853982  ;;  %v6685_v55 = vmov 2475754826   ;;  %v310_v19 = vmul.f32 %v309_v59, %v307_v62 }
  0xe0   :  { %v4602_v23 = vsel %vm4584_vm14, 0, %v314_v56  ;;  %v4606_v39 = vsel %vm4590_vm15, 0, %v418_v58  ;;  %v661_v27 = vshrl.u32 %v6685_v55, %v658_v16  ;;  %v414_v51 = vmul.f32 %v413_v9, %v411_v41 }
  0xe1   :  { %6681 = vst [vmem:[#allocation33_spill] sm:$0xff] %v4602_v23  ;;  %6682 = vst [vmem:[#allocation34_spill] sm:$0xff] %v4606_v39  ;;  %v605_v52 = vsub.s32 0, %v4596_v25  ;;  %v664_v50 = vshrl.u32 %v6661_v42, %v658_v16  ;;  %v511_v11 = vsub.s32 4294967266, %v4594_v12  ;;  %v660_v61 = vshll.u32 %v6656_v28, %v657_v14 }
  0xe2   :  { %v663_v60 = vshll.u32 %v6685_v55, %v657_v14  ;;  %v6686_v40 = vmov 2102212464   ;;  %v651_v17 = vor.u32 8388608, %v650_v20  ;;  %v656_v21 = vshrl.u32 %v655_v0, 5 }
  0xe3   :  { %v667_v44 = vshrl.u32 %v6686_v40, %v658_v16  ;;  %v666_v48 = vshll.u32 %v6661_v42, %v657_v14  ;;  %v750_v8 = vand.u32 2139095040, %v4507_v49  ;;  %v662_v53 = vor.u32 %v661_v27, %v660_v61 }
  0xe4   :  { %v665_v1 = vor.u32 %v664_v50, %v663_v60  ;;  %v669_v56 = vshll.u32 %v6686_v40, %v657_v14  ;;  %v670_v58 = vshrl.u32 %v6664_v15, %v658_v16  ;;  %v311_v62 = vxor.u32 2147483648, %v310_v19 }
  0xe5   :  { %v415_v41 = vxor.u32 2147483648, %v414_v51  ;;  %v3750_v36 = vmin.u32 %v605_v52, %v4596_v25  ;;  %v668_v31 = vor.u32 %v667_v44, %v666_v48  ;;  %v507_v63 = vsub.s32 32, %v4594_v12 }
  0xe6   :  { %v671_v59 = vor.u32 %v670_v58, %v669_v56  ;;  %v672_v0 = vshll.u32 %v6664_v15, %v657_v14  ;;  %v673_v37 = vshrl.u32 %v6649_v43, %v658_v16  ;;  %v512_v9 = vadd.s32 127, %v511_v11  ;;  %v6687_v56 = vld [vmem:[#allocation10_spill] sm:$0xff] }
  0xe7   :  { %vm675_vm0 = vcmp.lt.s32.totalorder %v656_v21, 1  ;;  %v691_v20 = vshll.u32 %v651_v17, 8  ;;  %v751_v32 = vshrl.u32 %v750_v8, 23  ;;  %v659_v7 = vshrl.u32 %v6656_v28, %v658_v16 }
  0xe8   :  { %v674_v27 = vor.u32 %v673_v37, %v672_v0  ;;  %vm678_vm1 = vcmp.lt.s32.totalorder %v656_v21, 4  ;;  %v683_v50 = vsel %vm675_vm0, %v662_v53, %v665_v1  ;;  %v607_v61 = vclz %v3750_v36 }
  0xe9   :  { %vm677_vm2 = vcmp.lt.s32.totalorder %v656_v21, 3  ;;  %v680_v52 = vsel %vm678_vm1, %v668_v31, 2102212464  ;;  %v684_v60 = vsel %vm678_vm1, %v671_v59, 920167782  ;;  %vm676_vm3 = vcmp.lt.s32.totalorder %v656_v21, 2 }
  0xea   :  { %v685_v44 = vsel %vm677_vm2, %v668_v31, %v684_v60  ;;  %v687_v14 = vsel %vm675_vm0, %v665_v1, %v668_v31  ;;  %v688_v48 = vsel %vm678_vm1, %v674_v27, 1326507024  ;;  %v312_v11 = vsel %vm229_vm11, %v311_v62, %v310_v19 }
  0xeb   :  { %v513_v17 = vshll.u32 %v512_v9, 23  ;;  %v679_v8 = vsel %vm675_vm0, %v659_v7, %v662_v53  ;;  %v686_v16 = vsel %vm676_vm3, %v683_v50, %v685_v44  ;;  %vm437_vm4 = vcmp.lt.s32.totalorder %v6687_v56, 0 }
  0xec   :  { %v681_v58 = vsel %vm677_vm2, %v665_v1, %v680_v52  ;;  %v689_v36 = vsel %vm677_vm2, %v671_v59, %v688_v48  ;;  %v4633_v0 = vmul.u32.u64.low %v691_v20, %v686_v16  ;;  %v4634_v37 = vmul.u32.u64.high %v691_v20, %v686_v16, %v4633_v0 }
  0xed   :  { %v509_v60 = vshrl.u32 %v491_v24, %v507_v63  ;;  %v3751_v18 = vadd.s32 4294967294, %v607_v61  ;;  %v690_v31 = vsel %vm676_vm3, %v687_v14, %v689_v36  ;;  %v3757_v27 = vadd.s32 4294967169, %v751_v32 }
  0xee   :  { %v320_v19 = vadd.s32 3, %v4602_v23  ;;  %v416_v53 = vsel %vm333_vm12, %v415_v41, %v414_v51  ;;  %v4641_v62 = vmul.u32.u64.low %v691_v20, %v690_v31  ;;  %v4642_v9 = vmul.u32.u64.high %v691_v20, %v690_v31, %v4641_v62 }
  0xef   :  { %v508_v1 = vshll.u32 %v4480_v26, %v4594_v12  ;;  %v514_v59 = vor.u32 4788187, %v513_v17  ;;  %v682_v7 = vsel %vm676_vm3, %v679_v8, %v681_v58  ;;  %v757_v50 = vadd.s32 1, %v3757_v27 }
  0xf0   :  { %v315_v24 = vsel %vm4584_vm14, %v4134_v33, %v312_v11  ;;  %v424_v63 = vadd.s32 3, %v4606_v39  ;;  %v521_v32 = vsub.s32 4, %v4460_v54  ;;  %v701_v51 = vadd.s32 1, %v4634_v37 }
  0xf1   :  { %v419_v41 = vsel %vm4590_vm15, %v4137_v35, %v416_v53  ;;  %v6688_v26 = vand.u32 2147483647, %v6687_v56  ;;  %v510_v21 = vor.u32 %v509_v60, %v508_v1  ;;  %vm3752_vm6 = vcmp.lt.s32.totalorder %v3751_v18, 0 }
  0xf2   :  { %vm758_vm7 = vcmp.gt.s32.totalorder %v757_v50, 0  ;;  %v698_v46 = vmul.u32 %v691_v20, %v682_v7  ;;  %vm700_vm8 = vc.u32 %v4642_v9, %v4633_v0  ;;  %v6529_v61 = vand.u32 2147483647, %v4507_v49 }
  0xf3   :  { %vm4658_vm5 = vcmp.le.f32.partialorder %v6688_v26, 0.7853982  ;;  %v759_v52 = vsel %vm758_vm7, %v757_v50, 0  ;;  %3964 = vcosq.f32 %v315_v24  ;;  %v4665_v44 = vand.u32 3, %v320_v19 }
  0xf4   :  { %v515_v29 = vand.u32 2147483647, %v514_v59  ;;  %v702_v14 = vsel %vm700_vm8, %v701_v51, %v4634_v37  ;;  %3966 = vsinq.f32 %v315_v24  ;;  %v4668_v48 = vsel %vm3752_vm6, 0, %v3751_v18 }
  0xf5   :  { %v703_v11 = vadd.s32 %v702_v14, %v698_v46  ;;  %v761_v17 = vand.u32 31, %v759_v52  ;;  %3968 = vcosq.f32 %v419_v41  ;;  %v4670_v8 = vand.u32 3, %v424_v63 }
  0xf6   :  { %v517_v20 = vcvt.s32.f32 %v510_v21  ;;  %v522_v16 = vsel %vm437_vm4, %v521_v32, %v4460_v54  ;;  %3970 = vsinq.f32 %v419_v41  ;;  %v754_v36 = vand.u32 8388607, %v6529_v61 }
  0xf7   :  { %v704_v58 = vadd.s32 536870912, %v703_v11  ;;  %v762_v60 = vsub.s32 32, %v761_v17  ;;  %v615_v18 = vsub.s32 4294967266, %v4668_v48  ;;  %v764_v31 = vshll.u32 %v6656_v28, %v761_v17 }
  0xf8   :  { %v4677_v37 = vmul.f32 %v517_v20, %v515_v29  ;;  %v854_v27 = vand.u32 2139095040, %v4511_v57  ;;  %v767_v54 = vshll.u32 %v6685_v55, %v761_v17  ;;  %v770_v1 = vshll.u32 %v6661_v42, %v761_v17 }
  0xf9   :  { %v4682_v19 = vshrl.u32 %v704_v58, 30  ;;  %v765_v53 = vshrl.u32 %v6685_v55, %v762_v60  ;;  %v768_v62 = vshrl.u32 %v6661_v42, %v762_v60  ;;  %v771_v59 = vshrl.u32 %v6686_v40, %v762_v60 }
  0xfa   :  { %v773_v7 = vshll.u32 %v6686_v40, %v761_v17  ;;  %v774_v50 = vshrl.u32 %v6664_v15, %v762_v60  ;;  %v4693_v24 = vsel %vm4658_vm5, 0, %v522_v16  ;;  %v595_v63 = vadd.s32 %v4495_v2, %v4528_v6 }
  0xfb   :  { %6691 = vst [vmem:[#allocation22_spill] sm:$0xff] %v4693_v24  ;;  %v706_v32 = vshll.u32 %v4682_v19, 30  ;;  %v760_v51 = vshrl.u32 %v759_v52, 5  ;;  %v766_v41 = vor.u32 %v765_v53, %v764_v31  ;;  %v769_v26 = vor.u32 %v768_v62, %v767_v54 }
  0xfc   :  { %v772_v21 = vor.u32 %v771_v59, %v770_v1  ;;  %v775_v46 = vor.u32 %v774_v50, %v773_v7  ;;  %v519_v29 = vxor.u32 2147483648, %v4677_v37  ;;  %v611_v14 = vsub.s32 32, %v4668_v48 }
  0xfd   :  { %v4700_v20 = vsub.s32 %v703_v11, %v706_v32  ;;  %v755_v58 = vor.u32 8388608, %v754_v36  ;;  %v616_v61 = vadd.s32 127, %v615_v18  ;;  %v776_v16 = vshll.u32 %v6664_v15, %v761_v17 }
  0xfe   :  { %v777_v39 = vshrl.u32 %v6649_v43, %v762_v60  ;;  %v855_v2 = vshrl.u32 %v854_v27, 23  ;;  %vm779_vm9 = vcmp.lt.s32.totalorder %v760_v51, 1  ;;  %vm781_vm10 = vcmp.lt.s32.totalorder %v760_v51, 3 }
  0xff   :  { %v709_v6 = vsub.s32 0, %v4700_v20  ;;  %vm782_vm11 = vcmp.lt.s32.totalorder %v760_v51, 4  ;;  %v787_v53 = vsel %vm779_vm9, %v766_v41, %v769_v26  ;;  %v763_v36 = vshrl.u32 %v6656_v28, %v762_v60 }
 0x100   :  { %v778_v52 = vor.u32 %v777_v39, %v776_v16  ;;  %v784_v31 = vsel %vm782_vm11, %v772_v21, 2102212464  ;;  %v788_v54 = vsel %vm782_vm11, %v775_v46, 920167782  ;;  %v4706_v62 = vpop.eup %3964  ;;  %vm780_vm12 = vcmp.lt.s32.totalorder %v760_v51, 2 }
 0x101   :  { %6692 = vst [vmem:[#allocation23_spill] sm:$0xff] %v4706_v62  ;;  %v3754_v11 = vmin.u32 %v709_v6, %v4700_v20  ;;  %v789_v17 = vsel %vm781_vm10, %v772_v21, %v788_v54  ;;  %v4711_v18 = vpop.eup %3966  ;;  %v791_v1 = vsel %vm779_vm9, %v769_v26, %v772_v21  ;;  %v795_v59 = vshll.u32 %v755_v58, 8 }
 0x102   :  { %6693 = vst [vmem:[#allocation10_spill] sm:$0xff] %v4711_v18  ;;  %v790_v27 = vsel %vm780_vm12, %v787_v53, %v789_v17  ;;  %v792_v39 = vsel %vm782_vm11, %v778_v52, 1326507024  ;;  %v4715_v7 = vpop.eup %3968  ;;  %vm326_vm13 = vcmp.eq.s32.totalorder %v4665_v44, 2  ;;  %v617_v50 = vshll.u32 %v616_v61, 23 }
 0x103   :  { %6694 = vst [vmem:[#allocation35_spill] sm:$0xff] %v4715_v7  ;;  %v711_v32 = vclz %v3754_v11  ;;  %v783_v16 = vsel %vm779_vm9, %v763_v36, %v766_v41  ;;  %v785_v60 = vsel %vm781_vm10, %v769_v26, %v784_v31  ;;  %v4720_v6 = vpop.eup %3970  ;;  %vm323_vm14 = vcmp.eq.s32.totalorder %v4665_v44, 0  ;;  %v6696_v31 = vld [vmem:[#allocation16_spill] sm:$0xff] }
 0x104   :  { %6695 = vst [vmem:[#allocation36_spill] sm:$0xff] %v4720_v6  ;;  %vm430_vm15 = vcmp.eq.s32.totalorder %v4670_v8, 2  ;;  %v793_v21 = vsel %vm781_vm10, %v775_v46, %v792_v39  ;;  %v4725_v52 = vmul.u32.u64.low %v795_v59, %v790_v27  ;;  %v4726_v58 = vmul.u32.u64.high %v795_v59, %v790_v27, %v4725_v52 }
 0x105   :  { %v3761_v53 = vadd.s32 4294967169, %v855_v2  ;;  %v528_v61 = vadd.s32 3, %v4693_v24  ;;  %v613_v54 = vshrl.u32 %v595_v63, %v611_v14  ;;  %v3755_v11 = vadd.s32 4294967294, %v711_v32 }
 0x106   :  { %v794_v41 = vsel %vm780_vm12, %v791_v1, %v793_v21  ;;  %v6533_v26 = vxor.u32 2147483648, %v4706_v62  ;;  %vm427_vm0 = vcmp.eq.s32.totalorder %v4670_v8, 0  ;;  %vm541_vm1 = vcmp.lt.s32.totalorder %v6696_v31, 0 }
 0x107   :  { %v4734_v36 = vmul.u32.u64.low %v795_v59, %v794_v41  ;;  %v4735_v17 = vmul.u32.u64.high %v795_v59, %v794_v41, %v4734_v36  ;;  %v861_v46 = vadd.s32 1, %v3761_v53  ;;  %v612_v27 = vshll.u32 %v4596_v25, %v4668_v48 }
 0x108   :  { %v618_v2 = vor.u32 4788187, %v617_v50  ;;  %vm3756_vm2 = vcmp.lt.s32.totalorder %v3755_v11, 0  ;;  %v786_v63 = vsel %vm780_vm12, %v783_v16, %v785_v60  ;;  %v520_v14 = vsel %vm437_vm4, %v519_v29, %v4677_v37 }
 0x109   :  { %v4743_v1 = vsel %vm3756_vm2, 0, %v3755_v11  ;;  %v805_v39 = vadd.s32 1, %v4726_v58  ;;  %vm862_vm3 = vcmp.gt.s32.totalorder %v861_v46, 0  ;;  %v6534_v32 = vxor.u32 2147483648, %v4711_v18 }
 0x10a   :  { %v6531_v21 = vxor.u32 2147483648, %v4715_v7  ;;  %v614_v53 = vor.u32 %v613_v54, %v612_v27  ;;  %v863_v41 = vsel %vm862_vm3, %v861_v46, 0  ;;  %v6532_v25 = vxor.u32 2147483648, %v4720_v6 }
 0x10b   :  { %v719_v48 = vsub.s32 4294967266, %v4743_v1  ;;  %v802_v51 = vmul.u32 %v795_v59, %v786_v63  ;;  %vm804_vm6 = vc.u32 %v4735_v17, %v4725_v52  ;;  %v523_v37 = vsel %vm4658_vm5, %v6687_v56, %v520_v14 }
 0x10c   :  { %v619_v29 = vand.u32 2147483647, %v618_v2  ;;  %v625_v50 = vsub.s32 4, %v4565_v47  ;;  %v806_v16 = vsel %vm804_vm6, %v805_v39, %v4726_v58  ;;  %v4762_v60 = vsel %vm326_vm13, %v6533_v26, %v4711_v18 }
 0x10d   :  { %v4764_v59 = vand.u32 3, %v528_v61  ;;  %v807_v54 = vadd.s32 %v806_v16, %v802_v51  ;;  %v865_v11 = vand.u32 31, %v863_v41  ;;  %v4771_v12 = vsel %vm323_vm14, %v4706_v62, %v6534_v32 }
 0x10e   :  { %v4778_v58 = vsel %vm430_vm15, %v6531_v21, %v4720_v6  ;;  %v621_v36 = vcvt.s32.f32 %v614_v53  ;;  %v6535_v61 = vand.u32 2147483647, %v4511_v57  ;;  %3972 = vcosq.f32 %v523_v37 }
 0x10f   :  { %v720_v46 = vadd.s32 127, %v719_v48  ;;  %v808_v27 = vadd.s32 536870912, %v807_v54  ;;  %v866_v2 = vsub.s32 32, %v865_v11  ;;  %v4786_v63 = vsel %vm427_vm0, %v4715_v7, %v6532_v25 }
 0x110   :  { %3974 = vsinq.f32 %v523_v37  ;;  %v4788_v14 = vmul.f32 %v621_v36, %v619_v29  ;;  %v4793_v39 = vsel %vm541_vm1, %v625_v50, %v4565_v47  ;;  %v699_v53 = vadd.s32 %v4633_v0, %v4642_v9 }
 0x111   :  { %v4797_v48 = vshrl.u32 %v808_v27, 30  ;;  %v869_v51 = vshrl.u32 %v6685_v55, %v866_v2  ;;  %v872_v16 = vshrl.u32 %v6661_v42, %v866_v2  ;;  %v715_v21 = vsub.s32 32, %v4743_v1 }
 0x112   :  { %v858_v37 = vand.u32 8388607, %v6535_v61  ;;  %v4804_v29 = vshrl.u32 %v863_v41, 5  ;;  %v875_v36 = vshrl.u32 %v6686_v40, %v866_v2  ;;  %v721_v47 = vshll.u32 %v720_v46, 23 }
 0x113   :  { %v810_v50 = vshll.u32 %v4797_v48, 30  ;;  %v868_v0 = vshll.u32 %v6656_v28, %v865_v11  ;;  %v871_v9 = vshll.u32 %v6685_v55, %v865_v11  ;;  %v874_v25 = vshll.u32 %v6661_v42, %v865_v11 }
 0x114   :  { %v877_v26 = vshll.u32 %v6686_v40, %v865_v11  ;;  %v878_v32 = vshrl.u32 %v6664_v15, %v866_v2  ;;  %v881_v46 = vshrl.u32 %v6649_v43, %v866_v2  ;;  %v717_v7 = vshrl.u32 %v699_v53, %v715_v21 }
 0x115   :  { %v4814_v61 = vsub.s32 %v807_v54, %v810_v50  ;;  %v870_v41 = vor.u32 %v869_v51, %v868_v0  ;;  %v873_v24 = vor.u32 %v872_v16, %v871_v9  ;;  %v876_v6 = vor.u32 %v875_v36, %v874_v25 }
 0x116   :  { %v879_v62 = vor.u32 %v878_v32, %v877_v26  ;;  %v880_v18 = vshll.u32 %v6664_v15, %v865_v11  ;;  %v6697_v23 = vand.u32 2147483647, %v6696_v31  ;;  %v722_v13 = vor.u32 4788187, %v721_v47 }
 0x117   :  { %v813_v30 = vsub.s32 0, %v4814_v61  ;;  %v859_v54 = vor.u32 8388608, %v858_v37  ;;  %vm886_vm5 = vcmp.lt.s32.totalorder %v4804_v29, 4  ;;  %v716_v51 = vshll.u32 %v4700_v20, %v4743_v1 }
 0x118   :  { %vm4820_vm4 = vcmp.le.f32.partialorder %v6697_v23, 0.7853982  ;;  %v882_v21 = vor.u32 %v881_v46, %v880_v18  ;;  %vm883_vm7 = vcmp.lt.s32.totalorder %v4804_v29, 1  ;;  %v892_v26 = vsel %vm886_vm5, %v879_v62, 920167782 }
 0x119   :  { %vm322_vm8 = vcmp.lt.s32.totalorder %v4665_v44, 2  ;;  %vm426_vm9 = vcmp.lt.s32.totalorder %v4670_v8, 2  ;;  %v3758_v23 = vmin.u32 %v813_v30, %v4814_v61  ;;  %vm885_vm10 = vcmp.lt.s32.totalorder %v4804_v29, 3 }
 0x11a   :  { %v891_v32 = vsel %vm883_vm7, %v870_v41, %v873_v24  ;;  %v958_v25 = vand.u32 2139095040, %v4515_v10  ;;  %v718_v20 = vor.u32 %v717_v7, %v716_v51  ;;  %v867_v18 = vshrl.u32 %v6656_v28, %v866_v2 }
 0x11b   :  { %v888_v1 = vsel %vm886_vm5, %v876_v6, 2102212464  ;;  %v893_v11 = vsel %vm885_vm10, %v876_v6, %v892_v26  ;;  %v723_v53 = vand.u32 2147483647, %v722_v13  ;;  %v815_v16 = vclz %v3758_v23  ;;  %v4846_v37 = vpop.eup %3972 }
 0x11c   :  { %vm884_vm11 = vcmp.lt.s32.totalorder %v4804_v29, 2  ;;  %v895_v30 = vsel %vm883_vm7, %v873_v24, %v876_v6  ;;  %6700 = vst [vmem:[#allocation16_spill] sm:$0xff] %v4846_v37  ;;  %v887_v7 = vsel %vm883_vm7, %v867_v18, %v870_v41  ;;  %v896_v36 = vsel %vm886_vm5, %v882_v21, 1326507024 }
 0x11d   :  { %v894_v2 = vsel %vm884_vm11, %v891_v32, %v893_v11  ;;  %v899_v47 = vshll.u32 %v859_v54, 8  ;;  %v4854_v50 = vpop.eup %3974  ;;  %vm319_vm12 = vweird.f32 %v4134_v33  ;;  %v3759_v13 = vadd.s32 4294967294, %v815_v16 }
 0x11e   :  { %6701 = vst [vmem:[#allocation37_spill] sm:$0xff] %v4854_v50  ;;  %v889_v6 = vsel %vm885_vm10, %v873_v24, %v888_v1  ;;  %v897_v0 = vsel %vm885_vm10, %v879_v62, %v896_v36  ;;  %v959_v9 = vshrl.u32 %v958_v25, 23  ;;  %vm423_vm13 = vweird.f32 %v4137_v35 }
 0x11f   :  { %v725_v41 = vcvt.s32.f32 %v718_v20  ;;  %v898_v46 = vsel %vm884_vm11, %v895_v30, %v897_v0  ;;  %v4864_v51 = vmul.u32.u64.low %v899_v47, %v894_v2  ;;  %v4865_v54 = vmul.u32.u64.high %v899_v47, %v894_v2, %v4864_v51 }
 0x120   :  { %vm3760_vm14 = vcmp.lt.s32.totalorder %v3759_v13, 0  ;;  %v4868_v21 = vmul.u32.u64.low %v899_v47, %v898_v46  ;;  %v4869_v26 = vmul.u32.u64.high %v899_v47, %v898_v46, %v4868_v21  ;;  %v3765_v23 = vadd.s32 4294967169, %v959_v9 }
 0x121   :  { %v4874_v24 = vsel %vm4820_vm4, 0, %v4793_v39  ;;  %v729_v62 = vsub.s32 4, %v4682_v19  ;;  %v818_v32 = vsel %vm3760_vm14, 0, %v3759_v13  ;;  %v890_v25 = vsel %vm884_vm11, %v887_v7, %v889_v6 }
 0x122   :  { %6702 = vst [vmem:[#allocation38_spill] sm:$0xff] %v4874_v24  ;;  %v6703_v20 = vand.u32 2147483647, %v4486_v5  ;;  %vm645_vm0 = vcmp.lt.s32.totalorder %v4486_v5, 0  ;;  %v726_v1 = vmul.f32 %v725_v41, %v723_v53  ;;  %v965_v11 = vadd.s32 1, %v3765_v23 }
 0x123   :  { %v329_v39 = vsel %vm322_vm8, %v4771_v12, %v4762_v60  ;;  %v433_v29 = vsel %vm426_vm9, %v4786_v63, %v4778_v58  ;;  %v823_v16 = vsub.s32 4294967266, %v818_v32  ;;  %v909_v30 = vadd.s32 1, %v4865_v54 }
 0x124   :  { %vm4881_vm15 = vcmp.le.f32.partialorder %v6703_v20, 0.7853982  ;;  %v6706_v7 = vxor.u32 2147483648, %v4788_v14  ;;  %v632_v2 = vadd.s32 3, %v4874_v24  ;;  %v906_v36 = vmul.u32 %v899_v47, %v890_v25 }
 0x125   :  { %vm908_vm2 = vc.u32 %v4869_v26, %v4864_v51  ;;  %v730_v44 = vsel %vm645_vm0, %v729_v62, %v4682_v19  ;;  %v6548_v60 = vand.u32 2147483647, %v4515_v10  ;;  %vm966_vm3 = vcmp.gt.s32.totalorder %v965_v11, 0 }
 0x126   :  { %v624_v53 = vsel %vm541_vm1, %v6706_v7, %v4788_v14  ;;  %v910_v8 = vsel %vm908_vm2, %v909_v30, %v4865_v54  ;;  %v727_v12 = vxor.u32 2147483648, %v726_v1  ;;  %v819_v58 = vsub.s32 32, %v818_v32 }
 0x127   :  { %v911_v63 = vadd.s32 %v910_v8, %v906_v36  ;;  %v967_v13 = vsel %vm966_vm3, %v965_v11, 0  ;;  %v4910_v14 = vsel %vm319_vm12, nan, %v329_v39  ;;  %v627_v47 = vsel %vm4820_vm4, %v6696_v31, %v624_v53 }
 0x128   :  { %v824_v6 = vadd.s32 127, %v823_v16  ;;  %v969_v0 = vand.u32 31, %v967_v13  ;;  %v4917_v19 = vsel %vm423_vm13, nan, %v433_v29  ;;  %v4919_v9 = vand.u32 3, %v632_v2 }
 0x129   :  { %6707 = vst [vmem:[#allocation39_spill] sm:$0xff] %v4917_v19  ;;  %v803_v41 = vadd.s32 %v4725_v52, %v4735_v17  ;;  %v912_v46 = vadd.s32 536870912, %v911_v63  ;;  %v4925_v54 = vsel %vm4881_vm15, 0, %v730_v44  ;;  %v962_v27 = vand.u32 8388607, %v6548_v60 }
 0x12a   :  { %6708 = vst [vmem:[#allocation40_spill] sm:$0xff] %v4925_v54  ;;  %v970_v21 = vsub.s32 32, %v969_v0  ;;  %v1062_v23 = vand.u32 2139095040, %v4525_v45  ;;  %3976 = vcosq.f32 %v627_v47  ;;  %v728_v62 = vsel %vm645_vm0, %v727_v12, %v726_v1 }
 0x12b   :  { %v821_v25 = vshrl.u32 %v803_v41, %v819_v58  ;;  %v4932_v20 = vshrl.u32 %v912_v46, 30  ;;  %v6551_v52 = vxor.u32 2147483648, %v4854_v50  ;;  %v6549_v17 = vxor.u32 2147483648, %v4846_v37 }
 0x12c   :  { %3978 = vsinq.f32 %v627_v47  ;;  %v825_v11 = vshll.u32 %v824_v6, 23  ;;  %v4937_v39 = vadd.s32 3, %v4925_v54  ;;  %v820_v29 = vshll.u32 %v4814_v61, %v818_v32 }
 0x12d   :  { %v914_v16 = vshll.u32 %v4932_v20, 30  ;;  %v973_v30 = vshrl.u32 %v6685_v55, %v970_v21  ;;  %v4945_v1 = vsel %vm4881_vm15, %v4486_v5, %v728_v62  ;;  %v963_v7 = vor.u32 8388608, %v962_v27 }
 0x12e   :  { %v976_v53 = vshrl.u32 %v6661_v42, %v970_v21  ;;  %v1063_v2 = vshrl.u32 %v1062_v23, 23  ;;  %v822_v36 = vor.u32 %v821_v25, %v820_v29  ;;  %v972_v8 = vshll.u32 %v6656_v28, %v969_v0 }
 0x12f   :  { %v4948_v44 = vsub.s32 %v911_v63, %v914_v16  ;;  %v979_v61 = vshrl.u32 %v6686_v40, %v970_v21  ;;  %v826_v32 = vor.u32 4788187, %v825_v11  ;;  %v975_v12 = vshll.u32 %v6685_v55, %v969_v0 }
 0x130   :  { %v981_v58 = vshll.u32 %v6686_v40, %v969_v0  ;;  %v982_v18 = vshrl.u32 %v6664_v15, %v970_v21  ;;  %v968_v6 = vshrl.u32 %v967_v13, 5  ;;  %v974_v41 = vor.u32 %v973_v30, %v972_v8 }
 0x131   :  { %v917_v47 = vsub.s32 0, %v4948_v44  ;;  %v978_v46 = vshll.u32 %v6661_v42, %v969_v0  ;;  %v977_v27 = vor.u32 %v976_v53, %v975_v12  ;;  %v984_v23 = vshll.u32 %v6664_v15, %v969_v0 }
 0x132   :  { %v983_v63 = vor.u32 %v982_v18, %v981_v58  ;;  %v985_v62 = vshrl.u32 %v6649_v43, %v970_v21  ;;  %3980 = vcosq.f32 %v4945_v1  ;;  %v4961_v29 = vshll.u32 %v963_v7, 8 }
 0x133   :  { %v3762_v25 = vmin.u32 %v917_v47, %v4948_v44  ;;  %v980_v11 = vor.u32 %v979_v61, %v978_v46  ;;  %vm534_vm1 = vcmp.eq.s32.totalorder %v4764_v59, 2  ;;  %v827_v16 = vand.u32 2147483647, %v826_v32 }
 0x134   :  { %v829_v13 = vcvt.s32.f32 %v822_v36  ;;  %v986_v30 = vor.u32 %v985_v62, %v984_v23  ;;  %v3769_v8 = vadd.s32 4294967169, %v1063_v2  ;;  %vm531_vm6 = vcmp.eq.s32.totalorder %v4764_v59, 0 }
 0x135   :  { %v919_v53 = vclz %v3762_v25  ;;  %v971_v0 = vshrl.u32 %v6656_v28, %v970_v21  ;;  %vm987_vm4 = vcmp.lt.s32.totalorder %v968_v6, 1  ;;  %vm990_vm5 = vcmp.lt.s32.totalorder %v968_v6, 4 }
 0x136   :  { %vm638_vm7 = vcmp.eq.s32.totalorder %v4919_v9, 2  ;;  %vm749_vm8 = vcmp.lt.s32.totalorder %v4507_v49, 0  ;;  %vm988_vm9 = vcmp.lt.s32.totalorder %v968_v6, 2  ;;  %vm989_vm10 = vcmp.lt.s32.totalorder %v968_v6, 3 }
 0x137   :  { %v995_v7 = vsel %vm987_vm4, %v974_v41, %v977_v27  ;;  %v996_v61 = vsel %vm990_vm5, %v983_v63, 920167782  ;;  %v3763_v12 = vadd.s32 4294967294, %v919_v53  ;;  %v992_v32 = vsel %vm990_vm5, %v980_v11, 2102212464  ;;  %v4969_v58 = vpop.eup %3976 }
 0x138   :  { %v997_v36 = vsel %vm989_vm10, %v980_v11, %v996_v61  ;;  %v999_v2 = vsel %vm987_vm4, %v977_v27, %v980_v11  ;;  %v991_v18 = vsel %vm987_vm4, %v971_v0, %v974_v41  ;;  %v1000_v47 = vsel %vm990_vm5, %v986_v30, 1326507024 }
 0x139   :  { %v998_v21 = vsel %vm988_vm9, %v995_v7, %v997_v36  ;;  %v1069_v46 = vadd.s32 1, %v3769_v8  ;;  %v4972_v23 = vpop.eup %3978  ;;  %vm3764_vm11 = vcmp.lt.s32.totalorder %v3763_v12, 0  ;;  %v1001_v62 = vsel %vm989_vm10, %v983_v63, %v1000_v47 }
 0x13a   :  { %v4976_v25 = vmul.u32.u64.low %v4961_v29, %v998_v21  ;;  %v4977_v60 = vmul.u32.u64.high %v4961_v29, %v998_v21, %v4976_v25  ;;  %v4980_v53 = vsel %vm3764_vm11, 0, %v3763_v12  ;;  %v993_v11 = vsel %vm989_vm10, %v977_v27, %v992_v32 }
 0x13b   :  { %v1002_v41 = vsel %vm988_vm9, %v999_v2, %v1001_v62  ;;  %vm1070_vm14 = vcmp.gt.s32.totalorder %v1069_v46, 0  ;;  %v6550_v30 = vxor.u32 2147483648, %v4969_v58  ;;  %v833_v8 = vsub.s32 4, %v4797_v48 }
 0x13c   :  { %v927_v0 = vsub.s32 4294967266, %v4980_v53  ;;  %v1071_v7 = vsel %vm1070_vm14, %v1069_v46, 0  ;;  %v830_v63 = vmul.f32 %v829_v13, %v827_v16  ;;  %v4996_v27 = vsel %vm534_vm1, %v6549_v17, %v4854_v50 }
 0x13d   :  { %v4988_v61 = vmul.u32.u64.low %v4961_v29, %v1002_v41  ;;  %v4989_v36 = vmul.u32.u64.high %v4961_v29, %v1002_v41, %v4988_v61  ;;  %v1073_v21 = vand.u32 31, %v1071_v7  ;;  %v6709_v12 = vand.u32 2147483647, %v4507_v49 }
 0x13e   :  { %v994_v16 = vsel %vm988_vm9, %v991_v18, %v993_v11  ;;  %v1013_v13 = vadd.s32 1, %v4977_v60  ;;  %v6552_v2 = vand.u32 2147483647, %v4525_v45  ;;  %v5012_v47 = vsel %vm531_vm6, %v4846_v37, %v6551_v52 }
 0x13f   :  { %vm5000_vm15 = vcmp.le.f32.partialorder %v6709_v12, 0.7853982  ;;  %v5016_v62 = vand.u32 3, %v4937_v39  ;;  %v5018_v41 = vsub.s32 32, %v1073_v21  ;;  %v5025_v6 = vsel %vm638_vm7, %v6550_v30, %v4972_v23  ;;  %v5031_v61 = vpop.eup %3980 }
 0x140   :  { %3982 = vsinq.f32 %v4945_v1  ;;  %v834_v18 = vsel %vm749_vm8, %v833_v8, %v4797_v48  ;;  %v928_v11 = vadd.s32 127, %v927_v0  ;;  %v831_v39 = vxor.u32 2147483648, %v830_v63 }
 0x141   :  { %v907_v12 = vadd.s32 %v4864_v51, %v4869_v26  ;;  %v1010_v17 = vmul.u32 %v4961_v29, %v994_v16  ;;  %vm1012_vm0 = vc.u32 %v4989_v36, %v4976_v25  ;;  %v923_v30 = vsub.s32 32, %v4980_v53 }
 0x142   :  { %v1014_v1 = vsel %vm1012_vm0, %v1013_v13, %v4977_v60  ;;  %v1066_v52 = vand.u32 8388607, %v6552_v2  ;;  %v1077_v48 = vshrl.u32 %v6685_v55, %v5018_v41  ;;  %v1076_v0 = vshll.u32 %v6656_v28, %v1073_v21 }
 0x143   :  { %v1015_v8 = vadd.s32 %v1014_v1, %v1010_v17  ;;  %v1079_v51 = vshll.u32 %v6685_v55, %v1073_v21  ;;  %v1080_v26 = vshrl.u32 %v6661_v42, %v5018_v41  ;;  %v929_v29 = vshll.u32 %v928_v11, 23 }
 0x144   :  { %v1083_v16 = vshrl.u32 %v6686_v40, %v5018_v41  ;;  %v1085_v60 = vshll.u32 %v6686_v40, %v1073_v21  ;;  %v1086_v13 = vshrl.u32 %v6664_v15, %v5018_v41  ;;  %v832_v2 = vsel %vm749_vm8, %v831_v39, %v830_v63 }
 0x145   :  { %v1016_v17 = vadd.s32 536870912, %v1015_v8  ;;  %v5055_v1 = vshrl.u32 %v1071_v7, 5  ;;  %v1082_v46 = vshll.u32 %v6661_v42, %v1073_v21  ;;  %v1078_v37 = vor.u32 %v1077_v48, %v1076_v0 }
 0x146   :  { %v1081_v50 = vor.u32 %v1080_v26, %v1079_v51  ;;  %v1087_v54 = vor.u32 %v1086_v13, %v1085_v60  ;;  %v1089_v11 = vshrl.u32 %v6649_v43, %v5018_v41  ;;  %v5062_v35 = vsel %vm5000_vm15, 0, %v834_v18 }
 0x147   :  { %v925_v24 = vshrl.u32 %v907_v12, %v923_v30  ;;  %v5064_v33 = vshrl.u32 %v1016_v17, 30  ;;  %v1067_v19 = vor.u32 8388608, %v1066_v52  ;;  %vm635_vm2 = vcmp.eq.s32.totalorder %v4919_v9, 0 }
 0x148   :  { %v835_v7 = vsel %vm5000_vm15, %v4507_v49, %v832_v2  ;;  %v930_v63 = vor.u32 4788187, %v929_v29  ;;  %v1084_v39 = vor.u32 %v1083_v16, %v1082_v46  ;;  %v1088_v48 = vshll.u32 %v6664_v15, %v1073_v21 }
 0x149   :  { %v924_v0 = vshll.u32 %v4948_v44, %v4980_v53  ;;  %v1018_v18 = vshll.u32 %v5064_v33, 30  ;;  %vm1091_vm3 = vcmp.lt.s32.totalorder %v5055_v1, 1  ;;  %vm1094_vm1 = vcmp.lt.s32.totalorder %v5055_v1, 4 }
 0x14a   :  { %v6562_v52 = vxor.u32 2147483648, %v5031_v61  ;;  %v1090_v30 = vor.u32 %v1089_v11, %v1088_v48  ;;  %v1099_v32 = vsel %vm1091_vm3, %v1078_v37, %v1081_v50  ;;  %v1100_v2 = vsel %vm1094_vm1, %v1087_v54, 920167782 }
 0x14b   :  { %vm530_vm6 = vcmp.lt.s32.totalorder %v4764_v59, 2  ;;  %vm742_vm4 = vcmp.eq.s32.totalorder %v5016_v62, 2  ;;  %3984 = vcosq.f32 %v835_v7  ;;  %v926_v44 = vor.u32 %v925_v24, %v924_v0 }
 0x14c   :  { %v5083_v53 = vsub.s32 %v1015_v8, %v1018_v18  ;;  %vm1093_vm5 = vcmp.lt.s32.totalorder %v5055_v1, 3  ;;  %v931_v21 = vand.u32 2147483647, %v930_v63  ;;  %vm1092_vm7 = vcmp.lt.s32.totalorder %v5055_v1, 2 }
 0x14d   :  { %v1101_v46 = vsel %vm1093_vm5, %v1084_v39, %v1100_v2  ;;  %v1107_v12 = vshll.u32 %v1067_v19, 8  ;;  %v5089_v51 = vpop.eup %3982  ;;  %vm634_vm8 = vcmp.lt.s32.totalorder %v4919_v9, 2  ;;  %v1096_v24 = vsel %vm1094_vm1, %v1084_v39, 2102212464 }
 0x14e   :  { %v1021_v26 = vsub.s32 0, %v5083_v53  ;;  %v1102_v8 = vsel %vm1092_vm7, %v1099_v32, %v1101_v46  ;;  %v1103_v29 = vsel %vm1091_vm3, %v1081_v50, %v1084_v39  ;;  %vm853_vm9 = vcmp.lt.s32.totalorder %v4511_v57, 0 }
 0x14f   :  { %v1075_v19 = vshrl.u32 %v6656_v28, %v5018_v41  ;;  %v1104_v16 = vsel %vm1094_vm1, %v1090_v30, 1326507024  ;;  %v5104_v60 = vmul.u32.u64.low %v1107_v12, %v1102_v8  ;;  %v5105_v13 = vmul.u32.u64.high %v1107_v12, %v1102_v8, %v5104_v60 }
 0x150   :  { %3986 = vsinq.f32 %v835_v7  ;;  %v933_v17 = vcvt.s32.f32 %v926_v44  ;;  %v3766_v11 = vmin.u32 %v1021_v26, %v5083_v53  ;;  %v1105_v63 = vsel %vm1093_vm5, %v1087_v54, %v1104_v16 }
 0x151   :  { %v1095_v39 = vsel %vm1091_vm3, %v1075_v19, %v1078_v37  ;;  %v1097_v41 = vsel %vm1093_vm5, %v1081_v50, %v1096_v24  ;;  %v1106_v48 = vsel %vm1092_vm7, %v1103_v29, %v1105_v63  ;;  %v1166_v0 = vand.u32 2139095040, %v4535_v4 }
 0x152   :  { %v6712_v18 = vxor.u32 2147483648, %v4972_v23  ;;  %v6563_v30 = vxor.u32 2147483648, %v5089_v51  ;;  %v6713_v54 = vand.u32 2147483647, %v4511_v57  ;;  %v934_v50 = vmul.f32 %v933_v17, %v931_v21 }
 0x153   :  { %v1023_v32 = vclz %v3766_v11  ;;  %vm527_vm11 = vweird.f32 %v6687_v56  ;;  %vm631_vm14 = vweird.f32 %v6696_v31  ;;  %v840_v2 = vadd.s32 3, %v5062_v35 }
 0x154   :  { %v637_v7 = vsel %vm635_vm2, %v4969_v58, %v6712_v18  ;;  %vm5126_vm10 = vcmp.le.f32.partialorder %v6713_v54, 0.7853982  ;;  %v937_v44 = vsub.s32 4, %v4932_v20  ;;  %v1098_v8 = vsel %vm1092_vm7, %v1095_v39, %v1097_v41 }
 0x155   :  { %v5134_v46 = vmul.u32.u64.low %v1107_v12, %v1106_v48  ;;  %v5135_v26 = vmul.u32.u64.high %v1107_v12, %v1106_v48, %v5134_v46  ;;  %v3767_v24 = vadd.s32 4294967294, %v1023_v32  ;;  %v1117_v29 = vadd.s32 1, %v5105_v13 }
 0x156   :  { %v1167_v19 = vshrl.u32 %v1166_v0, 23  ;;  %v537_v21 = vsel %vm530_vm6, %v5012_v47, %v4996_v27  ;;  %vm735_vm15 = vweird.f32 %v4486_v5  ;;  %vm738_vm0 = vcmp.lt.s32.totalorder %v5016_v62, 2 }
 0x157   :  { %vm739_vm2 = vcmp.eq.s32.totalorder %v5016_v62, 0  ;;  %v744_v1 = vsel %vm742_vm4, %v6562_v52, %v5089_v51  ;;  %v935_v17 = vxor.u32 2147483648, %v934_v50  ;;  %vm3768_vm3 = vcmp.lt.s32.totalorder %v3767_v24, 0 }
 0x158   :  { %v741_v16 = vsel %vm739_vm2, %v5031_v61, %v6563_v30  ;;  %v3773_v59 = vadd.s32 4294967169, %v1167_v19  ;;  %v641_v27 = vsel %vm634_vm8, %v637_v7, %v5025_v6  ;;  %v1026_v47 = vsel %vm3768_vm3, 0, %v3767_v24  ;;  %v5166_v0 = vpop.eup %3984 }
 0x159   :  { %v1114_v11 = vmul.u32 %v1107_v12, %v1098_v8  ;;  %vm1116_vm1 = vc.u32 %v5135_v26, %v5104_v60  ;;  %v5160_v63 = vand.u32 3, %v840_v2  ;;  %v938_v39 = vsel %vm853_vm9, %v937_v44, %v4932_v20  ;;  %6716 = vst [vmem:[#allocation41_spill] sm:$0xff] %v5166_v0 }
 0x15a   :  { %v1031_v41 = vsub.s32 4294967266, %v1026_v47  ;;  %v1118_v48 = vsel %vm1116_vm1, %v1117_v29, %v5105_v13  ;;  %v745_v9 = vsel %vm738_vm0, %v741_v16, %v744_v1  ;;  %v1027_v6 = vsub.s32 32, %v1026_v47 }
 0x15b   :  { %v1119_v18 = vadd.s32 %v1118_v48, %v1114_v11  ;;  %v1173_v12 = vadd.s32 1, %v3773_v59  ;;  %v936_v7 = vsel %vm853_vm9, %v935_v17, %v934_v50  ;;  %v6564_v32 = vand.u32 2147483647, %v4535_v4 }
 0x15c   :  { %v1032_v54 = vadd.s32 127, %v1031_v41  ;;  %v1270_v2 = vand.u32 2139095040, %v4538_v34  ;;  %v5176_v20 = vsel %vm5126_vm10, 0, %v938_v39  ;;  %v1011_v13 = vadd.s32 %v4976_v25, %v4989_v36 }
 0x15d   :  { %6717 = vst [vmem:[#allocation42_spill] sm:$0xff] %v5176_v20  ;;  %v1120_v62 = vadd.s32 536870912, %v1119_v18  ;;  %vm1174_vm6 = vcmp.gt.s32.totalorder %v1173_v12, 0  ;;  %v5182_v44 = vsel %vm527_vm11, nan, %v537_v21  ;;  %v5186_v50 = vsel %vm631_vm14, nan, %v641_v27  ;;  %v5188_v8 = vpop.eup %3986 }
 0x15e   :  { %v1033_v46 = vshll.u32 %v1032_v54, 23  ;;  %v1175_v24 = vsel %vm1174_vm6, %v1173_v12, 0  ;;  %6718 = vst [vmem:[#allocation43_spill] sm:$0xff] %v5188_v8  ;;  %v939_v29 = vsel %vm5126_vm10, %v4511_v57, %v936_v7  ;;  %v1029_v19 = vshrl.u32 %v1011_v13, %v1027_v6 }
 0x15f   :  { %v5193_v25 = vshrl.u32 %v1120_v62, 30  ;;  %v1177_v36 = vand.u32 31, %v1175_v24  ;;  %v5197_v21 = vsel %vm735_vm15, nan, %v745_v9  ;;  %vm843_vm4 = vcmp.eq.s32.totalorder %v5160_v63, 0 }
 0x160   :  { %vm846_vm5 = vcmp.eq.s32.totalorder %v5160_v63, 2  ;;  %v5202_v1 = vadd.s32 3, %v5176_v20  ;;  %vm957_vm7 = vcmp.lt.s32.totalorder %v4515_v10, 0  ;;  %v1170_v37 = vand.u32 8388607, %v6564_v32 }
 0x161   :  { %v1271_v16 = vshrl.u32 %v1270_v2, 23  ;;  %v1028_v59 = vshll.u32 %v5083_v53, %v1026_v47  ;;  %v1122_v27 = vshll.u32 %v5193_v25, 30  ;;  %v1178_v11 = vsub.s32 32, %v1177_v36 }
 0x162   :  { %3988 = vcosq.f32 %v939_v29  ;;  %v1034_v41 = vor.u32 4788187, %v1033_v46  ;;  %v1041_v48 = vsub.s32 4, %v5064_v33  ;;  %v1171_v7 = vor.u32 8388608, %v1170_v37 }
 0x163   :  { %3990 = vsinq.f32 %v939_v29  ;;  %v1030_v9 = vor.u32 %v1029_v19, %v1028_v59  ;;  %v5212_v6 = vsub.s32 %v1119_v18, %v1122_v27  ;;  %v1181_v12 = vshrl.u32 %v6685_v55, %v1178_v11 }
 0x164   :  { %v1176_v54 = vshrl.u32 %v1175_v24, 5  ;;  %v1184_v2 = vshrl.u32 %v6661_v42, %v1178_v11  ;;  %v3777_v53 = vadd.s32 4294967169, %v1271_v16  ;;  %v1180_v13 = vshll.u32 %v6656_v28, %v1177_v36 }
 0x165   :  { %v1125_v47 = vsub.s32 0, %v5212_v6  ;;  %v1183_v62 = vshll.u32 %v6685_v55, %v1177_v36  ;;  %v1187_v46 = vshrl.u32 %v6686_v40, %v1178_v11  ;;  %v1035_v52 = vand.u32 2147483647, %v1034_v41 }
 0x166   :  { %v1186_v29 = vshll.u32 %v6661_v42, %v1177_v36  ;;  %v1189_v18 = vshll.u32 %v6686_v40, %v1177_v36  ;;  %v1190_v19 = vshrl.u32 %v6664_v15, %v1178_v11  ;;  %v6719_v24 = vand.u32 2147483647, %v4515_v10 }
 0x167   :  { %v1037_v16 = vcvt.s32.f32 %v1030_v9  ;;  %v3770_v59 = vmin.u32 %v1125_v47, %v5212_v6  ;;  %v1182_v27 = vor.u32 %v1181_v12, %v1180_v13  ;;  %v1185_v30 = vor.u32 %v1184_v2, %v1183_v62 }
 0x168   :  { %vm5225_vm8 = vcmp.le.f32.partialorder %v6719_v24, 0.7853982  ;;  %v1188_v32 = vor.u32 %v1187_v46, %v1186_v29  ;;  %v1191_v17 = vor.u32 %v1190_v19, %v1189_v18  ;;  %v1192_v41 = vshll.u32 %v6664_v15, %v1177_v36 }
 0x169   :  { %v1193_v39 = vshrl.u32 %v6649_v43, %v1178_v11  ;;  %v6722_v20 = vxor.u32 2147483648, %v5188_v8  ;;  %v6723_v5 = vxor.u32 2147483648, %v5166_v0  ;;  %v1042_v12 = vsel %vm957_vm7, %v1041_v48, %v5064_v33 }
 0x16a   :  { %v1127_v2 = vclz %v3770_v59  ;;  %vm842_vm9 = vcmp.lt.s32.totalorder %v5160_v63, 2  ;;  %v1038_v36 = vmul.f32 %v1037_v16, %v1035_v52  ;;  %v1211_v13 = vshll.u32 %v1171_v7, 8 }
 0x16b   :  { %v845_v24 = vsel %vm843_vm4, %v5166_v0, %v6722_v20  ;;  %v848_v9 = vsel %vm846_vm5, %v6723_v5, %v5188_v8  ;;  %v1194_v47 = vor.u32 %v1193_v39, %v1192_v41  ;;  %v1277_v62 = vadd.s32 1, %v3777_v53 }
 0x16c   :  { %v3771_v46 = vadd.s32 4294967294, %v1127_v2  ;;  %v1179_v20 = vshrl.u32 %v6656_v28, %v1178_v11  ;;  %vm1195_vm10 = vcmp.lt.s32.totalorder %v1176_v54, 1  ;;  %vm1198_vm0 = vcmp.lt.s32.totalorder %v1176_v54, 4 }
 0x16d   :  { %vm1197_vm2 = vcmp.lt.s32.totalorder %v1176_v54, 3  ;;  %v1200_v29 = vsel %vm1198_vm0, %v1188_v32, 2102212464  ;;  %v1203_v5 = vsel %vm1195_vm10, %v1182_v27, %v1185_v30  ;;  %v1204_v18 = vsel %vm1198_vm0, %v1191_v17, 920167782 }
 0x16e   :  { %vm839_vm3 = vweird.f32 %v4507_v49  ;;  %vm3772_vm1 = vcmp.lt.s32.totalorder %v3771_v46, 0  ;;  %vm1196_vm6 = vcmp.lt.s32.totalorder %v1176_v54, 2  ;;  %v1205_v33 = vsel %vm1197_vm2, %v1188_v32, %v1204_v18 }
 0x16f   :  { %v1207_v52 = vsel %vm1195_vm10, %v1185_v30, %v1188_v32  ;;  %v1039_v39 = vxor.u32 2147483648, %v1038_v36  ;;  %v1130_v48 = vsel %vm3772_vm1, 0, %v3771_v46  ;;  %v1206_v7 = vsel %vm1196_vm6, %v1203_v5, %v1205_v33  ;;  %v5252_v53 = vpop.eup %3988 }
 0x170   :  { %v1208_v11 = vsel %vm1198_vm0, %v1194_v47, 1326507024  ;;  %6724 = vst [vmem:[#allocation44_spill] sm:$0xff] %v5252_v53  ;;  %v1135_v19 = vsub.s32 4294967266, %v1130_v48  ;;  %v1199_v16 = vsel %vm1195_vm10, %v1179_v20, %v1182_v27  ;;  %v1201_v59 = vsel %vm1197_vm2, %v1185_v30, %v1200_v29  ;;  %v5257_v2 = vpop.eup %3990 }
 0x171   :  { %v1209_v41 = vsel %vm1197_vm2, %v1191_v17, %v1208_v11  ;;  %6725 = vst [vmem:[#allocation45_spill] sm:$0xff] %v5257_v2  ;;  %v5261_v18 = vsel %vm5225_vm8, 0, %v1042_v12  ;;  %v5264_v46 = vmul.u32.u64.low %v1211_v13, %v1206_v7  ;;  %v5265_v5 = vmul.u32.u64.high %v1211_v13, %v1206_v7, %v5264_v46 }
 0x172   :  { %6726 = vst [vmem:[#allocation46_spill] sm:$0xff] %v5261_v18  ;;  %v1210_v32 = vsel %vm1196_vm6, %v1207_v52, %v1209_v41  ;;  %v5269_v47 = vand.u32 3, %v5202_v1  ;;  %v1136_v27 = vadd.s32 127, %v1135_v19  ;;  %v1040_v17 = vsel %vm957_vm7, %v1039_v39, %v1038_v36 }
 0x173   :  { %v5271_v20 = vmul.u32.u64.low %v1211_v13, %v1210_v32  ;;  %v5272_v30 = vmul.u32.u64.high %v1211_v13, %v1210_v32, %v5271_v20  ;;  %v1131_v29 = vsub.s32 32, %v1130_v48  ;;  %v1202_v12 = vsel %vm1196_vm6, %v1199_v16, %v1201_v59 }
 0x174   :  { %vm1278_vm4 = vcmp.gt.s32.totalorder %v1277_v62, 0  ;;  %v849_v33 = vsel %vm842_vm9, %v845_v24, %v848_v9  ;;  %v1048_v52 = vadd.s32 3, %v5261_v18  ;;  %v6567_v7 = vand.u32 2147483647, %v4538_v34 }
 0x175   :  { %v1279_v1 = vsel %vm1278_vm4, %v1277_v62, 0  ;;  %v1115_v11 = vadd.s32 %v5104_v60, %v5135_v26  ;;  %v1137_v19 = vshll.u32 %v1136_v27, 23  ;;  %v1221_v41 = vadd.s32 1, %v5265_v5 }
 0x176   :  { %v1281_v32 = vand.u32 31, %v1279_v1  ;;  %vm947_vm5 = vcmp.eq.s32.totalorder %v5269_v47, 0  ;;  %vm950_vm7 = vcmp.eq.s32.totalorder %v5269_v47, 2  ;;  %v1043_v63 = vsel %vm5225_vm8, %v4515_v10, %v1040_v17 }
 0x177   :  { %v1218_v54 = vmul.u32 %v1211_v13, %v1202_v12  ;;  %vm1220_vm9 = vc.u32 %v5272_v30, %v5264_v46  ;;  %v5293_v24 = vsel %vm839_vm3, nan, %v849_v33  ;;  %v1133_v60 = vshrl.u32 %v1115_v11, %v1131_v29 }
 0x178   :  { %v1222_v26 = vsel %vm1220_vm9, %v1221_v41, %v5265_v5  ;;  %v1282_v9 = vsub.s32 32, %v1281_v32  ;;  %v6573_v36 = vxor.u32 2147483648, %v5252_v53  ;;  %v5297_v62 = vand.u32 3, %v1048_v52 }
 0x179   :  { %v1223_v39 = vadd.s32 %v1222_v26, %v1218_v54  ;;  %v1274_v37 = vand.u32 8388607, %v6567_v7  ;;  %v6569_v13 = vxor.u32 2147483648, %v5257_v2  ;;  %3992 = vcosq.f32 %v1043_v63 }
 0x17a   :  { %v1132_v16 = vshll.u32 %v5212_v6, %v1130_v48  ;;  %v1138_v59 = vor.u32 4788187, %v1137_v19  ;;  %3994 = vsinq.f32 %v1043_v63  ;;  %v1285_v20 = vshrl.u32 %v6685_v55, %v1282_v9 }
 0x17b   :  { %v1224_v27 = vadd.s32 536870912, %v1223_v39  ;;  %v1288_v5 = vshrl.u32 %v6661_v42, %v1282_v9  ;;  %v5305_v29 = vshrl.u32 %v1279_v1, 5  ;;  %v1294_v12 = vshrl.u32 %v6664_v15, %v1282_v9 }
 0x17c   :  { %v1134_v17 = vor.u32 %v1133_v60, %v1132_v16  ;;  %v1374_v33 = vand.u32 2139095040, %v4541_v22  ;;  %v1284_v11 = vshll.u32 %v6656_v28, %v1281_v32  ;;  %v1287_v6 = vshll.u32 %v6685_v55, %v1281_v32 }
 0x17d   :  { %v5309_v52 = vshrl.u32 %v1224_v27, 30  ;;  %v1291_v48 = vshrl.u32 %v6686_v40, %v1282_v9  ;;  %vm1061_vm8 = vcmp.lt.s32.totalorder %v4525_v45, 0  ;;  %v1139_v19 = vand.u32 2147483647, %v1138_v59 }
 0x17e   :  { %v1293_v41 = vshll.u32 %v6686_v40, %v1281_v32  ;;  %v1296_v1 = vshll.u32 %v6664_v15, %v1281_v32  ;;  %v1297_v63 = vshrl.u32 %v6649_v43, %v1282_v9  ;;  %v1286_v60 = vor.u32 %v1285_v20, %v1284_v11 }
 0x17f   :  { %v1226_v54 = vshll.u32 %v5309_v52, 30  ;;  %v1289_v26 = vor.u32 %v1288_v5, %v1287_v6  ;;  %v1290_v16 = vshll.u32 %v6661_v42, %v1281_v32  ;;  %v949_v27 = vsel %vm947_vm5, %v5252_v53, %v6569_v13 }
 0x180   :  { %v952_v59 = vsel %vm950_vm7, %v6573_v36, %v5257_v2  ;;  %v1295_v7 = vor.u32 %v1294_v12, %v1293_v41  ;;  %v1298_v49 = vor.u32 %v1297_v63, %v1296_v1  ;;  %vm946_vm10 = vcmp.lt.s32.totalorder %v5269_v47, 2 }
 0x181   :  { %v6727_v20 = vand.u32 2147483647, %v4525_v45  ;;  %v1141_v5 = vcvt.s32.f32 %v1134_v17  ;;  %v5337_v11 = vsub.s32 %v1223_v39, %v1226_v54  ;;  %v1275_v6 = vor.u32 8388608, %v1274_v37 }
 0x182   :  { %v1292_v13 = vor.u32 %v1291_v48, %v1290_v16  ;;  %v1145_v53 = vsub.s32 4, %v5193_v25  ;;  %v1283_v18 = vshrl.u32 %v6656_v28, %v1282_v9  ;;  %vm1299_vm2 = vcmp.lt.s32.totalorder %v5305_v29, 1 }
 0x183   :  { %vm5333_vm0 = vcmp.le.f32.partialorder %v6727_v20, 0.7853982  ;;  %v1375_v12 = vshrl.u32 %v1374_v33, 23  ;;  %v1142_v41 = vmul.f32 %v1141_v5, %v1139_v19  ;;  %v1229_v1 = vsub.s32 0, %v5337_v11 }
 0x184   :  { %vm1302_vm1 = vcmp.lt.s32.totalorder %v5305_v29, 4  ;;  %v1307_v63 = vsel %vm1299_vm2, %v1286_v60, %v1289_v26  ;;  %vm1300_vm6 = vcmp.lt.s32.totalorder %v5305_v29, 2  ;;  %vm1301_vm4 = vcmp.lt.s32.totalorder %v5305_v29, 3 }
 0x185   :  { %v1308_v39 = vsel %vm1302_vm1, %v1295_v7, 920167782  ;;  %v1312_v37 = vsel %vm1302_vm1, %v1298_v49, 1326507024  ;;  %v3774_v17 = vmin.u32 %v1229_v1, %v5337_v11  ;;  %v1304_v9 = vsel %vm1302_vm1, %v1292_v13, 2102212464 }
 0x186   :  { %v1309_v33 = vsel %vm1301_vm4, %v1292_v13, %v1308_v39  ;;  %v1311_v48 = vsel %vm1299_vm2, %v1289_v26, %v1292_v13  ;;  %v1313_v54 = vsel %vm1301_vm4, %v1295_v7, %v1312_v37  ;;  %v1315_v16 = vshll.u32 %v1275_v6, 8  ;;  %v5357_v5 = vpop.eup %3992 }
 0x187   :  { %v1310_v19 = vsel %vm1300_vm6, %v1307_v63, %v1309_v33  ;;  %v3781_v20 = vadd.s32 4294967169, %v1375_v12  ;;  %6730 = vst [vmem:[#allocation47_spill] sm:$0xff] %v5357_v5  ;;  %vm6594_vm5 = vweird.f32 %v4511_v57  ;;  %v1143_v49 = vxor.u32 2147483648, %v1142_v41  ;;  %v5365_v36 = vpop.eup %3994 }
 0x188   :  { %v1146_v1 = vsel %vm1061_vm8, %v1145_v53, %v5193_v25  ;;  %v1231_v39 = vclz %v3774_v17  ;;  %v1303_v13 = vsel %vm1299_vm2, %v1283_v18, %v1286_v60  ;;  %6731 = vst [vmem:[#allocation48_spill] sm:$0xff] %v5365_v36  ;;  %v1305_v7 = vsel %vm1301_vm4, %v1289_v26, %v1304_v9 }
 0x189   :  { %v1314_v6 = vsel %vm1300_vm6, %v1311_v48, %v1313_v54  ;;  %v5371_v12 = vmul.u32.u64.low %v1315_v16, %v1310_v19  ;;  %v5372_v63 = vmul.u32.u64.high %v1315_v16, %v1310_v19, %v5371_v12  ;;  %vm1051_vm7 = vcmp.eq.s32.totalorder %v5297_v62, 0 }
 0x18a   :  { %v3775_v37 = vadd.s32 4294967294, %v1231_v39  ;;  %v5376_v25 = vmul.u32.u64.low %v1315_v16, %v1314_v6  ;;  %v5377_v53 = vmul.u32.u64.high %v1315_v16, %v1314_v6, %v5376_v25  ;;  %v1381_v17 = vadd.s32 1, %v3781_v20 }
 0x18b   :  { %v953_v18 = vsel %vm946_vm10, %v949_v27, %v952_v59  ;;  %v5383_v60 = vsel %vm5333_vm0, 0, %v1146_v1  ;;  %vm1165_vm9 = vcmp.lt.s32.totalorder %v4535_v4, 0  ;;  %v1219_v26 = vadd.s32 %v5264_v46, %v5272_v30 }
 0x18c   :  { %6732 = vst [vmem:[#allocation49_spill] sm:$0xff] %v5383_v60  ;;  %v6576_v9 = vand.u32 2147483647, %v4541_v22  ;;  %v1144_v33 = vsel %vm1061_vm8, %v1143_v49, %v1142_v41  ;;  %vm3776_vm2 = vcmp.lt.s32.totalorder %v3775_v37, 0  ;;  %v1306_v48 = vsel %vm1300_vm6, %v1303_v13, %v1305_v7 }
 0x18d   :  { %vm1382_vm1 = vcmp.gt.s32.totalorder %v1381_v17, 0  ;;  %v6574_v47 = vxor.u32 2147483648, %v5357_v5  ;;  %v1234_v27 = vsel %vm3776_vm2, 0, %v3775_v37  ;;  %v1325_v59 = vadd.s32 1, %v5372_v63 }
 0x18e   :  { %v1383_v19 = vsel %vm1382_vm1, %v1381_v17, 0  ;;  %v6575_v54 = vxor.u32 2147483648, %v5365_v36  ;;  %v1235_v20 = vsub.s32 32, %v1234_v27  ;;  %v1239_v46 = vsub.s32 4294967266, %v1234_v27 }
 0x18f   :  { %v1249_v30 = vsub.s32 4, %v5309_v52  ;;  %v1147_v41 = vsel %vm5333_vm0, %v4525_v45, %v1144_v33  ;;  %v1322_v49 = vmul.u32 %v1315_v16, %v1306_v48  ;;  %vm1324_vm8 = vc.u32 %v5377_v53, %v5371_v12 }
 0x190   :  { %v1385_v29 = vand.u32 31, %v1383_v19  ;;  %v1236_v1 = vshll.u32 %v5337_v11, %v1234_v27  ;;  %v1237_v39 = vshrl.u32 %v1219_v26, %v1235_v20  ;;  %v1240_v13 = vadd.s32 127, %v1239_v46 }
 0x191   :  { %v1326_v7 = vsel %vm1324_vm8, %v1325_v59, %v5372_v63  ;;  %v5406_v6 = vsel %vm6594_vm5, nan, %v953_v18  ;;  %vm1050_vm10 = vcmp.lt.s32.totalorder %v5297_v62, 2  ;;  %vm1054_vm6 = vcmp.eq.s32.totalorder %v5297_v62, 2 }
 0x192   :  { %v1327_v32 = vadd.s32 %v1326_v7, %v1322_v49  ;;  %v1386_v16 = vsub.s32 32, %v1385_v29  ;;  %v1152_v37 = vadd.s32 3, %v5383_v60  ;;  %v6733_v25 = vand.u32 2147483647, %v4535_v4 }
 0x193   :  { %v1238_v17 = vor.u32 %v1237_v39, %v1236_v1  ;;  %v1241_v63 = vshll.u32 %v1240_v13, 23  ;;  %v1378_v18 = vand.u32 8388607, %v6576_v9  ;;  %v1053_v26 = vsel %vm1051_vm7, %v5357_v5, %v6575_v54 }
 0x194   :  { %vm5413_vm0 = vcmp.le.f32.partialorder %v6733_v25, 0.7853982  ;;  %v1056_v33 = vsel %vm1054_vm6, %v6574_v47, %v5365_v36  ;;  %3996 = vcosq.f32 %v1147_v41  ;;  %v1328_v48 = vadd.s32 536870912, %v1327_v32 }
 0x195   :  { %3998 = vsinq.f32 %v1147_v41  ;;  %v1242_v27 = vor.u32 4788187, %v1241_v63  ;;  %v1250_v59 = vsel %vm1165_vm9, %v1249_v30, %v5309_v52  ;;  %v1389_v20 = vshrl.u32 %v6685_v55, %v1386_v16 }
 0x196   :  { %v5431_v46 = vshrl.u32 %v1328_v48, 30  ;;  %v5433_v49 = vshrl.u32 %v1383_v19, 5  ;;  %v1388_v1 = vshll.u32 %v6656_v28, %v1385_v29  ;;  %v1392_v39 = vshrl.u32 %v6661_v42, %v1386_v16 }
 0x197   :  { %v1243_v13 = vand.u32 2147483647, %v1242_v27  ;;  %v1245_v7 = vcvt.s32.f32 %v1238_v17  ;;  %v1391_v25 = vshll.u32 %v6685_v55, %v1385_v29  ;;  %v1395_v41 = vshrl.u32 %v6686_v40, %v1386_v16 }
 0x198   :  { %v1330_v63 = vshll.u32 %v5431_v46, 30  ;;  %v1394_v52 = vshll.u32 %v6661_v42, %v1385_v29  ;;  %v1397_v30 = vshll.u32 %v6686_v40, %v1385_v29  ;;  %v1398_v48 = vshrl.u32 %v6664_v15, %v1386_v16 }
 0x199   :  { %v1246_v19 = vmul.f32 %v1245_v7, %v1243_v13  ;;  %v1379_v47 = vor.u32 8388608, %v1378_v18  ;;  %v1390_v54 = vor.u32 %v1389_v20, %v1388_v1  ;;  %v1401_v9 = vshrl.u32 %v6649_v43, %v1386_v16 }
 0x19a   :  { %v5444_v57 = vsub.s32 %v1327_v32, %v1330_v63  ;;  %v1393_v17 = vor.u32 %v1392_v39, %v1391_v25  ;;  %v1396_v27 = vor.u32 %v1395_v41, %v1394_v52  ;;  %v1399_v5 = vor.u32 %v1398_v48, %v1397_v30 }
 0x19b   :  { %v5448_v36 = vsel %vm1050_vm10, %v1053_v26, %v1056_v33  ;;  %v5450_v2 = vand.u32 3, %v1152_v37  ;;  %v1400_v60 = vshll.u32 %v6664_v15, %v1385_v29  ;;  %v1478_v0 = vand.u32 2139095040, %v4551_v38 }
 0x19c   :  { %v1247_v13 = vxor.u32 2147483648, %v1246_v19  ;;  %v5456_v18 = vsel %vm5413_vm0, 0, %v1250_v59  ;;  %v1333_v32 = vsub.s32 0, %v5444_v57  ;;  %vm1406_vm4 = vcmp.lt.s32.totalorder %v5433_v49, 4 }
 0x19d   :  { %6736 = vst [vmem:[#allocation50_spill] sm:$0xff] %v5456_v18  ;;  %v1402_v20 = vor.u32 %v1401_v9, %v1400_v60  ;;  %vm1403_vm7 = vcmp.lt.s32.totalorder %v5433_v49, 1  ;;  %v1412_v62 = vsel %vm1406_vm4, %v1399_v5, 920167782  ;;  %v1419_v37 = vshll.u32 %v1379_v47, 8 }
 0x19e   :  { %v3778_v29 = vmin.u32 %v1333_v32, %v5444_v57  ;;  %vm1405_vm2 = vcmp.lt.s32.totalorder %v5433_v49, 3  ;;  %v1408_v26 = vsel %vm1406_vm4, %v1396_v27, 2102212464  ;;  %v1411_v33 = vsel %vm1403_vm7, %v1390_v54, %v1393_v17 }
 0x19f   :  { %v1387_v59 = vshrl.u32 %v6656_v28, %v1386_v16  ;;  %v1413_v60 = vsel %vm1405_vm2, %v1396_v27, %v1412_v62  ;;  %v6590_v9 = vand.u32 2147483647, %v4551_v38  ;;  %v1479_v1 = vshrl.u32 %v1478_v0, 23 }
 0x1a0   :  { %v1248_v47 = vsel %vm1165_vm9, %v1247_v13, %v1246_v19  ;;  %vm1269_vm1 = vcmp.lt.s32.totalorder %v4538_v34, 0  ;;  %v1335_v39 = vclz %v3778_v29  ;;  %vm1404_vm8 = vcmp.lt.s32.totalorder %v5433_v49, 2 }
 0x1a1   :  { %v1415_v7 = vsel %vm1403_vm7, %v1393_v17, %v1396_v27  ;;  %v5479_v25 = vpop.eup %3996  ;;  %vm1158_vm10 = vcmp.eq.s32.totalorder %v5450_v2, 2  ;;  %v1407_v16 = vsel %vm1403_vm7, %v1387_v59, %v1390_v54  ;;  %v1409_v0 = vsel %vm1405_vm2, %v1393_v17, %v1408_v26 }
 0x1a2   :  { %6737 = vst [vmem:[#allocation51_spill] sm:$0xff] %v5479_v25  ;;  %v1414_v41 = vsel %vm1404_vm8, %v1411_v33, %v1413_v60  ;;  %v1416_v63 = vsel %vm1406_vm4, %v1402_v20, 1326507024  ;;  %v5490_v52 = vpop.eup %3998  ;;  %vm1155_vm9 = vcmp.eq.s32.totalorder %v5450_v2, 0  ;;  %v3779_v30 = vadd.s32 4294967294, %v1335_v39 }
 0x1a3   :  { %6738 = vst [vmem:[#allocation52_spill] sm:$0xff] %v5490_v52  ;;  %v1417_v48 = vsel %vm1405_vm2, %v1399_v5, %v1416_v63  ;;  %v5495_v19 = vmul.u32.u64.low %v1419_v37, %v1414_v41  ;;  %v5496_v27 = vmul.u32.u64.high %v1419_v37, %v1414_v41, %v5495_v19  ;;  %vm6591_vm6 = vweird.f32 %v4515_v10 }
 0x1a4   :  { %v1251_v54 = vsel %vm5413_vm0, %v4535_v4, %v1248_v47  ;;  %v6739_v17 = vand.u32 2147483647, %v4538_v34  ;;  %v1323_v32 = vadd.s32 %v5371_v12, %v5377_v53  ;;  %v1418_v5 = vsel %vm1404_vm8, %v1415_v7, %v1417_v48 }
 0x1a5   :  { %v3785_v20 = vadd.s32 4294967169, %v1479_v1  ;;  %vm3780_vm7 = vcmp.lt.s32.totalorder %v3779_v30, 0  ;;  %v1410_v62 = vsel %vm1404_vm8, %v1407_v16, %v1409_v0  ;;  %vm1154_vm0 = vcmp.lt.s32.totalorder %v5450_v2, 2 }
 0x1a6   :  { %vm5504_vm4 = vcmp.le.f32.partialorder %v6739_v17, 0.7853982  ;;  %v5514_v29 = vmul.u32.u64.low %v1419_v37, %v1418_v5  ;;  %v5515_v11 = vmul.u32.u64.high %v1419_v37, %v1418_v5, %v5514_v29  ;;  %v6587_v26 = vxor.u32 2147483648, %v5479_v25 }
 0x1a7   :  { %v1338_v33 = vsel %vm3780_vm7, 0, %v3779_v30  ;;  %v1353_v59 = vsub.s32 4, %v5431_v46  ;;  %v1485_v60 = vadd.s32 1, %v3785_v20  ;;  %4000 = vcosq.f32 %v1251_v54 }
 0x1a8   :  { %v1339_v12 = vsub.s32 32, %v1338_v33  ;;  %v1343_v53 = vsub.s32 4294967266, %v1338_v33  ;;  %v1429_v1 = vadd.s32 1, %v5496_v27  ;;  %v6588_v47 = vxor.u32 2147483648, %v5490_v52 }
 0x1a9   :  { %v1426_v49 = vmul.u32 %v1419_v37, %v1410_v62  ;;  %v1482_v39 = vand.u32 8388607, %v6590_v9  ;;  %vm1486_vm2 = vcmp.gt.s32.totalorder %v1485_v60, 0  ;;  %v1340_v7 = vshll.u32 %v5444_v57, %v1338_v33 }
 0x1aa   :  { %v1341_v16 = vshrl.u32 %v1323_v32, %v1339_v12  ;;  %v1344_v0 = vadd.s32 127, %v1343_v53  ;;  %vm1428_vm8 = vc.u32 %v5515_v11, %v5495_v19  ;;  %v1256_v41 = vadd.s32 3, %v5456_v18 }
 0x1ab   :  { %v1354_v63 = vsel %vm1269_vm1, %v1353_v59, %v5431_v46  ;;  %v1430_v30 = vsel %vm1428_vm8, %v1429_v1, %v5496_v27  ;;  %v1487_v48 = vsel %vm1486_vm2, %v1485_v60, 0  ;;  %v1160_v37 = vsel %vm1158_vm10, %v6587_v26, %v5490_v52 }
 0x1ac   :  { %v1342_v57 = vor.u32 %v1341_v16, %v1340_v7  ;;  %v1345_v17 = vshll.u32 %v1344_v0, 23  ;;  %v1431_v32 = vadd.s32 %v1430_v30, %v1426_v49  ;;  %v1157_v5 = vsel %vm1155_vm9, %v5479_v25, %v6588_v47 }
 0x1ad   :  { %v1483_v20 = vor.u32 8388608, %v1482_v39  ;;  %v1489_v46 = vand.u32 31, %v1487_v48  ;;  %v6589_v27 = vand.u32 2147483647, %v4554_v3  ;;  %v5545_v62 = vsel %vm6591_vm6, nan, %v5448_v36 }
 0x1ae   :  { %v1346_v29 = vor.u32 4788187, %v1345_v17  ;;  %v5549_v33 = vsel %vm5504_vm4, 0, %v1354_v63  ;;  %v1432_v59 = vadd.s32 536870912, %v1431_v32  ;;  %4002 = vsinq.f32 %v1251_v54 }
 0x1af   :  { %6742 = vst [vmem:[#allocation53_spill] sm:$0xff] %v5549_v33  ;;  %v5551_v60 = vand.u32 3, %v1256_v41  ;;  %v1490_v12 = vsub.s32 32, %v1489_v46  ;;  %v1582_v53 = vand.u32 2139095040, %v4554_v3  ;;  %v5556_v1 = vsel %vm1154_vm0, %v1157_v5, %v1160_v37 }
 0x1b0   :  { %v1347_v49 = vand.u32 2147483647, %v1346_v29  ;;  %v1349_v39 = vcvt.s32.f32 %v1342_v57  ;;  %v5558_v36 = vshrl.u32 %v1432_v59, 30  ;;  %v5561_v7 = vadd.s32 3, %v5549_v33 }
 0x1b1   :  { %v1493_v16 = vshrl.u32 %v6685_v55, %v1490_v12  ;;  %v5564_v0 = vshll.u32 %v1483_v20, 8  ;;  %v5568_v54 = vand.u32 8388607, %v6589_v27  ;;  %v5571_v2 = vadd.s32 %v5495_v19, %v5515_v11 }
 0x1b2   :  { %v1350_v41 = vmul.f32 %v1349_v39, %v1347_v49  ;;  %v1434_v63 = vshll.u32 %v5558_v36, 30  ;;  %v1496_v30 = vshrl.u32 %v6661_v42, %v1490_v12  ;;  %v1488_v37 = vshrl.u32 %v1487_v48, 5 }
 0x1b3   :  { %v1492_v57 = vshll.u32 %v6656_v28, %v1489_v46  ;;  %v1499_v17 = vshrl.u32 %v6686_v40, %v1490_v12  ;;  %v1583_v5 = vshrl.u32 %v1582_v53, 23  ;;  %v1495_v59 = vshll.u32 %v6685_v55, %v1489_v46 }
 0x1b4   :  { %v1351_v20 = vxor.u32 2147483648, %v1350_v41  ;;  %v5577_v29 = vsub.s32 %v1431_v32, %v1434_v63  ;;  %v1498_v49 = vshll.u32 %v6661_v42, %v1489_v46  ;;  %v5581_v39 = vpop.eup %4000  ;;  %v1501_v11 = vshll.u32 %v6686_v40, %v1489_v46 }
 0x1b5   :  { %6743 = vst [vmem:[#allocation54_spill] sm:$0xff] %v5581_v39  ;;  %v1494_v19 = vor.u32 %v1493_v16, %v1492_v57  ;;  %v1502_v26 = vshrl.u32 %v6664_v15, %v1490_v12  ;;  %v1497_v32 = vor.u32 %v1496_v30, %v1495_v59  ;;  %v1504_v16 = vshll.u32 %v6664_v15, %v1489_v46 }
 0x1b6   :  { %v1352_v47 = vsel %vm1269_vm1, %v1351_v20, %v1350_v41  ;;  %v1437_v53 = vsub.s32 0, %v5577_v29  ;;  %v1500_v63 = vor.u32 %v1499_v17, %v1498_v49  ;;  %v1505_v57 = vshrl.u32 %v6649_v43, %v1490_v12 }
 0x1b7   :  { %v1355_v27 = vsel %vm5504_vm4, %v4538_v34, %v1352_v47  ;;  %v1503_v9 = vor.u32 %v1502_v26, %v1501_v11  ;;  %vm1262_vm10 = vcmp.eq.s32.totalorder %v5551_v60, 2  ;;  %vm1373_vm9 = vcmp.lt.s32.totalorder %v4541_v22, 0 }
 0x1b8   :  { %v3782_v41 = vmin.u32 %v1437_v53, %v5577_v29  ;;  %vm1507_vm1 = vcmp.lt.s32.totalorder %v1488_v37, 1  ;;  %v3789_v30 = vadd.s32 4294967169, %v1583_v5  ;;  %v1457_v17 = vsub.s32 4, %v5558_v36 }
 0x1b9   :  { %v1491_v13 = vshrl.u32 %v6656_v28, %v1490_v12  ;;  %v1506_v47 = vor.u32 %v1505_v57, %v1504_v16  ;;  %vm1508_vm4 = vcmp.lt.s32.totalorder %v1488_v37, 2  ;;  %vm1259_vm7 = vcmp.eq.s32.totalorder %v5551_v60, 0 }
 0x1ba   :  { %4004 = vcosq.f32 %v1355_v27  ;;  %v1439_v26 = vclz %v3782_v41  ;;  %vm1509_vm0 = vcmp.lt.s32.totalorder %v1488_v37, 3  ;;  %vm1510_vm2 = vcmp.lt.s32.totalorder %v1488_v37, 4 }
 0x1bb   :  { %v6744_v46 = vand.u32 2147483647, %v4541_v22  ;;  %v1512_v59 = vsel %vm1510_vm2, %v1500_v63, 2102212464  ;;  %v1515_v5 = vsel %vm1507_vm1, %v1494_v19, %v1497_v32  ;;  %v1516_v49 = vsel %vm1510_vm2, %v1503_v9, 920167782  ;;  %v5609_v11 = vpop.eup %4002 }
 0x1bc   :  { %v1519_v12 = vsel %vm1507_vm1, %v1497_v32, %v1500_v63  ;;  %6747 = vst [vmem:[#allocation55_spill] sm:$0xff] %v5609_v11  ;;  %v3783_v53 = vadd.s32 4294967294, %v1439_v26  ;;  %v1511_v16 = vsel %vm1507_vm1, %v1491_v13, %v1494_v19  ;;  %v1517_v57 = vsel %vm1509_vm0, %v1500_v63, %v1516_v49 }
 0x1bd   :  { %vm5603_vm8 = vcmp.le.f32.partialorder %v6744_v46, 0.7853982  ;;  %v1520_v41 = vsel %vm1510_vm2, %v1506_v47, 1326507024  ;;  %vm6609_vm6 = vweird.f32 %v4525_v45  ;;  %v1513_v48 = vsel %vm1509_vm0, %v1497_v32, %v1512_v59 }
 0x1be   :  { %v1518_v46 = vsel %vm1508_vm4, %v1515_v5, %v1517_v57  ;;  %v1521_v33 = vsel %vm1509_vm0, %v1503_v9, %v1520_v41  ;;  %v1589_v10 = vadd.s32 1, %v3789_v30  ;;  %vm3784_vm5 = vcmp.lt.s32.totalorder %v3783_v53, 0 }
 0x1bf   :  { %v1522_v18 = vsel %vm1508_vm4, %v1519_v12, %v1521_v33  ;;  %v5616_v25 = vmul.u32.u64.low %v5564_v0, %v1518_v46  ;;  %v5617_v52 = vmul.u32.u64.high %v5564_v0, %v1518_v46, %v5616_v25  ;;  %v6600_v26 = vxor.u32 2147483648, %v5609_v11 }
 0x1c0   :  { %v1442_v19 = vsel %vm3784_vm5, 0, %v3783_v53  ;;  %v5622_v63 = vmul.u32.u64.low %v5564_v0, %v1522_v18  ;;  %v5623_v13 = vmul.u32.u64.high %v5564_v0, %v1522_v18, %v5622_v63  ;;  %v1514_v9 = vsel %vm1508_vm4, %v1511_v16, %v1513_v48 }
 0x1c1   :  { %v1443_v32 = vsub.s32 32, %v1442_v19  ;;  %v1447_v47 = vsub.s32 4294967266, %v1442_v19  ;;  %vm1590_vm1 = vcmp.gt.s32.totalorder %v1589_v10, 0  ;;  %v6748_v33 = vxor.u32 2147483648, %v5581_v39 }
 0x1c2   :  { %4006 = vsinq.f32 %v1355_v27  ;;  %v1458_v59 = vsel %vm1373_vm9, %v1457_v17, %v5558_v36  ;;  %v1591_v5 = vsel %vm1590_vm1, %v1589_v10, 0  ;;  %v1444_v18 = vshll.u32 %v5577_v29, %v1442_v19 }
 0x1c3   :  { %v1264_v30 = vsel %vm1262_vm10, %v6748_v33, %v5609_v11  ;;  %v1445_v49 = vshrl.u32 %v5571_v2, %v1443_v32  ;;  %v1448_v12 = vadd.s32 127, %v1447_v47  ;;  %v1533_v37 = vadd.s32 1, %v5617_v52 }
 0x1c4   :  { %v1261_v48 = vsel %vm1259_vm7, %v5581_v39, %v6600_v26  ;;  %v1530_v27 = vmul.u32 %v5564_v0, %v1514_v9  ;;  %vm1532_vm5 = vc.u32 %v5623_v13, %v5616_v25  ;;  %v1593_v36 = vand.u32 31, %v1591_v5 }
 0x1c5   :  { %v1446_v10 = vor.u32 %v1445_v49, %v1444_v18  ;;  %v1449_v17 = vshll.u32 %v1448_v12, 23  ;;  %v5647_v2 = vsel %vm5603_vm8, 0, %v1458_v59  ;;  %v1534_v29 = vsel %vm1532_vm5, %v1533_v37, %v5617_v52 }
 0x1c6   :  { %6749 = vst [vmem:[#allocation56_spill] sm:$0xff] %v5647_v2  ;;  %vm1258_vm10 = vcmp.lt.s32.totalorder %v5551_v60, 2  ;;  %v1535_v53 = vadd.s32 %v1534_v29, %v1530_v27  ;;  %v5651_v16 = vshrl.u32 %v1591_v5, 5  ;;  %v1594_v57 = vsub.s32 32, %v1593_v36 }
 0x1c7   :  { %v5656_v0 = vsel %vm6609_vm6, nan, %v5556_v1  ;;  %v5659_v41 = vand.u32 3, %v5561_v7  ;;  %v1450_v46 = vor.u32 4788187, %v1449_v17  ;;  %vm1477_vm4 = vcmp.lt.s32.totalorder %v4551_v38, 0  ;;  %v5666_v60 = vpop.eup %4004  ;;  %v6752_v1 = vld [vmem:[#allocation32_spill] sm:$0xff] }
 0x1c8   :  { %v6750_v19 = vor.u32 8388608, %v5568_v54  ;;  %6751 = vst [vmem:[#allocation57_spill] sm:$0xff] %v5666_v60  ;;  %v5668_v63 = vsel %vm1258_vm10, %v1261_v48, %v1264_v30  ;;  %v5671_v32 = vadd.s32 3, %v5647_v2  ;;  %v1536_v47 = vadd.s32 536870912, %v1535_v53 }
 0x1c9   :  { %v1451_v33 = vand.u32 2147483647, %v1450_v46  ;;  %v1453_v7 = vcvt.s32.f32 %v1446_v10  ;;  %v1603_v59 = vshrl.u32 %v6686_v40, %v1594_v57  ;;  %v1686_v5 = vand.u32 2139095040, %v6752_v1 }
 0x1ca   :  { %v5664_v52 = vshll.u32 %v6750_v19, 8  ;;  %v1537_v18 = vshrl.u32 %v1536_v47, 30  ;;  %v1597_v54 = vshrl.u32 %v6685_v55, %v1594_v57  ;;  %v1600_v49 = vshrl.u32 %v6661_v42, %v1594_v57 }
 0x1cb   :  { %vm1611_vm7 = vcmp.lt.s32.totalorder %v5651_v16, 1  ;;  %v1454_v30 = vmul.f32 %v1453_v7, %v1451_v33  ;;  %v6753_v12 = vand.u32 2147483647, %v4551_v38  ;;  %v1596_v48 = vshll.u32 %v6656_v28, %v1593_v36 }
 0x1cc   :  { %v1599_v27 = vshll.u32 %v6685_v55, %v1593_v36  ;;  %v1602_v10 = vshll.u32 %v6661_v42, %v1593_v36  ;;  %v1538_v17 = vshll.u32 %v1537_v18, 30  ;;  %v1561_v29 = vsub.s32 4, %v1537_v18 }
 0x1cd   :  { %vm5681_vm0 = vcmp.le.f32.partialorder %v6753_v12, 0.7853982  ;;  %v1605_v46 = vshll.u32 %v6686_v40, %v1593_v36  ;;  %v1606_v19 = vshrl.u32 %v6664_v15, %v1594_v57  ;;  %v1455_v47 = vxor.u32 2147483648, %v1454_v30 }
 0x1ce   :  { %v1604_v33 = vor.u32 %v1603_v59, %v1602_v10  ;;  %v1608_v7 = vshll.u32 %v6664_v15, %v1593_v36  ;;  %v1609_v12 = vshrl.u32 %v6649_v43, %v1594_v57  ;;  %v5692_v26 = vsub.s32 %v1535_v53, %v1538_v17 }
 0x1cf   :  { %v1598_v9 = vor.u32 %v1597_v54, %v1596_v48  ;;  %v1601_v2 = vor.u32 %v1600_v49, %v1599_v27  ;;  %v1607_v39 = vor.u32 %v1606_v19, %v1605_v46  ;;  %v5694_v11 = vpop.eup %4006  ;;  %vm1366_vm2 = vcmp.eq.s32.totalorder %v5659_v41, 2 }
 0x1d0   :  { %6756 = vst [vmem:[#allocation32_spill] sm:$0xff] %v5694_v11  ;;  %v6610_v45 = vxor.u32 2147483648, %v5666_v60  ;;  %v1456_v8 = vsel %vm1373_vm9, %v1455_v47, %v1454_v30  ;;  %v1595_v59 = vshrl.u32 %v6656_v28, %v1594_v57  ;;  %v1610_v10 = vor.u32 %v1609_v12, %v1608_v7 }
 0x1d1   :  { %vm1363_vm1 = vcmp.eq.s32.totalorder %v5659_v41, 0  ;;  %v1459_v36 = vsel %vm5603_vm8, %v4541_v22, %v1456_v8  ;;  %v1541_v53 = vsub.s32 0, %v5692_v26  ;;  %v1562_v54 = vsel %vm1477_vm4, %v1561_v29, %v1537_v18 }
 0x1d2   :  { %vm1614_vm5 = vcmp.lt.s32.totalorder %v5651_v16, 4  ;;  %4008 = vcosq.f32 %v1459_v36  ;;  %vm1613_vm10 = vcmp.lt.s32.totalorder %v5651_v16, 3  ;;  %v1615_v48 = vsel %vm1611_vm7, %v1595_v59, %v1598_v9 }
 0x1d3   :  { %v1616_v49 = vsel %vm1614_vm5, %v1604_v33, 2102212464  ;;  %v1620_v30 = vsel %vm1614_vm5, %v1607_v39, 920167782  ;;  %v3786_v57 = vmin.u32 %v1541_v53, %v5692_v26  ;;  %v1619_v20 = vsel %vm1611_vm7, %v1598_v9, %v1601_v2 }
 0x1d4   :  { %v1617_v8 = vsel %vm1613_vm10, %v1601_v2, %v1616_v49  ;;  %v6611_v18 = vxor.u32 2147483648, %v5694_v11  ;;  %v1621_v27 = vsel %vm1613_vm10, %v1604_v33, %v1620_v30  ;;  %v1623_v17 = vsel %vm1611_vm7, %v1601_v2, %v1604_v33 }
 0x1d5   :  { %v1624_v29 = vsel %vm1614_vm5, %v1610_v10, 1326507024  ;;  %vm1362_vm9 = vcmp.lt.s32.totalorder %v5659_v41, 2  ;;  %4010 = vsinq.f32 %v1459_v36  ;;  %v1543_v46 = vclz %v3786_v57 }
 0x1d6   :  { %v5725_v19 = vsel %vm5681_vm0, 0, %v1562_v54  ;;  %vm1612_vm8 = vcmp.lt.s32.totalorder %v5651_v16, 2  ;;  %vm6629_vm6 = vweird.f32 %v4535_v4  ;;  %v1625_v7 = vsel %vm1613_vm10, %v1607_v39, %v1624_v29 }
 0x1d7   :  { %6757 = vst [vmem:[#allocation58_spill] sm:$0xff] %v5725_v19  ;;  %v1618_v9 = vsel %vm1612_vm8, %v1615_v48, %v1617_v8  ;;  %v1622_v47 = vsel %vm1612_vm8, %v1619_v20, %v1621_v27  ;;  %v1687_v12 = vshrl.u32 %v1686_v5, 23  ;;  %v3787_v2 = vadd.s32 4294967294, %v1543_v46 }
 0x1d8   :  { %v1626_v33 = vsel %vm1612_vm8, %v1623_v17, %v1625_v7  ;;  %v5732_v59 = vmul.u32.u64.low %v5664_v52, %v1622_v47  ;;  %v5733_v10 = vmul.u32.u64.high %v5664_v52, %v1622_v47, %v5732_v59  ;;  %vm6621_vm7 = vweird.f32 %v4538_v34 }
 0x1d9   :  { %v5738_v36 = vmul.u32.u64.low %v5664_v52, %v1626_v33  ;;  %v5739_v53 = vmul.u32.u64.high %v5664_v52, %v1626_v33, %v5738_v36  ;;  %v3793_v54 = vadd.s32 4294967169, %v1687_v12  ;;  %v6758_v49 = vand.u32 2147483647, %v6752_v1 }
 0x1da   :  { %v1368_v39 = vsel %vm1366_vm2, %v6610_v45, %v5694_v11  ;;  %v5749_v16 = vand.u32 3, %v5671_v32  ;;  %v1531_v5 = vadd.s32 %v5616_v25, %v5623_v13  ;;  %vm3788_vm5 = vcmp.lt.s32.totalorder %v3787_v2, 0 }
 0x1db   :  { %v1690_v30 = vand.u32 8388607, %v6758_v49  ;;  %v1365_v57 = vsel %vm1363_vm1, %v5666_v60, %v6611_v18  ;;  %v1546_v48 = vsel %vm3788_vm5, 0, %v3787_v2  ;;  %v1568_v8 = vadd.s32 3, %v5725_v19 }
 0x1dc   :  { %v1693_v20 = vadd.s32 1, %v3793_v54  ;;  %v1547_v27 = vsub.s32 32, %v1546_v48  ;;  %v1551_v17 = vsub.s32 4294967266, %v1546_v48  ;;  %v1634_v29 = vmul.u32 %v5664_v52, %v1618_v9  ;;  %v6759_v52 = vld [vmem:[#allocation24_spill] sm:$0xff] }
 0x1dd   :  { %v1637_v32 = vadd.s32 1, %v5733_v10  ;;  %v1548_v46 = vshll.u32 %v5692_v26, %v1546_v48  ;;  %vm1636_vm2 = vc.u32 %v5739_v53, %v5732_v59  ;;  %v1691_v25 = vor.u32 8388608, %v1690_v30 }
 0x1de   :  { %vm1694_vm10 = vcmp.gt.s32.totalorder %v1693_v20, 0  ;;  %v1549_v13 = vshrl.u32 %v1531_v5, %v1547_v27  ;;  %v1552_v47 = vadd.s32 127, %v1551_v17  ;;  %v1369_v2 = vsel %vm1362_vm9, %v1365_v57, %v1368_v39 }
 0x1df   :  { %v1638_v7 = vsel %vm1636_vm2, %v1637_v32, %v5733_v10  ;;  %v1695_v12 = vsel %vm1694_vm10, %v1693_v20, 0  ;;  %v1790_v9 = vand.u32 2139095040, %v6759_v52  ;;  %v5768_v54 = vpop.eup %4008  ;;  %v5773_v26 = vsel %vm6629_vm6, nan, %v5668_v63 }
 0x1e0   :  { %v1639_v33 = vadd.s32 %v1638_v7, %v1634_v29  ;;  %v1697_v36 = vand.u32 31, %v1695_v12  ;;  %6760 = vst [vmem:[#allocation24_spill] sm:$0xff] %v5768_v54  ;;  %v1550_v49 = vor.u32 %v1549_v13, %v1548_v46  ;;  %v1553_v30 = vshll.u32 %v1552_v47, 23 }
 0x1e1   :  { %vm1581_vm1 = vcmp.lt.s32.totalorder %v4554_v3, 0  ;;  %vm1470_vm8 = vcmp.eq.s32.totalorder %v5749_v16, 2  ;;  %v6613_v39 = vand.u32 2147483647, %v6759_v52  ;;  %v5780_v5 = vsel %vm6621_vm7, nan, %v1369_v2 }
 0x1e2   :  { %v1640_v10 = vadd.s32 536870912, %v1639_v33  ;;  %v1698_v41 = vsub.s32 32, %v1697_v36  ;;  %vm1467_vm9 = vcmp.eq.s32.totalorder %v5749_v16, 0  ;;  %v1554_v57 = vor.u32 4788187, %v1553_v30  ;;  %v5787_v20 = vpop.eup %4010 }
 0x1e3   :  { %v5783_v48 = vand.u32 3, %v1568_v8  ;;  %v5785_v63 = vshll.u32 %v1691_v25, 8  ;;  %v6620_v27 = vxor.u32 2147483648, %v5768_v54  ;;  %v6761_v17 = vand.u32 2147483647, %v4554_v3 }
 0x1e4   :  { %v1641_v32 = vshrl.u32 %v1640_v10, 30  ;;  %v5796_v46 = vshrl.u32 %v1695_v12, 5  ;;  %v1791_v13 = vshrl.u32 %v1790_v9, 23  ;;  %v1555_v47 = vand.u32 2147483647, %v1554_v57 }
 0x1e5   :  { %vm5792_vm5 = vcmp.le.f32.partialorder %v6761_v17, 0.7853982  ;;  %v1557_v7 = vcvt.s32.f32 %v1550_v49  ;;  %v1701_v8 = vshrl.u32 %v6685_v55, %v1698_v41  ;;  %v1704_v25 = vshrl.u32 %v6661_v42, %v1698_v41 }
 0x1e6   :  { %v1642_v2 = vshll.u32 %v1641_v32, 30  ;;  %v1665_v30 = vsub.s32 4, %v1641_v32  ;;  %v1700_v45 = vshll.u32 %v6656_v28, %v1697_v36  ;;  %v5803_v17 = vand.u32 8388607, %v6613_v39 }
 0x1e7   :  { %v1558_v10 = vmul.f32 %v1557_v7, %v1555_v47  ;;  %v1703_v12 = vshll.u32 %v6685_v55, %v1697_v36  ;;  %v1707_v9 = vshrl.u32 %v6686_v40, %v1698_v41  ;;  %v1472_v49 = vsel %vm1470_vm8, %v6620_v27, %v5787_v20 }
 0x1e8   :  { %v5813_v57 = vsub.s32 %v1639_v33, %v1642_v2  ;;  %v1706_v34 = vshll.u32 %v6661_v42, %v1697_v36  ;;  %v1710_v39 = vshrl.u32 %v6664_v15, %v1698_v41  ;;  %v1702_v11 = vor.u32 %v1701_v8, %v1700_v45 }
 0x1e9   :  { %v1559_v60 = vxor.u32 2147483648, %v1558_v10  ;;  %v1705_v18 = vor.u32 %v1704_v25, %v1703_v12  ;;  %v1709_v47 = vshll.u32 %v6686_v40, %v1697_v36  ;;  %v1666_v19 = vsel %vm1581_vm1, %v1665_v30, %v1641_v32 }
 0x1ea   :  { %v1645_v7 = vsub.s32 0, %v5813_v57  ;;  %v1712_v4 = vshll.u32 %v6664_v15, %v1697_v36  ;;  %v1713_v27 = vshrl.u32 %v6649_v43, %v1698_v41  ;;  %vm1466_vm2 = vcmp.lt.s32.totalorder %v5749_v16, 2 }
 0x1eb   :  { %v1560_v33 = vsel %vm1477_vm4, %v1559_v60, %v1558_v10  ;;  %v1699_v2 = vshrl.u32 %v6656_v28, %v1698_v41  ;;  %v1708_v45 = vor.u32 %v1707_v9, %v1706_v34  ;;  %v1711_v8 = vor.u32 %v1710_v39, %v1709_v47 }
 0x1ec   :  { %v6764_v25 = vxor.u32 2147483648, %v5787_v20  ;;  %v1563_v36 = vsel %vm5681_vm0, %v4551_v38, %v1560_v33  ;;  %v3790_v32 = vmin.u32 %v1645_v7, %v5813_v57  ;;  %v1714_v30 = vor.u32 %v1713_v27, %v1712_v4 }
 0x1ed   :  { %4012 = vcosq.f32 %v1563_v36  ;;  %v5838_v60 = vsel %vm5792_vm5, 0, %v1666_v19  ;;  %vm1715_vm4 = vcmp.lt.s32.totalorder %v5796_v46, 1  ;;  %vm1716_vm10 = vcmp.lt.s32.totalorder %v5796_v46, 2 }
 0x1ee   :  { %v1469_v12 = vsel %vm1467_vm9, %v5768_v54, %v6764_v25  ;;  %vm6624_vm8 = vweird.f32 %v4541_v22  ;;  %4014 = vsinq.f32 %v1563_v36  ;;  %v1647_v34 = vclz %v3790_v32 }
 0x1ef   :  { %vm1718_vm9 = vcmp.lt.s32.totalorder %v5796_v46, 4  ;;  %v1723_v37 = vsel %vm1715_vm4, %v1702_v11, %v1705_v18  ;;  %vm1717_vm0 = vcmp.lt.s32.totalorder %v5796_v46, 3  ;;  %v1727_v39 = vsel %vm1715_vm4, %v1705_v18, %v1708_v45 }
 0x1f0   :  { %v1720_v41 = vsel %vm1718_vm9, %v1708_v45, 2102212464  ;;  %v1724_v4 = vsel %vm1718_vm9, %v1711_v8, 920167782  ;;  %v3791_v27 = vadd.s32 4294967294, %v1647_v34  ;;  %v1719_v10 = vsel %vm1715_vm4, %v1699_v2, %v1702_v11 }
 0x1f1   :  { %v1725_v19 = vsel %vm1717_vm0, %v1708_v45, %v1724_v4  ;;  %v1728_v9 = vsel %vm1718_vm9, %v1714_v30, 1326507024  ;;  %v1721_v47 = vsel %vm1717_vm0, %v1705_v18, %v1720_v41  ;;  %v3797_v25 = vadd.s32 4294967169, %v1791_v13 }
 0x1f2   :  { %v1726_v7 = vsel %vm1716_vm10, %v1723_v37, %v1725_v19  ;;  %v1729_v33 = vsel %vm1717_vm0, %v1711_v8, %v1728_v9  ;;  %vm3792_vm7 = vcmp.lt.s32.totalorder %v3791_v27, 0  ;;  %v1635_v34 = vadd.s32 %v5732_v59, %v5739_v53 }
 0x1f3   :  { %v1730_v36 = vsel %vm1716_vm10, %v1727_v39, %v1729_v33  ;;  %v5850_v32 = vmul.u32.u64.low %v5785_v63, %v1726_v7  ;;  %v5851_v54 = vmul.u32.u64.high %v5785_v63, %v1726_v7, %v5850_v32  ;;  %v1650_v11 = vsel %vm3792_vm7, 0, %v3791_v27 }
 0x1f4   :  { %v5856_v2 = vmul.u32.u64.low %v5785_v63, %v1730_v36  ;;  %v5857_v18 = vmul.u32.u64.high %v5785_v63, %v1730_v36, %v5856_v2  ;;  %v1473_v45 = vsel %vm1466_vm2, %v1469_v12, %v1472_v49  ;;  %v1651_v13 = vsub.s32 32, %v1650_v11  ;;  %v6765_v36 = vld [vmem:[#allocation39_spill] sm:$0xff] }
 0x1f5   :  { %v1655_v8 = vsub.s32 4294967266, %v1650_v11  ;;  %v1722_v30 = vsel %vm1716_vm10, %v1719_v10, %v1721_v47  ;;  %vm1571_vm4 = vcmp.eq.s32.totalorder %v5783_v48, 0  ;;  %vm1574_vm9 = vcmp.eq.s32.totalorder %v5783_v48, 2 }
 0x1f6   :  { %v1652_v37 = vshll.u32 %v5813_v57, %v1650_v11  ;;  %v1672_v59 = vadd.s32 3, %v5838_v60  ;;  %v1797_v53 = vadd.s32 1, %v3797_v25  ;;  %v1653_v41 = vshrl.u32 %v1635_v34, %v1651_v13 }
 0x1f7   :  { %v1656_v4 = vadd.s32 127, %v1655_v8  ;;  %v1741_v39 = vadd.s32 1, %v5851_v54  ;;  %v1795_v16 = vor.u32 8388608, %v5803_v17  ;;  %v5871_v49 = vsel %vm6624_vm8, nan, %v1473_v45 }
 0x1f8   :  { %vm1570_vm7 = vcmp.lt.s32.totalorder %v5783_v48, 2  ;;  %v1738_v46 = vmul.u32 %v5785_v63, %v1722_v30  ;;  %vm1740_vm2 = vc.u32 %v5857_v18, %v5850_v32  ;;  %vm1798_vm10 = vcmp.gt.s32.totalorder %v1797_v53, 0 }
 0x1f9   :  { %v1654_v57 = vor.u32 %v1653_v41, %v1652_v37  ;;  %v1657_v12 = vshll.u32 %v1656_v4, 23  ;;  %vm1685_vm0 = vcmp.lt.s32.totalorder %v6752_v1, 0  ;;  %v1742_v27 = vsel %vm1740_vm2, %v1741_v39, %v5851_v54 }
 0x1fa   :  { %v1799_v10 = vsel %vm1798_vm10, %v1797_v53, 0  ;;  %v5878_v19 = vand.u32 3, %v1672_v59  ;;  %v1743_v17 = vadd.s32 %v1742_v27, %v1738_v46  ;;  %v5881_v7 = vpop.eup %4012  ;;  %v5884_v63 = vadd.s32 %v5850_v32, %v5857_v18 }
 0x1fb   :  { %v1801_v9 = vand.u32 31, %v1799_v10  ;;  %v1658_v33 = vor.u32 4788187, %v1657_v12  ;;  %v5886_v25 = vshll.u32 %v1795_v16, 8  ;;  %v5889_v11 = vpop.eup %4014  ;;  %v6625_v54 = vxor.u32 2147483648, %v5881_v7 }
 0x1fc   :  { %v1744_v2 = vadd.s32 536870912, %v1743_v17  ;;  %v5892_v45 = vshrl.u32 %v1799_v10, 5  ;;  %vm6627_vm2 = vweird.f32 %v4551_v38  ;;  %v6626_v8 = vxor.u32 2147483648, %v5889_v11 }
 0x1fd   :  { %v1802_v13 = vsub.s32 32, %v1801_v9  ;;  %v1659_v30 = vand.u32 2147483647, %v1658_v33  ;;  %v1661_v37 = vcvt.s32.f32 %v1654_v57  ;;  %v6766_v32 = vand.u32 2147483647, %v6752_v1 }
 0x1fe   :  { %v1576_v53 = vsel %vm1574_vm9, %v6625_v54, %v5889_v11  ;;  %v1745_v41 = vshrl.u32 %v1744_v2, 30  ;;  %vm1907_vm8 = vcmask 1040384   ;;  %v1573_v16 = vsel %vm1571_vm4, %v5881_v7, %v6626_v8 }
 0x1ff   :  { %vm5898_vm10 = vcmp.le.f32.partialorder %v6766_v32, 0.7853982  ;;  %v1805_v4 = vshrl.u32 %v6685_v55, %v1802_v13  ;;  %v1662_v46 = vmul.f32 %v1661_v37, %v1659_v30  ;;  %v1804_v57 = vshll.u32 %v6656_v28, %v1801_v9 }
 0x200   :  { %v1746_v27 = vshll.u32 %v1745_v41, 30  ;;  %v1769_v10 = vsub.s32 4, %v1745_v41  ;;  %v1808_v33 = vshrl.u32 %v6661_v42, %v1802_v13  ;;  %v1811_v2 = vshrl.u32 %v6686_v40, %v1802_v13 }
 0x201   :  { %v1577_v32 = vsel %vm1570_vm7, %v1573_v16, %v1576_v53  ;;  %v1663_v54 = vxor.u32 2147483648, %v1662_v46  ;;  %v1807_v39 = vshll.u32 %v6685_v55, %v1801_v9  ;;  %v1810_v59 = vshll.u32 %v6661_v42, %v1801_v9 }
 0x202   :  { %v5923_v8 = vsub.s32 %v1743_v17, %v1746_v27  ;;  %v1770_v30 = vsel %vm1685_vm0, %v1769_v10, %v1745_v41  ;;  %v1806_v37 = vor.u32 %v1805_v4, %v1804_v57  ;;  %v1814_v12 = vshrl.u32 %v6664_v15, %v1802_v13 }
 0x203   :  { %v1664_v34 = vsel %vm1581_vm1, %v1663_v54, %v1662_v46  ;;  %v1813_v47 = vshll.u32 %v6686_v40, %v1801_v9  ;;  %v1816_v48 = vshll.u32 %v6664_v15, %v1801_v9  ;;  %v1817_v53 = vshrl.u32 %v6649_v43, %v1802_v13 }
 0x204   :  { %v1667_v42 = vsel %vm5792_vm5, %v4554_v3, %v1664_v34  ;;  %v1749_v55 = vsub.s32 0, %v5923_v8  ;;  %v1809_v17 = vor.u32 %v1808_v33, %v1807_v39  ;;  %v1812_v41 = vor.u32 %v1811_v2, %v1810_v59  ;;  %v6770_v39 = vld [vmem:[#allocation2_spill] sm:$0xff] }
 0x205   :  { %4016 = vcosq.f32 %v1667_v42  ;;  %v1803_v4 = vshrl.u32 %v6656_v28, %v1802_v13  ;;  %v1815_v16 = vor.u32 %v1814_v12, %v1813_v47  ;;  %v1818_v57 = vor.u32 %v1817_v53, %v1816_v48 }
 0x206   :  { %v5940_v40 = vsel %vm6627_vm2, nan, %v1577_v32  ;;  %4018 = vsinq.f32 %v1667_v42  ;;  %v3794_v15 = vmin.u32 %v1749_v55, %v5923_v8  ;;  %v5945_v43 = vsel %vm5898_vm10, 0, %v1770_v30 }
 0x207   :  { %vm1819_vm1 = vcmp.lt.s32.totalorder %v5892_v45, 1  ;;  %vm1820_vm5 = vcmp.lt.s32.totalorder %v5892_v45, 2  ;;  %vm1821_vm4 = vcmp.lt.s32.totalorder %v5892_v45, 3  ;;  %vm1822_vm9 = vcmp.lt.s32.totalorder %v5892_v45, 4 }
 0x208   :  { %v1751_v28 = vclz %v3794_v15  ;;  %v1823_v29 = vsel %vm1819_vm1, %v1803_v4, %v1806_v37  ;;  %v1827_v9 = vsel %vm1819_vm1, %v1806_v37, %v1809_v17  ;;  %v1831_v47 = vsel %vm1819_vm1, %v1809_v17, %v1812_v41 }
 0x209   :  { %v1824_v34 = vsel %vm1822_vm9, %v1812_v41, 2102212464  ;;  %v1828_v54 = vsel %vm1822_vm9, %v1815_v16, 920167782  ;;  %v1832_v13 = vsel %vm1822_vm9, %v1818_v57, 1326507024  ;;  %vm6628_vm9 = vweird.f32 %v4554_v3 }
 0x20a   :  { %v6769_v59 = vrot.slane %v4910_v14, 7  ;;  %v3795_v12 = vadd.s32 4294967294, %v1751_v28  ;;  %v1825_v27 = vsel %vm1821_vm4, %v1809_v17, %v1824_v34  ;;  %v1829_v10 = vsel %vm1821_vm4, %v1812_v41, %v1828_v54 }
 0x20b   :  { %v1833_v33 = vsel %vm1821_vm4, %v1815_v16, %v1832_v13  ;;  %v5959_v2 = vadd.s32 3, %v5945_v43  ;;  %v1826_v32 = vsel %vm1820_vm5, %v1823_v29, %v1825_v27  ;;  %v1830_v30 = vsel %vm1820_vm5, %v1827_v9, %v1829_v10 }
 0x20c   :  { %v1956_v46 = vsel %vm1907_vm8, %v6770_v39, %v6769_v59  ;;  %v1834_v37 = vsel %vm1820_vm5, %v1831_v47, %v1833_v33  ;;  %vm1678_vm7 = vcmp.eq.s32.totalorder %v5878_v19, 2  ;;  %vm3796_vm1 = vcmp.lt.s32.totalorder %v3795_v12, 0 }
 0x20d   :  { %1964 = vst [vmem:[%s6483_s2] sm:$0xff] %v1956_v46  ;;  %v5969_v48 = vmul.u32.u64.low %v5886_v25, %v1834_v37  ;;  %v5970_v53 = vmul.u32.u64.high %v5886_v25, %v1834_v37, %v5969_v48  ;;  %v1913_v42 = vrot.slane %v5293_v24, 7  ;;  %vm1675_vm4 = vcmp.eq.s32.totalorder %v5878_v19, 0 }
 0x20e   :  { %v1754_v55 = vsel %vm3796_vm1, 0, %v3795_v12  ;;  %v5975_v17 = vmul.u32.u64.low %v5886_v25, %v1830_v30  ;;  %v5976_v41 = vmul.u32.u64.high %v5886_v25, %v1830_v30, %v5975_v17  ;;  %v1842_v45 = vmul.u32 %v5886_v25, %v1826_v32  ;;  %v6776_v30 = vld [vmem:[#allocation4_spill] sm:$0xff] }
 0x20f   :  { %vm1674_vm5 = vcmp.lt.s32.totalorder %v5878_v19, 2  ;;  %v1755_v4 = vsub.s32 32, %v1754_v55  ;;  %v1756_v16 = vshll.u32 %v5923_v8, %v1754_v55  ;;  %v1759_v57 = vsub.s32 4294967266, %v1754_v55  ;;  %v6778_v55 = vld [vmem:[#allocation6_spill] sm:$0xff] }
 0x210   :  { %v1914_v15 = vrot.slane %v5406_v6, 7  ;;  %v1916_v28 = vrot.slane %v5656_v0, 7  ;;  %v1918_v29 = vrot.slane %v5773_v26, 7  ;;  %v1920_v9 = vrot.slane %v5780_v5, 7 }
 0x211   :  { %v1922_v47 = vrot.slane %v5871_v49, 7  ;;  %v1757_v25 = vshrl.u32 %v5884_v63, %v1755_v4  ;;  %v1760_v34 = vadd.s32 127, %v1759_v57  ;;  %vm1844_vm1 = vc.u32 %v5970_v53, %v5975_v17 }
 0x212   :  { %v1915_v8 = vrot.slane %v5545_v62, 7  ;;  %v1845_v54 = vadd.s32 1, %v5976_v41  ;;  %v6771_v13 = vmov %v6769_v59  ;;  %v6772_v26 = vrot.slane %v6765_v36, 7  ;;  %1980 = vst [vmem:[%s6483_s2 + $0x80] sm:$0x1] %v1916_v28  ;;  %v6014_v14 = vpop.eup %4016  ;;  %v6850_v36 = vld [vmem:[#allocation32_spill] sm:$0xff] }
 0x213   :  { %v1917_v0 = vsel %vm1907_vm8, %v6771_v13, %v1916_v28  ;;  %v6773_v49 = vrot.slane %v5182_v44, 7  ;;  %1981 = vst [vmem:[%s6483_s2 + $0x88] sm:$0x1] %v1918_v29  ;;  %1982 = vst [vmem:[%s6483_s2 + $0x90] sm:$0x1] %v1920_v9  ;;  %v1758_v59 = vor.u32 %v1757_v25, %v1756_v16  ;;  %v1761_v39 = vshll.u32 %v1760_v34, 23  ;;  %v6029_v10 = vpop.eup %4018 }
 0x214   :  { %v1919_v5 = vsel %vm1907_vm8, %v6772_v26, %v1918_v29  ;;  %1983 = vst [vmem:[%s6483_s2 + $0x98] sm:$0x1] %v1922_v47  ;;  %v6774_v46 = vrot.slane %v5186_v50, 7  ;;  %v1924_v27 = vrot.slane %v5940_v40, 7  ;;  %1972 = vst [vmem:[%s6483_s2 + $0x40] sm:$0xff] %v1917_v0  ;;  %v1679_v33 = vxor.u32 2147483648, %v6014_v14 }
 0x215   :  { %v1921_v63 = vsel %vm1907_vm8, %v6773_v49, %v1920_v9  ;;  %1973 = vst [vmem:[%s6483_s2 + $0x48] sm:$0xff] %v1919_v5  ;;  %vm1789_vm2 = vcmp.lt.s32.totalorder %v6759_v52, 0  ;;  %v1846_v40 = vsel %vm1844_vm1, %v1845_v54, %v5976_v41  ;;  %v6775_v32 = vmov %v6772_v26  ;;  %v6784_v25 = vld [vmem:[#allocation11_spill] sm:$0xff]  ;;  %v6786_v13 = vld [vmem:[#allocation13_spill] sm:$0xff] }
 0x216   :  { %v1923_v12 = vsel %vm1907_vm8, %v6774_v46, %v1922_v47  ;;  %1974 = vst [vmem:[%s6483_s2 + $0x50] sm:$0xff] %v1921_v63  ;;  %v1957_v37 = vsel %vm1907_vm8, %v6776_v30, %v6775_v32  ;;  %v6777_v48 = vmov %v6773_v49  ;;  %v1676_v16 = vxor.u32 2147483648, %v6029_v10  ;;  %1984 = vst [vmem:[%s6483_s2 + $0xa0] sm:$0x1] %v1924_v27  ;;  %v6787_v63 = vld [vmem:[#allocation14_spill] sm:$0xff] }
 0x217   :  { %v1958_v4 = vsel %vm1907_vm8, %v6778_v55, %v6777_v48  ;;  %1975 = vst [vmem:[%s6483_s2 + $0x58] sm:$0xff] %v1923_v12  ;;  %v1762_v57 = vor.u32 4788187, %v1761_v39  ;;  %v1765_v28 = vcvt.s32.f32 %v1758_v59  ;;  %v6779_v41 = vand.u32 2147483647, %v6759_v52  ;;  %1965 = vst [vmem:[%s6483_s2 + $0x8] sm:$0xff] %v1957_v37 }
 0x218   :  { %v1847_v29 = vadd.s32 %v1846_v40, %v1842_v45  ;;  %1966 = vst [vmem:[%s6483_s2 + $0x10] sm:$0xff] %v1958_v4  ;;  %v1680_v44 = vsel %vm1678_vm7, %v1679_v33, %v6029_v10  ;;  %v6782_v45 = vrot.slane %v5197_v21, 7  ;;  %v6783_v47 = vmov %v6774_v46  ;;  %v6788_v59 = vld [vmem:[#allocation15_spill] sm:$0xff]  ;;  %v6789_v46 = vld [vmem:[#allocation17_spill] sm:$0xff]  ;;  %v6791_v37 = vld [vmem:[#allocation34_spill] sm:$0xff] }
 0x219   :  { %vm6051_vm1 = vcmp.le.f32.partialorder %v6779_v41, 0.7853982  ;;  %v1959_v34 = vsel %vm1907_vm8, %v6784_v25, %v6783_v47  ;;  %v1677_v26 = vsel %vm1675_vm4, %v6014_v14, %v1676_v16  ;;  %v1763_v5 = vand.u32 2147483647, %v1762_v57 }
 0x21a   :  { %v1925_v9 = vsel %vm1907_vm8, %v6782_v45, %v1924_v27  ;;  %v6785_v54 = vmov %v6782_v45  ;;  %v1848_v49 = vadd.s32 536870912, %v1847_v29  ;;  %v1961_v50 = vsel %vm1907_vm8, %v6787_v63, %v1913_v42  ;;  %1967 = vst [vmem:[%s6483_s2 + $0x18] sm:$0xff] %v1959_v34  ;;  %v6790_v27 = vld [vmem:[#allocation33_spill] sm:$0xff]  ;;  %v6794_v45 = vld [vmem:[#allocation23_spill] sm:$0xff] }
 0x21b   :  { %v1960_v0 = vsel %vm1907_vm8, %v6786_v13, %v6785_v54  ;;  %1976 = vst [vmem:[%s6483_s2 + $0x60] sm:$0xff] %v1925_v9  ;;  %v1681_v21 = vsel %vm1674_vm5, %v1677_v26, %v1680_v44  ;;  %v1962_v39 = vsel %vm1907_vm8, %v6788_v59, %v1914_v15  ;;  %v1963_v12 = vsel %vm1907_vm8, %v6789_v46, %v1915_v8  ;;  %v6792_v44 = vld [vmem:[#allocation10_spill] sm:$0xff] }
 0x21c   :  { %1968 = vst [vmem:[%s6483_s2 + $0x20] sm:$0xff] %v1960_v0  ;;  %1969 = vst [vmem:[%s6483_s2 + $0x28] sm:$0xff] %v1961_v50  ;;  %v2081_v40 = vand.u32 3, %v6790_v27  ;;  %v1682_v19 = vsel %vm6628_vm9, nan, %v1681_v21  ;;  %v1766_v32 = vmul.f32 %v1765_v28, %v1763_v5  ;;  %v1849_v30 = vshrl.u32 %v1848_v49, 30  ;;  %v6797_v49 = vld [vmem:[#allocation36_spill] sm:$0xff] }
 0x21d   :  { %1970 = vst [vmem:[%s6483_s2 + $0x30] sm:$0xff] %v1962_v39  ;;  %1971 = vst [vmem:[%s6483_s2 + $0x38] sm:$0xff] %v1963_v12  ;;  %v2184_v48 = vand.u32 3, %v6791_v37  ;;  %v1926_v55 = vrot.slane %v1682_v19, 7  ;;  %v6793_v28 = vxor.u32 2147483648, %v6792_v44  ;;  %v6795_v25 = vxor.u32 2147483648, %v6794_v45 }
 0x21e   :  { %vm2082_vm7 = vcmp.lt.s32.totalorder %v2081_v40, 2  ;;  %vm2083_vm4 = vcmp.eq.s32.totalorder %v2081_v40, 0  ;;  %vm2086_vm5 = vcmp.eq.s32.totalorder %v2081_v40, 2  ;;  %v1767_v4 = vxor.u32 2147483648, %v1766_v32  ;;  %v6799_v50 = vld [vmem:[#allocation35_spill] sm:$0xff]  ;;  %v6801_v12 = vld [vmem:[#allocation22_spill] sm:$0xff] }
 0x21f   :  { %v1850_v57 = vshll.u32 %v1849_v30, 30  ;;  %v1873_v41 = vsub.s32 4, %v1849_v30  ;;  %v2085_v9 = vsel %vm2083_vm4, %v6794_v45, %v6793_v28  ;;  %v1927_v47 = vsel %vm1907_vm8, %v1913_v42, %v1926_v55  ;;  %1985 = vst [vmem:[%s6483_s2 + $0xa8] sm:$0x1] %v1926_v55  ;;  %v6802_v40 = vld [vmem:[#allocation38_spill] sm:$0xff] }
 0x220   :  { %v2088_v34 = vsel %vm2086_vm5, %v6795_v25, %v6792_v44  ;;  %vm2185_vm9 = vcmp.lt.s32.totalorder %v2184_v48, 2  ;;  %vm2186_vm6 = vcmp.eq.s32.totalorder %v2184_v48, 0  ;;  %v1768_v54 = vsel %vm1685_vm0, %v1767_v4, %v1766_v32  ;;  %1977 = vst [vmem:[%s6483_s2 + $0x68] sm:$0xff] %v1927_v47  ;;  %v6804_v44 = vld [vmem:[#allocation40_spill] sm:$0xff] }
 0x221   :  { %v6135_v13 = vsub.s32 %v1847_v29, %v1850_v57  ;;  %v1874_v24 = vsel %vm1789_vm2, %v1873_v41, %v1849_v30  ;;  %v2089_v42 = vsel %vm2082_vm7, %v2085_v9, %v2088_v34  ;;  %v1771_v0 = vsel %vm5898_vm10, %v6752_v1, %v1768_v54  ;;  %v6807_v47 = vld [vmem:[#allocation16_spill] sm:$0xff] }
 0x222   :  { %v6148_v26 = vsel %vm6051_vm1, 0, %v1874_v24  ;;  %v6152_v29 = vsel %vm319_vm12, nan, %v2089_v42  ;;  %v6798_v63 = vxor.u32 2147483648, %v6797_v49  ;;  %4020 = vcosq.f32 %v1771_v0 }
 0x223   :  { %v1853_v59 = vsub.s32 0, %v6135_v13  ;;  %v1880_v39 = vadd.s32 3, %v6148_v26  ;;  %vm2189_vm0 = vcmp.eq.s32.totalorder %v2184_v48, 2  ;;  %4022 = vsinq.f32 %v1771_v0 }
 0x224   :  { %v2188_v21 = vsel %vm2186_vm6, %v6799_v50, %v6798_v63  ;;  %v6800_v18 = vxor.u32 2147483648, %v6799_v50  ;;  %v2287_v27 = vand.u32 3, %v6801_v12  ;;  %v2390_v19 = vand.u32 3, %v6802_v40 }
 0x225   :  { %v6165_v32 = vand.u32 3, %v5959_v2  ;;  %v3798_v30 = vmin.u32 %v1853_v59, %v6135_v13  ;;  %v1843_v55 = vadd.s32 %v5975_v17, %v5970_v53  ;;  %v6171_v4 = vand.u32 3, %v1880_v39  ;;  %v6805_v2 = vld [vmem:[#allocation37_spill] sm:$0xff] }
 0x226   :  { %v2191_v46 = vsel %vm2189_vm0, %v6800_v18, %v6797_v49  ;;  %v2493_v28 = vand.u32 3, %v6804_v44  ;;  %vm2288_vm12 = vcmp.lt.s32.totalorder %v2287_v27, 2  ;;  %vm2289_vm6 = vcmp.eq.s32.totalorder %v2287_v27, 0 }
 0x227   :  { %v2192_v37 = vsel %vm2185_vm9, %v2188_v21, %v2191_v46  ;;  %v1855_v45 = vclz %v3798_v30  ;;  %vm2292_vm10 = vcmp.eq.s32.totalorder %v2287_v27, 2  ;;  %v6806_v9 = vxor.u32 2147483648, %v6805_v2  ;;  %v6826_v27 = vld [vmem:[#allocation48_spill] sm:$0xff] }
 0x228   :  { %v6175_v41 = vsel %vm423_vm13, nan, %v2192_v37  ;;  %v6808_v25 = vxor.u32 2147483648, %v6807_v47  ;;  %vm2391_vm9 = vcmp.lt.s32.totalorder %v2390_v19, 2  ;;  %vm2392_vm7 = vcmp.eq.s32.totalorder %v2390_v19, 0 }
 0x229   :  { %v2291_v48 = vsel %vm2289_vm6, %v6807_v47, %v6806_v9  ;;  %v3799_v17 = vadd.s32 4294967294, %v1855_v45  ;;  %v6809_v54 = vxor.u32 2147483648, %v4972_v23  ;;  %vm2395_vm13 = vcmp.eq.s32.totalorder %v2390_v19, 2  ;;  %v6820_v47 = vld [vmem:[#allocation49_spill] sm:$0xff] }
 0x22a   :  { %v2294_v53 = vsel %vm2292_vm10, %v6808_v25, %v6805_v2  ;;  %vm1782_vm4 = vcmp.eq.s32.totalorder %v6165_v32, 2  ;;  %v6810_v0 = vxor.u32 2147483648, %v4969_v58  ;;  %vm2494_vm5 = vcmp.lt.s32.totalorder %v2493_v28, 2  ;;  %v6819_v2 = vld [vmem:[#allocation46_spill] sm:$0xff] }
 0x22b   :  { %v2295_v34 = vsel %vm2288_vm12, %v2291_v48, %v2294_v53  ;;  %v2394_v24 = vsel %vm2392_vm7, %v4969_v58, %v6809_v54  ;;  %vm2495_vm0 = vcmp.eq.s32.totalorder %v2493_v28, 0  ;;  %vm1779_vm6 = vcmp.eq.s32.totalorder %v6165_v32, 0 }
 0x22c   :  { %v6190_v42 = vsel %vm527_vm11, nan, %v2295_v34  ;;  %v2397_v5 = vsel %vm2395_vm13, %v6810_v0, %v4972_v23  ;;  %vm3800_vm12 = vcmp.lt.s32.totalorder %v3799_v17, 0  ;;  %v6811_v63 = vxor.u32 2147483648, %v5089_v51 }
 0x22d   :  { %v2398_v49 = vsel %vm2391_vm9, %v2394_v24, %v2397_v5  ;;  %vm2498_vm10 = vcmp.eq.s32.totalorder %v2493_v28, 2  ;;  %vm1778_vm7 = vcmp.lt.s32.totalorder %v6165_v32, 2  ;;  %v1858_v56 = vsel %vm3800_vm12, 0, %v3799_v17  ;;  %v6818_v28 = vld [vmem:[#allocation42_spill] sm:$0xff] }
 0x22e   :  { %v2497_v50 = vsel %vm2495_vm0, %v5031_v61, %v6811_v63  ;;  %v6202_v21 = vsel %vm631_vm14, nan, %v2398_v49  ;;  %v6812_v58 = vxor.u32 2147483648, %v5031_v61  ;;  %v2596_v59 = vand.u32 3, %v5062_v35  ;;  %v6816_v35 = vld [vmem:[#allocation41_spill] sm:$0xff] }
 0x22f   :  { %vm1775_vm11 = vweird.f32 %v6752_v1  ;;  %v1859_v39 = vsub.s32 32, %v1858_v56  ;;  %v1860_v18 = vshll.u32 %v6135_v13, %v1858_v56  ;;  %v1863_v46 = vsub.s32 4294967266, %v1858_v56  ;;  %v6221_v57 = vpop.eup %4020  ;;  %v6822_v63 = vld [vmem:[#allocation45_spill] sm:$0xff]  ;;  %v6824_v56 = vld [vmem:[#allocation44_spill] sm:$0xff] }
 0x230   :  { %v2500_v23 = vsel %vm2498_vm10, %v6812_v58, %v5089_v51  ;;  %vm2597_vm14 = vcmp.lt.s32.totalorder %v2596_v59, 2  ;;  %vm2598_vm9 = vcmp.eq.s32.totalorder %v2596_v59, 0  ;;  %vm2601_vm13 = vcmp.eq.s32.totalorder %v2596_v59, 2  ;;  %v6814_v51 = vld [vmem:[#allocation43_spill] sm:$0xff]  ;;  %v6226_v25 = vpop.eup %4022 }
 0x231   :  { %v2501_v12 = vsel %vm2494_vm5, %v2497_v50, %v2500_v23  ;;  %v1861_v31 = vshrl.u32 %v1843_v55, %v1859_v39  ;;  %v1864_v61 = vadd.s32 127, %v1863_v46  ;;  %v6815_v19 = vxor.u32 2147483648, %v6814_v51 }
 0x232   :  { %v6213_v40 = vsel %vm735_vm15, nan, %v2501_v12  ;;  %v6817_v37 = vxor.u32 2147483648, %v6816_v35  ;;  %v2699_v45 = vand.u32 3, %v6818_v28  ;;  %v2802_v9 = vand.u32 3, %v6819_v2 }
 0x233   :  { %v2600_v30 = vsel %vm2598_vm9, %v6816_v35, %v6815_v19  ;;  %v2905_v48 = vand.u32 3, %v6820_v47  ;;  %v1783_v55 = vxor.u32 2147483648, %v6221_v57  ;;  %v1862_v53 = vor.u32 %v1861_v31, %v1860_v18  ;;  %v6829_v35 = vld [vmem:[#allocation27_spill] sm:$0xff] }
 0x234   :  { %v2603_v13 = vsel %vm2601_vm13, %v6817_v37, %v6814_v51  ;;  %v1865_v17 = vshll.u32 %v1864_v61, 23  ;;  %v1780_v24 = vxor.u32 2147483648, %v6226_v25  ;;  %vm2700_vm15 = vcmp.lt.s32.totalorder %v2699_v45, 2  ;;  %v6828_v61 = vld [vmem:[#allocation47_spill] sm:$0xff] }
 0x235   :  { %v2604_v44 = vsel %vm2597_vm14, %v2600_v30, %v2603_v13  ;;  %vm2701_vm5 = vcmp.eq.s32.totalorder %v2699_v45, 0  ;;  %vm2704_vm0 = vcmp.eq.s32.totalorder %v2699_v45, 2  ;;  %v1784_v0 = vsel %vm1782_vm4, %v1783_v55, %v6226_v25  ;;  %v6832_v45 = vld [vmem:[#allocation52_spill] sm:$0xff]  ;;  %v6834_v47 = vld [vmem:[#allocation51_spill] sm:$0xff] }
 0x236   :  { %v6231_v54 = vsel %vm839_vm3, nan, %v2604_v44  ;;  %v1866_v5 = vor.u32 4788187, %v1865_v17  ;;  %v1869_v49 = vcvt.s32.f32 %v1862_v53  ;;  %v6823_v50 = vxor.u32 2147483648, %v6822_v63  ;;  %v6835_v17 = vld [vmem:[#allocation50_spill] sm:$0xff] }
 0x237   :  { %v1781_v23 = vsel %vm1779_vm6, %v6221_v57, %v1780_v24  ;;  %v6825_v59 = vxor.u32 2147483648, %v6824_v56  ;;  %vm2803_vm3 = vcmp.lt.s32.totalorder %v2802_v9, 2  ;;  %vm2804_vm12 = vcmp.eq.s32.totalorder %v2802_v9, 0 }
 0x238   :  { %v2703_v58 = vsel %vm2701_vm5, %v6824_v56, %v6823_v50  ;;  %v1785_v18 = vsel %vm1778_vm7, %v1781_v23, %v1784_v0  ;;  %v1867_v46 = vand.u32 2147483647, %v1866_v5  ;;  %v6827_v31 = vxor.u32 2147483648, %v6826_v27  ;;  %v6836_v5 = vld [vmem:[#allocation28_spill] sm:$0xff] }
 0x239   :  { %v2706_v39 = vsel %vm2704_vm0, %v6825_v59, %v6822_v63  ;;  %v1786_v19 = vsel %vm1775_vm11, nan, %v1785_v18  ;;  %vm6830_vm4 = vweird.f32 %v6829_v35  ;;  %vm2807_vm6 = vcmp.eq.s32.totalorder %v2802_v9, 2  ;;  %v6843_v59 = vld [vmem:[#allocation54_spill] sm:$0xff] }
 0x23a   :  { %v2707_v12 = vsel %vm2700_vm15, %v2703_v58, %v2706_v39  ;;  %v2806_v51 = vsel %vm2804_vm12, %v6828_v61, %v6827_v31  ;;  %vm2906_vm10 = vcmp.lt.s32.totalorder %v2905_v48, 2  ;;  %v1870_v37 = vmul.f32 %v1869_v49, %v1867_v46  ;;  %v6841_v58 = vld [vmem:[#allocation55_spill] sm:$0xff]  ;;  %v6845_v31 = vld [vmem:[#allocation53_spill] sm:$0xff]  ;;  %v6847_v35 = vld [vmem:[#allocation30_spill] sm:$0xff] }
 0x23b   :  { %v6259_v30 = vsel %vm6830_vm4, nan, %v2707_v12  ;;  %v1928_v13 = vrot.slane %v1786_v19, 7  ;;  %v6831_v32 = vxor.u32 2147483648, %v6828_v61  ;;  %vm2907_vm7 = vcmp.eq.s32.totalorder %v2905_v48, 0 }
 0x23c   :  { %v6833_v2 = vxor.u32 2147483648, %v6832_v45  ;;  %vm2910_vm14 = vcmp.eq.s32.totalorder %v2905_v48, 2  ;;  %v3008_v34 = vand.u32 3, %v6835_v17  ;;  %v1871_v0 = vxor.u32 2147483648, %v1870_v37 }
 0x23d   :  { %v2809_v44 = vsel %vm2807_vm6, %v6831_v32, %v6826_v27  ;;  %v1929_v9 = vsel %vm1907_vm8, %v1914_v15, %v1928_v13  ;;  %1986 = vst [vmem:[%s6483_s2 + $0xb0] sm:$0x1] %v1928_v13  ;;  %vm6837_vm9 = vweird.f32 %v6836_v5  ;;  %v6838_v63 = vxor.u32 2147483648, %v6834_v47  ;;  %v6839_v15 = vld [vmem:[#allocation29_spill] sm:$0xff]  ;;  %v6849_v13 = vld [vmem:[#allocation58_spill] sm:$0xff] }
 0x23e   :  { %v2810_v28 = vsel %vm2803_vm3, %v2806_v51, %v2809_v44  ;;  %v2909_v53 = vsel %vm2907_vm7, %v6834_v47, %v6833_v2  ;;  %1978 = vst [vmem:[%s6483_s2 + $0x70] sm:$0xff] %v1929_v9  ;;  %vm3009_vm13 = vcmp.lt.s32.totalorder %v3008_v34, 2  ;;  %vm3010_vm15 = vcmp.eq.s32.totalorder %v3008_v34, 0  ;;  %v6846_v51 = vld [vmem:[#allocation56_spill] sm:$0xff] }
 0x23f   :  { %v6276_v49 = vsel %vm6837_vm9, nan, %v2810_v28  ;;  %v2912_v50 = vsel %vm2910_vm14, %v6838_v63, %v6832_v45  ;;  %vm3013_vm5 = vcmp.eq.s32.totalorder %v3008_v34, 2  ;;  %v1872_v6 = vsel %vm1789_vm2, %v1871_v0, %v1870_v37  ;;  %v6852_v45 = vld [vmem:[#allocation57_spill] sm:$0xff]  ;;  %v6855_v0 = vld [vmem:[#allocation24_spill] sm:$0xff] }
 0x240   :  { %v2913_v48 = vsel %vm2906_vm10, %v2909_v53, %v2912_v50  ;;  %vm6840_vm0 = vweird.f32 %v6839_v15  ;;  %v6842_v23 = vxor.u32 2147483648, %v6841_v58  ;;  %v6844_v18 = vxor.u32 2147483648, %v6843_v59 }
 0x241   :  { %v6288_v56 = vsel %vm6840_vm0, nan, %v2913_v48  ;;  %v1875_v12 = vsel %vm6051_vm1, %v6759_v52, %v1872_v6  ;;  %v3111_v61 = vand.u32 3, %v6845_v31  ;;  %v3214_v19 = vand.u32 3, %v6846_v51 }
 0x242   :  { %v3012_v39 = vsel %vm3010_vm15, %v6843_v59, %v6842_v23  ;;  %v3015_v46 = vsel %vm3013_vm5, %v6844_v18, %v6841_v58  ;;  %4024 = vcosq.f32 %v1875_v12  ;;  %vm6848_vm2 = vweird.f32 %v6847_v35 }
 0x243   :  { %v3016_v27 = vsel %vm3009_vm13, %v3012_v39, %v3015_v46  ;;  %v3317_v32 = vand.u32 3, %v6849_v13  ;;  %v3420_v44 = vand.u32 3, %v5838_v60  ;;  %4026 = vsinq.f32 %v1875_v12  ;;  %v6856_v60 = vld [vmem:[#allocation31_spill] sm:$0xff] }
 0x244   :  { %v6303_v37 = vsel %vm6848_vm2, nan, %v3016_v27  ;;  %vm3112_vm3 = vcmp.lt.s32.totalorder %v3111_v61, 2  ;;  %vm3113_vm12 = vcmp.eq.s32.totalorder %v3111_v61, 0  ;;  %vm3116_vm4 = vcmp.eq.s32.totalorder %v3111_v61, 2 }
 0x245   :  { %v6851_v28 = vxor.u32 2147483648, %v6850_v36  ;;  %v6853_v47 = vxor.u32 2147483648, %v6852_v45  ;;  %vm3215_vm1 = vcmp.lt.s32.totalorder %v3214_v19, 2  ;;  %vm3216_vm6 = vcmp.eq.s32.totalorder %v3214_v19, 0 }
 0x246   :  { %v6854_v34 = vxor.u32 2147483648, %v5787_v20  ;;  %vm3219_vm10 = vcmp.eq.s32.totalorder %v3214_v19, 2  ;;  %vm3318_vm7 = vcmp.lt.s32.totalorder %v3317_v32, 2  ;;  %vm6857_vm14 = vweird.f32 %v6856_v60 }
 0x247   :  { %v3115_v2 = vsel %vm3113_vm12, %v6852_v45, %v6851_v28  ;;  %v3118_v53 = vsel %vm3116_vm4, %v6853_v47, %v6850_v36  ;;  %v6858_v63 = vxor.u32 2147483648, %v6855_v0  ;;  %vm3319_vm9 = vcmp.eq.s32.totalorder %v3317_v32, 0 }
 0x248   :  { %v3119_v17 = vsel %vm3112_vm3, %v3115_v2, %v3118_v53  ;;  %v3218_v9 = vsel %vm3216_vm6, %v6855_v0, %v6854_v34  ;;  %vm3322_vm13 = vcmp.eq.s32.totalorder %v3317_v32, 2  ;;  %v6859_v6 = vxor.u32 2147483648, %v5889_v11  ;;  %v6864_v2 = vld [vmem:[#allocation3_spill] sm:$0xff]  ;;  %v6865_v53 = vld [vmem:[#allocation5_spill] sm:$0xff] }
 0x249   :  { %v3120_v5 = vsel %vm6857_vm14, nan, %v3119_v17  ;;  %v3221_v50 = vsel %vm3219_vm10, %v6858_v63, %v5787_v20  ;;  %v6860_v58 = vxor.u32 2147483648, %v5881_v7  ;;  %vm3421_vm15 = vcmp.lt.s32.totalorder %v3420_v44, 2  ;;  %v6867_v63 = vld [vmem:[#allocation12_spill] sm:$0xff] }
 0x24a   :  { %v3222_v48 = vsel %vm3215_vm1, %v3218_v9, %v3221_v50  ;;  %v3321_v15 = vsel %vm3319_vm9, %v5881_v7, %v6859_v6  ;;  %vm6861_vm5 = vweird.f32 %v4541_v22  ;;  %vm3422_vm0 = vcmp.eq.s32.totalorder %v3420_v44, 0  ;;  %v6866_v9 = vld [vmem:[#allocation7_spill] sm:$0xff] }
 0x24b   :  { %v3324_v23 = vsel %vm3322_vm13, %v6860_v58, %v5889_v11  ;;  %v3223_v59 = vsel %vm6861_vm5, nan, %v3222_v48  ;;  %vm3425_vm2 = vcmp.eq.s32.totalorder %v3420_v44, 2  ;;  %vm1886_vm3 = vcmp.eq.s32.totalorder %v6171_v4, 2  ;;  %v6868_v48 = vld [vmem:[#allocation18_spill] sm:$0xff] }
 0x24c   :  { %v3325_v39 = vsel %vm3318_vm7, %v3321_v15, %v3324_v23  ;;  %vm6862_vm12 = vweird.f32 %v4551_v38  ;;  %v3424_v18 = vsel %vm3422_vm0, %v6014_v14, %v1676_v16  ;;  %v3427_v7 = vsel %vm3425_vm2, %v1679_v33, %v6029_v10  ;;  %v6869_v15 = vld [vmem:[#allocation19_spill] sm:$0xff]  ;;  %v6870_v23 = vld [vmem:[#allocation20_spill] sm:$0xff] }
 0x24d   :  { %v3326_v20 = vsel %vm6862_vm12, nan, %v3325_v39  ;;  %v3523_v11 = vand.u32 3, %v5945_v43  ;;  %vm1883_vm4 = vcmp.eq.s32.totalorder %v6171_v4, 0  ;;  %v3428_v22 = vsel %vm3421_vm15, %v3424_v18, %v3427_v7  ;;  %v6871_v39 = vld [vmem:[#allocation21_spill] sm:$0xff] }
 0x24e   :  { %v3626_v46 = vand.u32 3, %v6148_v26  ;;  %v3652_v12 = vrot.slane %v6152_v29, 7  ;;  %v3653_v38 = vrot.slane %v6175_v41, 7  ;;  %vm1882_vm1 = vcmp.lt.s32.totalorder %v6171_v4, 2 }
 0x24f   :  { %vm6863_vm6 = vweird.f32 %v4554_v3  ;;  %vm3524_vm10 = vcmp.lt.s32.totalorder %v3523_v11, 2  ;;  %vm3525_vm7 = vcmp.eq.s32.totalorder %v3523_v11, 0  ;;  %vm3528_vm14 = vcmp.eq.s32.totalorder %v3523_v11, 2  ;;  %v4025_v27 = vpop.eup %4024 }
 0x250   :  { %v3429_v16 = vsel %vm6863_vm6, nan, %v3428_v22  ;;  %vm1879_vm9 = vweird.f32 %v6759_v52  ;;  %v3527_v43 = vsel %vm3525_vm7, %v6221_v57, %v1780_v24  ;;  %v3530_v14 = vsel %vm3528_vm14, %v1783_v55, %v6226_v25 }
 0x251   :  { %vm3627_vm13 = vcmp.lt.s32.totalorder %v3626_v46, 2  ;;  %vm3628_vm15 = vcmp.eq.s32.totalorder %v3626_v46, 0  ;;  %v3531_v10 = vsel %vm3524_vm10, %v3527_v43, %v3530_v14  ;;  %vm3631_vm5 = vcmp.eq.s32.totalorder %v3626_v46, 2 }
 0x252   :  { %v3654_v3 = vrot.slane %v6190_v42, 7  ;;  %v3655_v33 = vrot.slane %v6202_v21, 7  ;;  %v3532_v26 = vsel %vm1775_vm11, nan, %v3531_v10  ;;  %v3656_v29 = vrot.slane %v6213_v40, 7  ;;  %v4027_v42 = vpop.eup %4026 }
 0x253   :  { %v3657_v41 = vrot.slane %v6231_v54, 7  ;;  %v3658_v24 = vrot.slane %v6259_v30, 7  ;;  %v3659_v57 = vrot.slane %v6276_v49, 7  ;;  %v3660_v25 = vrot.slane %v6288_v56, 7 }
 0x254   :  { %v3662_v55 = vrot.slane %v6303_v37, 7  ;;  %v3664_v31 = vrot.slane %v3120_v5, 7  ;;  %v1887_v61 = vxor.u32 2147483648, %v4025_v27  ;;  %v3666_v21 = vrot.slane %v3223_v59, 7 }
 0x255   :  { %v3668_v51 = vrot.slane %v3326_v20, 7  ;;  %v3670_v1 = vrot.slane %v3429_v16, 7  ;;  %v1884_v19 = vxor.u32 2147483648, %v4027_v42  ;;  %v3661_v40 = vsel %vm1907_vm8, %v3652_v12, %v3660_v25  ;;  %3881 = vst [vmem:[%s6483_s2 + $0x140] sm:$0x1] %v3660_v25 }
 0x256   :  { %v3663_v54 = vsel %vm1907_vm8, %v3653_v38, %v3662_v55  ;;  %v3665_v30 = vsel %vm1907_vm8, %v3654_v3, %v3664_v31  ;;  %3882 = vst [vmem:[%s6483_s2 + $0x148] sm:$0x1] %v3662_v55  ;;  %3883 = vst [vmem:[%s6483_s2 + $0x150] sm:$0x1] %v3664_v31  ;;  %v1888_v49 = vsel %vm1886_vm3, %v1887_v61, %v4027_v42  ;;  %v3672_v36 = vrot.slane %v3532_v26, 7 }
 0x257   :  { %v3633_v56 = vsel %vm3631_vm5, %v1887_v61, %v4027_v42  ;;  %v3667_v35 = vsel %vm1907_vm8, %v3655_v33, %v3666_v21  ;;  %v3669_v37 = vsel %vm1907_vm8, %v3656_v29, %v3668_v51  ;;  %3873 = vst [vmem:[%s6483_s2 + $0x100] sm:$0xff] %v3661_v40  ;;  %3874 = vst [vmem:[%s6483_s2 + $0x108] sm:$0xff] %v3663_v54 }
 0x258   :  { %3875 = vst [vmem:[%s6483_s2 + $0x110] sm:$0xff] %v3665_v30  ;;  %3884 = vst [vmem:[%s6483_s2 + $0x158] sm:$0x1] %v3666_v21  ;;  %v1885_v13 = vsel %vm1883_vm4, %v4025_v27, %v1884_v19  ;;  %v3630_v32 = vsel %vm3628_vm15, %v4025_v27, %v1884_v19  ;;  %v3671_v44 = vsel %vm1907_vm8, %v3657_v41, %v3670_v1 }
 0x259   :  { %3885 = vst [vmem:[%s6483_s2 + $0x160] sm:$0x1] %v3668_v51  ;;  %3886 = vst [vmem:[%s6483_s2 + $0x168] sm:$0x1] %v3670_v1  ;;  %v1889_v28 = vsel %vm1882_vm1, %v1885_v13, %v1888_v49  ;;  %v3634_v45 = vsel %vm3627_vm13, %v3630_v32, %v3633_v56  ;;  %v3700_v47 = vsel %vm1907_vm8, %v6864_v2, %v3652_v12 }
 0x25a   :  { %3876 = vst [vmem:[%s6483_s2 + $0x118] sm:$0xff] %v3667_v35  ;;  %3877 = vst [vmem:[%s6483_s2 + $0x120] sm:$0xff] %v3669_v37  ;;  %v3701_v17 = vsel %vm1907_vm8, %v6865_v53, %v3653_v38  ;;  %v1890_v34 = vsel %vm1879_vm9, nan, %v1889_v28  ;;  %v3635_v0 = vsel %vm1879_vm9, nan, %v3634_v45  ;;  %v3673_v4 = vsel %vm1907_vm8, %v3658_v24, %v3672_v36 }
 0x25b   :  { %3878 = vst [vmem:[%s6483_s2 + $0x128] sm:$0xff] %v3671_v44  ;;  %v3702_v60 = vsel %vm1907_vm8, %v6866_v9, %v3654_v3  ;;  %3865 = vst [vmem:[%s6483_s2 + $0xc0] sm:$0xff] %v3700_v47  ;;  %v1930_v5 = vrot.slane %v1890_v34, 7  ;;  %v3674_v52 = vrot.slane %v3635_v0, 7  ;;  %v3703_v50 = vsel %vm1907_vm8, %v6867_v63, %v3655_v33 }
 0x25c   :  { %3866 = vst [vmem:[%s6483_s2 + $0xc8] sm:$0xff] %v3701_v17  ;;  %3887 = vst [vmem:[%s6483_s2 + $0x170] sm:$0x1] %v3672_v36  ;;  %v3704_v6 = vsel %vm1907_vm8, %v6868_v48, %v3656_v29  ;;  %v3705_v58 = vsel %vm1907_vm8, %v6869_v15, %v3657_v41  ;;  %v3706_v59 = vsel %vm1907_vm8, %v6870_v23, %v3658_v24 }
 0x25d   :  { %3867 = vst [vmem:[%s6483_s2 + $0xd0] sm:$0xff] %v3702_v60  ;;  %3879 = vst [vmem:[%s6483_s2 + $0x130] sm:$0xff] %v3673_v4  ;;  %v3707_v20 = vsel %vm1907_vm8, %v6871_v39, %v3659_v57  ;;  %v1931_v18 = vsel %vm1907_vm8, %v1915_v8, %v1930_v5  ;;  %v3675_v7 = vsel %vm1907_vm8, %v3659_v57, %v3674_v52 }
 0x25e   :  { %3868 = vst [vmem:[%s6483_s2 + $0xd8] sm:$0xff] %v3703_v50  ;;  %3869 = vst [vmem:[%s6483_s2 + $0xe0] sm:$0xff] %v3704_v6 }
 0x25f   :  { %1987 = vst [vmem:[%s6483_s2 + $0xb8] sm:$0x1] %v1930_v5  ;;  %3870 = vst [vmem:[%s6483_s2 + $0xe8] sm:$0xff] %v3705_v58 }
 0x260   :  { %3871 = vst [vmem:[%s6483_s2 + $0xf0] sm:$0xff] %v3706_v59  ;;  %3872 = vst [vmem:[%s6483_s2 + $0xf8] sm:$0xff] %v3707_v20 }
 0x261   :  { %3888 = vst [vmem:[%s6483_s2 + $0x178] sm:$0x1] %v3674_v52  ;;  %1979 = vst [vmem:[%s6483_s2 + $0x78] sm:$0xff] %v1931_v18 }
 0x262   :  { %3880 = vst [vmem:[%s6483_s2 + $0x138] sm:$0xff] %v3675_v7 }

</bundles_post_ra>
